<compile_context>
chip_gen: v6e
topology: v6e:2x2x1
jax: 0.10.0
libtpu: 0.0.40
codegen_flags: <defaults>
</compile_context>

<pallas_src>
import jax
import jax.numpy as jnp
from jax.experimental import pallas as pl
from jax.experimental.pallas import tpu as pltpu  # noqa: F401  (kept for parity / future scratch use)

# Small hyper-parameters consistent with the module (defaults scaled down).
X_DIM = 16      # x_dim == y_dim
Z_DIM = 16      # z_dim (default)
H_DIM = 32      # dim_RNN_h
G_DIM = 32      # dim_RNN_g
D_MLP = 32      # dense_gz_z = dense_hz_z = dense_hz_x = [D_MLP, D_MLP]
SEQ = 8
BATCH = 2
BP = 8          # batch rows padded to one 8-sublane tile

# Slab-B packing relies on every MLP/head width being identical (all 32 here).
assert H_DIM == G_DIM
assert D_MLP == 2 * Z_DIM == 2 * X_DIM

# Lane layout of the single packed output slab.
OUT_WIDTH = 128
_OUT_Z = 0
_OUT_ZM = Z_DIM
_OUT_ZLV = 2 * Z_DIM
_OUT_PRIOR = 3 * Z_DIM
_OUT_Y = 3 * Z_DIM + 2 * Z_DIM
_OUT_USED = _OUT_Y + 2 * X_DIM          # 112 used, 16 pad lanes


# ----------------------------------------------------------------------------
# Parameter slab layout (row offsets are static; each section is padded to a
# multiple of 8 rows so every in-kernel slice is sublane-tile aligned).
# ----------------------------------------------------------------------------
def _layout(entries):
    offs, off = {}, 0
    for name, rows in entries:
        offs[name] = off
        off += -(-rows // 8) * 8
    return offs, off


# Slab A: 128-lane-wide LSTM parameters (gate order i, f, g, o).
_A_ENTRIES = [
    ('h_wih', X_DIM), ('h_whh', H_DIM), ('h_b', 1),
    ('g_wih', H_DIM + X_DIM), ('g_whh', G_DIM), ('g_b', 1),
]
_A_OFFS, _A_ROWS = _layout(_A_ENTRIES)

# Slab B: 32-lane-wide MLP / head parameters.
_B_ENTRIES = [
    ('gz_w1g', G_DIM), ('gz_w1z', Z_DIM), ('gz_b1', 1),
    ('gz_w2', D_MLP), ('gz_b2', 1),
    ('inf_w', D_MLP), ('inf_b', 1),
    ('zz_w1', H_DIM + Z_DIM), ('zz_b1', 1),
    ('zz_w2', D_MLP), ('zz_b2', 1),
    ('prior_w', D_MLP), ('prior_b', 1),
    ('zx_w1', H_DIM + Z_DIM), ('zx_b1', 1),
    ('zx_w2', D_MLP), ('zx_b2', 1),
    ('y_w', D_MLP), ('y_b', 1),
]
_B_OFFS, _B_ROWS = _layout(_B_ENTRIES)


# ----------------------------------------------------------------------------
# Fused SRNN forward kernel (single grid step; everything lives in VMEM/vregs).
# ----------------------------------------------------------------------------
def _srnn_fused_kernel(x_ref, eps_ref, wa_ref, wb_ref, out_ref):
    f32 = jnp.float32
    TB = x_ref.shape[0]
    T = TB // BP
    H, G, Z, X = H_DIM, G_DIM, Z_DIM, X_DIM

    def dot(a, b):
        return jnp.dot(a, b, preferred_element_type=f32)

    def pA(name, rows):                       # static, tile-aligned slab-A slice
        o = _A_OFFS[name]
        return wa_ref[o:o + rows, :]

    def pB(name, rows):                       # static, tile-aligned slab-B slice
        o = _B_OFFS[name]
        return wb_ref[o:o + rows, :]

    x2d = x_ref[...]                          # (T*BP, X)
    eps2d = eps_ref[...]                      # (T*BP, Z)

    def lstm_cell(gates_in, h, c, whh, n):
        # PyTorch LSTM gate order i, f, g, o. `gates` is (BP, 4n) == one vreg.
        gates = gates_in + dot(h, whh)
        i = jax.nn.sigmoid(gates[:, 0 * n:1 * n])
        f = jax.nn.sigmoid(gates[:, 1 * n:2 * n])
        g = jnp.tanh(gates[:, 2 * n:3 * n])
        o = jax.nn.sigmoid(gates[:, 3 * n:4 * n])
        c_new = f * c + i * g
        return o * jnp.tanh(c_new), c_new

    # ---- Phase 1: forward LSTM over x_tm1 (hoisted input projection) -------
    # x_tm1[t] = x[t-1] (zeros at t=0): row-block t-1 of proj_h feeds step t,
    # step 0 reduces to the fused bias alone.
    h_b = pA('h_b', 1)
    proj_h = dot(x2d, pA('h_wih', X)) + h_b               # one (T*BP, 4H) matmul
    h_whh = pA('h_whh', H)
    h_t = jnp.zeros((BP, H), f32)
    c_t = jnp.zeros((BP, H), f32)
    h_list = []
    for t in range(T):
        gates_in = h_b if t == 0 else proj_h[(t - 1) * BP:t * BP, :]
        h_t, c_t = lstm_cell(gates_in, h_t, c_t, h_whh, H)
        h_list.append(h_t)                                # stays in vregs
    h2d = jnp.concatenate(h_list, axis=0)                 # (T*BP, H)

    # ---- Phase 2: backward LSTM over cat(h, x) (fused K, hoisted) ----------
    hx = jnp.concatenate([h2d, x2d], axis=-1)             # (T*BP, H+X)
    proj_g = dot(hx, pA('g_wih', H + X)) + pA('g_b', 1)   # ONE matmul, K=48
    g_whh = pA('g_whh', G)
    g_t = jnp.zeros((BP, G), f32)
    c_t = jnp.zeros((BP, G), f32)
    g_list = [None] * T
    for t in range(T - 1, -1, -1):                        # == flip / rnn_g / flip
        g_t, c_t = lstm_cell(proj_g[t * BP:(t + 1) * BP, :], g_t, c_t, g_whh, G)
        g_list[t] = g_t
    g2d = jnp.concatenate(g_list, axis=0)                 # (T*BP, G)

    # ---- Phase 3: inference (serial over z_t; 3 matmuls on the chain) ------
    proj_gz = dot(g2d, pB('gz_w1g', G)) + pB('gz_b1', 1)  # hoisted g-side proj
    gz_w1z = pB('gz_w1z', Z)
    gz_w2 = pB('gz_w2', D_MLP)
    gz_b2 = pB('gz_b2', 1)
    inf_w = pB('inf_w', D_MLP)                            # packed [mean | logvar]
    inf_b = pB('inf_b', 1)
    z_prev = jnp.zeros((BP, Z), f32)
    z_list, m_list, lv_list = [], [], []
    for t in range(T):
        a1 = jnp.tanh(proj_gz[t * BP:(t + 1) * BP, :] + dot(z_prev, gz_w1z))
        a2 = jnp.tanh(dot(a1, gz_w2) + gz_b2)
        heads = dot(a2, inf_w) + inf_b                    # (BP, 2Z) single head matmul
        mean = heads[:, :Z]
        logvar = heads[:, Z:]
        z_prev = mean + eps2d[t * BP:(t + 1) * BP, :] * jnp.exp(0.5 * logvar)
        z_list.append(z_prev)
        m_list.append(mean)
        lv_list.append(logvar)
    z2d = jnp.concatenate(z_list, axis=0)                 # (T*BP, Z)
    mean2d = jnp.concatenate(m_list, axis=0)
    logvar2d = jnp.concatenate(lv_list, axis=0)
    z_tm1 = jnp.concatenate([jnp.zeros((BP, Z), f32)] + z_list[:-1], axis=0)

    # ---- Phase 4: generation_z (time folded into matmul M; fused K) --------
    hz = jnp.concatenate([h2d, z_tm1], axis=-1)           # (T*BP, H+Z)
    p1 = jnp.tanh(dot(hz, pB('zz_w1', H + Z)) + pB('zz_b1', 1))
    p2 = jnp.tanh(dot(p1, pB('zz_w2', D_MLP)) + pB('zz_b2', 1))
    prior2d = dot(p2, pB('prior_w', D_MLP)) + pB('prior_b', 1)   # [mean | logvar]

    # ---- Phase 5: generation_x (time folded; fused K) ----------------------
    hz2 = jnp.concatenate([h2d, z2d], axis=-1)            # (T*BP, H+Z)
    q1 = jnp.tanh(dot(hz2, pB('zx_w1', H + Z)) + pB('zx_b1', 1))
    q2 = jnp.tanh(dot(q1, pB('zx_w2', D_MLP)) + pB('zx_b2', 1))
    y2d = dot(q2, pB('y_w', D_MLP)) + pB('y_b', 1)        # [y_mean | y_var]

    # ---- Single lane-dense packed output store ------------------------------
    pad = jnp.zeros((TB, OUT_WIDTH - _OUT_USED), f32)
    out_ref[...] = jnp.concatenate(
        [z2d, mean2d, logvar2d, prior2d, y2d, pad], axis=-1)


# ----------------------------------------------------------------------------
# Parameter init (deterministic, synthetic).  Weights are stored transposed
# vs. PyTorch: (in_features, out_features); concat-inputs are pre-packed as
# stacked rows and two-head outputs are lane-packed.
# ----------------------------------------------------------------------------
def init_params(key):
    def nrm(k, shape, scale=0.1):
        return scale * jax.random.normal(k, shape, dtype=jnp.float32)

    ks = iter(jax.random.split(key, 64))
    p = {}
    # rnn_h : LSTM(x_dim -> H_DIM); gate order i, f, g, o; bias = b_ih + b_hh.
    p['h_wih'] = nrm(next(ks), (X_DIM, 4 * H_DIM))
    p['h_whh'] = nrm(next(ks), (H_DIM, 4 * H_DIM))
    p['h_b'] = nrm(next(ks), (1, 4 * H_DIM)) + nrm(next(ks), (1, 4 * H_DIM))
    # rnn_g : LSTM(H_DIM + x_dim -> G_DIM); input weight packed [h-rows ; x-rows].
    p['g_wih'] = nrm(next(ks), (H_DIM + X_DIM, 4 * G_DIM))
    p['g_whh'] = nrm(next(ks), (G_DIM, 4 * G_DIM))
    p['g_b'] = nrm(next(ks), (1, 4 * G_DIM)) + nrm(next(ks), (1, 4 * G_DIM))
    # mlp_gz_z (layer-1 split g / z because z_t is sequentially generated).
    p['gz_w1g'] = nrm(next(ks), (G_DIM, D_MLP))
    p['gz_w1z'] = nrm(next(ks), (Z_DIM, D_MLP))
    p['gz_b1'] = nrm(next(ks), (1, D_MLP))
    p['gz_w2'] = nrm(next(ks), (D_MLP, D_MLP))
    p['gz_b2'] = nrm(next(ks), (1, D_MLP))
    # inference heads, lane-packed [inf_mean | inf_logvar].
    p['inf_w'] = nrm(next(ks), (D_MLP, 2 * Z_DIM))
    p['inf_b'] = nrm(next(ks), (1, 2 * Z_DIM))
    # mlp_hz_z : layer-1 weight packed [h-rows ; z_tm1-rows]; prior heads packed.
    p['zz_w1'] = nrm(next(ks), (H_DIM + Z_DIM, D_MLP))
    p['zz_b1'] = nrm(next(ks), (1, D_MLP))
    p['zz_w2'] = nrm(next(ks), (D_MLP, D_MLP))
    p['zz_b2'] = nrm(next(ks), (1, D_MLP))
    p['prior_w'] = nrm(next(ks), (D_MLP, 2 * Z_DIM))
    p['prior_b'] = nrm(next(ks), (1, 2 * Z_DIM))
    # mlp_hz_x : layer-1 weight packed [h-rows ; z-rows]; y heads packed.
    p['zx_w1'] = nrm(next(ks), (H_DIM + Z_DIM, D_MLP))
    p['zx_b1'] = nrm(next(ks), (1, D_MLP))
    p['zx_w2'] = nrm(next(ks), (D_MLP, D_MLP))
    p['zx_b2'] = nrm(next(ks), (1, D_MLP))
    p['y_w'] = nrm(next(ks), (D_MLP, 2 * X_DIM))
    p['y_b'] = nrm(next(ks), (1, 2 * X_DIM))
    return p


def pack_params(p):
    """Pack the ~24 tiny parameter arrays into two slabs (2 input DMAs)."""
    slab_a = jnp.zeros((_A_ROWS, 4 * H_DIM), jnp.float32)
    for name, rows in _A_ENTRIES:
        o = _A_OFFS[name]
        slab_a = slab_a.at[o:o + rows, :].set(p[name])
    slab_b = jnp.zeros((_B_ROWS, D_MLP), jnp.float32)
    for name, rows in _B_ENTRIES:
        o = _B_OFFS[name]
        slab_b = slab_b.at[o:o + rows, :].set(p[name])
    return slab_a, slab_b


# ----------------------------------------------------------------------------
# Wrapper: pad batch to the 8-sublane tile, run the fused kernel, unpack.
# ----------------------------------------------------------------------------
def _pad_batch(a):
    T, B, D = a.shape
    return jnp.zeros((T, BP, D), a.dtype).at[:, :B, :].set(a).reshape(T * BP, D)


def srnn_forward(x, eps, slab_a, slab_b):
    T, B, X = x.shape
    Z = eps.shape[-1]
    x2d = _pad_batch(x)
    eps2d = _pad_batch(eps)

    out = pl.pallas_call(
        _srnn_fused_kernel,
        out_shape=jax.ShapeDtypeStruct((T * BP, OUT_WIDTH), jnp.float32),
        cost_estimate=pl.CostEstimate(
            flops=3_500_000, transcendentals=35_000, bytes_accessed=175_000),
    )(x2d, eps2d, slab_a, slab_b)

    full = out.reshape(T, BP, OUT_WIDTH)[:, :B, :]
    z = full[..., _OUT_Z:_OUT_Z + Z]
    z_mean = full[..., _OUT_ZM:_OUT_ZM + Z]
    z_logvar = full[..., _OUT_ZLV:_OUT_ZLV + Z]
    z_mean_p = full[..., _OUT_PRIOR:_OUT_PRIOR + Z]
    z_logvar_p = full[..., _OUT_PRIOR + Z:_OUT_PRIOR + 2 * Z]
    y_mean = full[..., _OUT_Y:_OUT_Y + X]
    y_var = full[..., _OUT_Y + X:_OUT_Y + 2 * X]
    # Mirrors the torch module exactly: y_var head is a raw linear output.
    y_lower = y_mean - 1.645 * y_var
    y_upper = y_mean + 1.645 * y_var
    # forward() returns y (= y_mean); the rest are attributes on the torch module.
    return y_mean, (z, z_mean, z_logvar, z_mean_p, z_logvar_p, y_lower, y_upper)


if __name__ == "__main__":
    root = jax.random.PRNGKey(0)
    k_param, k_x, k_eps = jax.random.split(root, 3)
    params = init_params(k_param)
    slab_a, slab_b = pack_params(params)     # one-time parameter packing
    x = jax.random.normal(k_x, (SEQ, BATCH, X_DIM), dtype=jnp.float32)
    # torch.randn_like(std) inside reparameterization -> precomputed deterministic eps
    eps = jax.random.normal(k_eps, (SEQ, BATCH, Z_DIM), dtype=jnp.float32)

    y, aux = jax.jit(srnn_forward)(x, eps, slab_a, slab_b)
    jax.block_until_ready(y)
    assert y.shape == (SEQ, BATCH, X_DIM)
    assert all(bool(jnp.all(jnp.isfinite(a))) for a in (y,) + aux)
    print("KERNEL_OK")
</pallas_src>

<mosaic_0001>
module attributes {stable_mosaic.version = 11 : i64} {
  func.func @_srnn_fused_kernel(%arg0: memref<64x16xf32, #tpu.memory_space<vmem>>, %arg1: memref<64x16xf32, #tpu.memory_space<vmem>>, %arg2: memref<144x128xf32, #tpu.memory_space<vmem>>, %arg3: memref<408x32xf32, #tpu.memory_space<vmem>>, %arg4: memref<64x128xf32, #tpu.memory_space<vmem>>) attributes {dimension_semantics = [], scalar_prefetch = 0 : i64, scratch_operands = 0 : i64, tpu.core_type = #tpu.core_type<tc>} {
    %c0 = arith.constant 0 : index
    %c0_0 = arith.constant 0 : index
    %0 = vector.load %arg0[%c0, %c0_0] : memref<64x16xf32, #tpu.memory_space<vmem>>, vector<64x16xf32>
    %c0_1 = arith.constant 0 : index
    %c0_2 = arith.constant 0 : index
    %1 = vector.load %arg1[%c0_1, %c0_2] : memref<64x16xf32, #tpu.memory_space<vmem>>, vector<64x16xf32>
    %c48 = arith.constant 48 : index
    %c0_3 = arith.constant 0 : index
    %2 = vector.load %arg2[%c48, %c0_3] : memref<144x128xf32, #tpu.memory_space<vmem>>, vector<1x128xf32>
    %c0_4 = arith.constant 0 : index
    %c0_5 = arith.constant 0 : index
    %3 = vector.load %arg2[%c0_4, %c0_5] : memref<144x128xf32, #tpu.memory_space<vmem>>, vector<16x128xf32>
    %cst = arith.constant dense<0.000000e+00> : vector<64x128xf32>
    %4 = tpu.matmul %0, %3, %cst {dimension_numbers = #tpu.dot_dimension_numbers<[1], [0], [0], [1], [0, 0, 1, 1], [], []>} : vector<64x16xf32>, vector<16x128xf32>, vector<64x128xf32> -> vector<64x128xf32>
    %5 = vector.broadcast %2 : vector<1x128xf32> to vector<64x128xf32>
    %6 = arith.addf %4, %5 : vector<64x128xf32>
    %c16 = arith.constant 16 : index
    %c0_6 = arith.constant 0 : index
    %7 = vector.load %arg2[%c16, %c0_6] : memref<144x128xf32, #tpu.memory_space<vmem>>, vector<32x128xf32>
    %cst_7 = arith.constant 0.000000e+00 : f32
    %8 = vector.broadcast %cst_7 : f32 to vector<8x32xf32>
    %cst_8 = arith.constant 0.000000e+00 : f32
    %9 = vector.broadcast %cst_8 : f32 to vector<8x32xf32>
    %cst_9 = arith.constant dense<0.000000e+00> : vector<8x128xf32>
    %10 = tpu.matmul %8, %7, %cst_9 {dimension_numbers = #tpu.dot_dimension_numbers<[1], [0], [0], [1], [0, 0, 1, 1], [], []>} : vector<8x32xf32>, vector<32x128xf32>, vector<8x128xf32> -> vector<8x128xf32>
    %11 = vector.broadcast %2 : vector<1x128xf32> to vector<8x128xf32>
    %12 = arith.addf %11, %10 : vector<8x128xf32>
    %13 = vector.extract_strided_slice %12 {offsets = [0, 0], sizes = [8, 32], strides = [1, 1]} : vector<8x128xf32> to vector<8x32xf32>
    %14 = arith.negf %13 : vector<8x32xf32>
    %15 = math.exp %14 : vector<8x32xf32>
    %cst_10 = arith.constant 1.000000e+00 : f32
    %16 = vector.broadcast %cst_10 : f32 to vector<8x32xf32>
    %17 = arith.addf %16, %15 : vector<8x32xf32>
    %18 = arith.divf %16, %17 : vector<8x32xf32>
    %19 = vector.extract_strided_slice %12 {offsets = [0, 32], sizes = [8, 32], strides = [1, 1]} : vector<8x128xf32> to vector<8x32xf32>
    %20 = arith.negf %19 : vector<8x32xf32>
    %21 = math.exp %20 : vector<8x32xf32>
    %cst_11 = arith.constant 1.000000e+00 : f32
    %22 = vector.broadcast %cst_11 : f32 to vector<8x32xf32>
    %23 = arith.addf %22, %21 : vector<8x32xf32>
    %24 = arith.divf %22, %23 : vector<8x32xf32>
    %25 = vector.extract_strided_slice %12 {offsets = [0, 64], sizes = [8, 32], strides = [1, 1]} : vector<8x128xf32> to vector<8x32xf32>
    %26 = math.tanh %25 : vector<8x32xf32>
    %27 = vector.extract_strided_slice %12 {offsets = [0, 96], sizes = [8, 32], strides = [1, 1]} : vector<8x128xf32> to vector<8x32xf32>
    %28 = arith.negf %27 : vector<8x32xf32>
    %29 = math.exp %28 : vector<8x32xf32>
    %cst_12 = arith.constant 1.000000e+00 : f32
    %30 = vector.broadcast %cst_12 : f32 to vector<8x32xf32>
    %31 = arith.addf %30, %29 : vector<8x32xf32>
    %32 = arith.divf %30, %31 : vector<8x32xf32>
    %33 = arith.mulf %24, %9 : vector<8x32xf32>
    %34 = arith.mulf %18, %26 : vector<8x32xf32>
    %35 = arith.addf %33, %34 : vector<8x32xf32>
    %36 = math.tanh %35 : vector<8x32xf32>
    %37 = arith.mulf %32, %36 : vector<8x32xf32>
    %38 = vector.extract_strided_slice %6 {offsets = [0, 0], sizes = [8, 128], strides = [1, 1]} : vector<64x128xf32> to vector<8x128xf32>
    %cst_13 = arith.constant dense<0.000000e+00> : vector<8x128xf32>
    %39 = tpu.matmul %37, %7, %cst_13 {dimension_numbers = #tpu.dot_dimension_numbers<[1], [0], [0], [1], [0, 0, 1, 1], [], []>} : vector<8x32xf32>, vector<32x128xf32>, vector<8x128xf32> -> vector<8x128xf32>
    %40 = arith.addf %38, %39 : vector<8x128xf32>
    %41 = vector.extract_strided_slice %40 {offsets = [0, 0], sizes = [8, 32], strides = [1, 1]} : vector<8x128xf32> to vector<8x32xf32>
    %42 = arith.negf %41 : vector<8x32xf32>
    %43 = math.exp %42 : vector<8x32xf32>
    %cst_14 = arith.constant 1.000000e+00 : f32
    %44 = vector.broadcast %cst_14 : f32 to vector<8x32xf32>
    %45 = arith.addf %44, %43 : vector<8x32xf32>
    %46 = arith.divf %44, %45 : vector<8x32xf32>
    %47 = vector.extract_strided_slice %40 {offsets = [0, 32], sizes = [8, 32], strides = [1, 1]} : vector<8x128xf32> to vector<8x32xf32>
    %48 = arith.negf %47 : vector<8x32xf32>
    %49 = math.exp %48 : vector<8x32xf32>
    %cst_15 = arith.constant 1.000000e+00 : f32
    %50 = vector.broadcast %cst_15 : f32 to vector<8x32xf32>
    %51 = arith.addf %50, %49 : vector<8x32xf32>
    %52 = arith.divf %50, %51 : vector<8x32xf32>
    %53 = vector.extract_strided_slice %40 {offsets = [0, 64], sizes = [8, 32], strides = [1, 1]} : vector<8x128xf32> to vector<8x32xf32>
    %54 = math.tanh %53 : vector<8x32xf32>
    %55 = vector.extract_strided_slice %40 {offsets = [0, 96], sizes = [8, 32], strides = [1, 1]} : vector<8x128xf32> to vector<8x32xf32>
    %56 = arith.negf %55 : vector<8x32xf32>
    %57 = math.exp %56 : vector<8x32xf32>
    %cst_16 = arith.constant 1.000000e+00 : f32
    %58 = vector.broadcast %cst_16 : f32 to vector<8x32xf32>
    %59 = arith.addf %58, %57 : vector<8x32xf32>
    %60 = arith.divf %58, %59 : vector<8x32xf32>
    %61 = arith.mulf %52, %35 : vector<8x32xf32>
    %62 = arith.mulf %46, %54 : vector<8x32xf32>
    %63 = arith.addf %61, %62 : vector<8x32xf32>
    %64 = math.tanh %63 : vector<8x32xf32>
    %65 = arith.mulf %60, %64 : vector<8x32xf32>
    %66 = vector.extract_strided_slice %6 {offsets = [8, 0], sizes = [8, 128], strides = [1, 1]} : vector<64x128xf32> to vector<8x128xf32>
    %cst_17 = arith.constant dense<0.000000e+00> : vector<8x128xf32>
    %67 = tpu.matmul %65, %7, %cst_17 {dimension_numbers = #tpu.dot_dimension_numbers<[1], [0], [0], [1], [0, 0, 1, 1], [], []>} : vector<8x32xf32>, vector<32x128xf32>, vector<8x128xf32> -> vector<8x128xf32>
    %68 = arith.addf %66, %67 : vector<8x128xf32>
    %69 = vector.extract_strided_slice %68 {offsets = [0, 0], sizes = [8, 32], strides = [1, 1]} : vector<8x128xf32> to vector<8x32xf32>
    %70 = arith.negf %69 : vector<8x32xf32>
    %71 = math.exp %70 : vector<8x32xf32>
    %cst_18 = arith.constant 1.000000e+00 : f32
    %72 = vector.broadcast %cst_18 : f32 to vector<8x32xf32>
    %73 = arith.addf %72, %71 : vector<8x32xf32>
    %74 = arith.divf %72, %73 : vector<8x32xf32>
    %75 = vector.extract_strided_slice %68 {offsets = [0, 32], sizes = [8, 32], strides = [1, 1]} : vector<8x128xf32> to vector<8x32xf32>
    %76 = arith.negf %75 : vector<8x32xf32>
    %77 = math.exp %76 : vector<8x32xf32>
    %cst_19 = arith.constant 1.000000e+00 : f32
    %78 = vector.broadcast %cst_19 : f32 to vector<8x32xf32>
    %79 = arith.addf %78, %77 : vector<8x32xf32>
    %80 = arith.divf %78, %79 : vector<8x32xf32>
    %81 = vector.extract_strided_slice %68 {offsets = [0, 64], sizes = [8, 32], strides = [1, 1]} : vector<8x128xf32> to vector<8x32xf32>
    %82 = math.tanh %81 : vector<8x32xf32>
    %83 = vector.extract_strided_slice %68 {offsets = [0, 96], sizes = [8, 32], strides = [1, 1]} : vector<8x128xf32> to vector<8x32xf32>
    %84 = arith.negf %83 : vector<8x32xf32>
    %85 = math.exp %84 : vector<8x32xf32>
    %cst_20 = arith.constant 1.000000e+00 : f32
    %86 = vector.broadcast %cst_20 : f32 to vector<8x32xf32>
    %87 = arith.addf %86, %85 : vector<8x32xf32>
    %88 = arith.divf %86, %87 : vector<8x32xf32>
    %89 = arith.mulf %80, %63 : vector<8x32xf32>
    %90 = arith.mulf %74, %82 : vector<8x32xf32>
    %91 = arith.addf %89, %90 : vector<8x32xf32>
    %92 = math.tanh %91 : vector<8x32xf32>
    %93 = arith.mulf %88, %92 : vector<8x32xf32>
    %94 = vector.extract_strided_slice %6 {offsets = [16, 0], sizes = [8, 128], strides = [1, 1]} : vector<64x128xf32> to vector<8x128xf32>
    %cst_21 = arith.constant dense<0.000000e+00> : vector<8x128xf32>
    %95 = tpu.matmul %93, %7, %cst_21 {dimension_numbers = #tpu.dot_dimension_numbers<[1], [0], [0], [1], [0, 0, 1, 1], [], []>} : vector<8x32xf32>, vector<32x128xf32>, vector<8x128xf32> -> vector<8x128xf32>
    %96 = arith.addf %94, %95 : vector<8x128xf32>
    %97 = vector.extract_strided_slice %96 {offsets = [0, 0], sizes = [8, 32], strides = [1, 1]} : vector<8x128xf32> to vector<8x32xf32>
    %98 = arith.negf %97 : vector<8x32xf32>
    %99 = math.exp %98 : vector<8x32xf32>
    %cst_22 = arith.constant 1.000000e+00 : f32
    %100 = vector.broadcast %cst_22 : f32 to vector<8x32xf32>
    %101 = arith.addf %100, %99 : vector<8x32xf32>
    %102 = arith.divf %100, %101 : vector<8x32xf32>
    %103 = vector.extract_strided_slice %96 {offsets = [0, 32], sizes = [8, 32], strides = [1, 1]} : vector<8x128xf32> to vector<8x32xf32>
    %104 = arith.negf %103 : vector<8x32xf32>
    %105 = math.exp %104 : vector<8x32xf32>
    %cst_23 = arith.constant 1.000000e+00 : f32
    %106 = vector.broadcast %cst_23 : f32 to vector<8x32xf32>
    %107 = arith.addf %106, %105 : vector<8x32xf32>
    %108 = arith.divf %106, %107 : vector<8x32xf32>
    %109 = vector.extract_strided_slice %96 {offsets = [0, 64], sizes = [8, 32], strides = [1, 1]} : vector<8x128xf32> to vector<8x32xf32>
    %110 = math.tanh %109 : vector<8x32xf32>
    %111 = vector.extract_strided_slice %96 {offsets = [0, 96], sizes = [8, 32], strides = [1, 1]} : vector<8x128xf32> to vector<8x32xf32>
    %112 = arith.negf %111 : vector<8x32xf32>
    %113 = math.exp %112 : vector<8x32xf32>
    %cst_24 = arith.constant 1.000000e+00 : f32
    %114 = vector.broadcast %cst_24 : f32 to vector<8x32xf32>
    %115 = arith.addf %114, %113 : vector<8x32xf32>
    %116 = arith.divf %114, %115 : vector<8x32xf32>
    %117 = arith.mulf %108, %91 : vector<8x32xf32>
    %118 = arith.mulf %102, %110 : vector<8x32xf32>
    %119 = arith.addf %117, %118 : vector<8x32xf32>
    %120 = math.tanh %119 : vector<8x32xf32>
    %121 = arith.mulf %116, %120 : vector<8x32xf32>
    %122 = vector.extract_strided_slice %6 {offsets = [24, 0], sizes = [8, 128], strides = [1, 1]} : vector<64x128xf32> to vector<8x128xf32>
    %cst_25 = arith.constant dense<0.000000e+00> : vector<8x128xf32>
    %123 = tpu.matmul %121, %7, %cst_25 {dimension_numbers = #tpu.dot_dimension_numbers<[1], [0], [0], [1], [0, 0, 1, 1], [], []>} : vector<8x32xf32>, vector<32x128xf32>, vector<8x128xf32> -> vector<8x128xf32>
    %124 = arith.addf %122, %123 : vector<8x128xf32>
    %125 = vector.extract_strided_slice %124 {offsets = [0, 0], sizes = [8, 32], strides = [1, 1]} : vector<8x128xf32> to vector<8x32xf32>
    %126 = arith.negf %125 : vector<8x32xf32>
    %127 = math.exp %126 : vector<8x32xf32>
    %cst_26 = arith.constant 1.000000e+00 : f32
    %128 = vector.broadcast %cst_26 : f32 to vector<8x32xf32>
    %129 = arith.addf %128, %127 : vector<8x32xf32>
    %130 = arith.divf %128, %129 : vector<8x32xf32>
    %131 = vector.extract_strided_slice %124 {offsets = [0, 32], sizes = [8, 32], strides = [1, 1]} : vector<8x128xf32> to vector<8x32xf32>
    %132 = arith.negf %131 : vector<8x32xf32>
    %133 = math.exp %132 : vector<8x32xf32>
    %cst_27 = arith.constant 1.000000e+00 : f32
    %134 = vector.broadcast %cst_27 : f32 to vector<8x32xf32>
    %135 = arith.addf %134, %133 : vector<8x32xf32>
    %136 = arith.divf %134, %135 : vector<8x32xf32>
    %137 = vector.extract_strided_slice %124 {offsets = [0, 64], sizes = [8, 32], strides = [1, 1]} : vector<8x128xf32> to vector<8x32xf32>
    %138 = math.tanh %137 : vector<8x32xf32>
    %139 = vector.extract_strided_slice %124 {offsets = [0, 96], sizes = [8, 32], strides = [1, 1]} : vector<8x128xf32> to vector<8x32xf32>
    %140 = arith.negf %139 : vector<8x32xf32>
    %141 = math.exp %140 : vector<8x32xf32>
    %cst_28 = arith.constant 1.000000e+00 : f32
    %142 = vector.broadcast %cst_28 : f32 to vector<8x32xf32>
    %143 = arith.addf %142, %141 : vector<8x32xf32>
    %144 = arith.divf %142, %143 : vector<8x32xf32>
    %145 = arith.mulf %136, %119 : vector<8x32xf32>
    %146 = arith.mulf %130, %138 : vector<8x32xf32>
    %147 = arith.addf %145, %146 : vector<8x32xf32>
    %148 = math.tanh %147 : vector<8x32xf32>
    %149 = arith.mulf %144, %148 : vector<8x32xf32>
    %150 = vector.extract_strided_slice %6 {offsets = [32, 0], sizes = [8, 128], strides = [1, 1]} : vector<64x128xf32> to vector<8x128xf32>
    %cst_29 = arith.constant dense<0.000000e+00> : vector<8x128xf32>
    %151 = tpu.matmul %149, %7, %cst_29 {dimension_numbers = #tpu.dot_dimension_numbers<[1], [0], [0], [1], [0, 0, 1, 1], [], []>} : vector<8x32xf32>, vector<32x128xf32>, vector<8x128xf32> -> vector<8x128xf32>
    %152 = arith.addf %150, %151 : vector<8x128xf32>
    %153 = vector.extract_strided_slice %152 {offsets = [0, 0], sizes = [8, 32], strides = [1, 1]} : vector<8x128xf32> to vector<8x32xf32>
    %154 = arith.negf %153 : vector<8x32xf32>
    %155 = math.exp %154 : vector<8x32xf32>
    %cst_30 = arith.constant 1.000000e+00 : f32
    %156 = vector.broadcast %cst_30 : f32 to vector<8x32xf32>
    %157 = arith.addf %156, %155 : vector<8x32xf32>
    %158 = arith.divf %156, %157 : vector<8x32xf32>
    %159 = vector.extract_strided_slice %152 {offsets = [0, 32], sizes = [8, 32], strides = [1, 1]} : vector<8x128xf32> to vector<8x32xf32>
    %160 = arith.negf %159 : vector<8x32xf32>
    %161 = math.exp %160 : vector<8x32xf32>
    %cst_31 = arith.constant 1.000000e+00 : f32
    %162 = vector.broadcast %cst_31 : f32 to vector<8x32xf32>
    %163 = arith.addf %162, %161 : vector<8x32xf32>
    %164 = arith.divf %162, %163 : vector<8x32xf32>
    %165 = vector.extract_strided_slice %152 {offsets = [0, 64], sizes = [8, 32], strides = [1, 1]} : vector<8x128xf32> to vector<8x32xf32>
    %166 = math.tanh %165 : vector<8x32xf32>
    %167 = vector.extract_strided_slice %152 {offsets = [0, 96], sizes = [8, 32], strides = [1, 1]} : vector<8x128xf32> to vector<8x32xf32>
    %168 = arith.negf %167 : vector<8x32xf32>
    %169 = math.exp %168 : vector<8x32xf32>
    %cst_32 = arith.constant 1.000000e+00 : f32
    %170 = vector.broadcast %cst_32 : f32 to vector<8x32xf32>
    %171 = arith.addf %170, %169 : vector<8x32xf32>
    %172 = arith.divf %170, %171 : vector<8x32xf32>
    %173 = arith.mulf %164, %147 : vector<8x32xf32>
    %174 = arith.mulf %158, %166 : vector<8x32xf32>
    %175 = arith.addf %173, %174 : vector<8x32xf32>
    %176 = math.tanh %175 : vector<8x32xf32>
    %177 = arith.mulf %172, %176 : vector<8x32xf32>
    %178 = vector.extract_strided_slice %6 {offsets = [40, 0], sizes = [8, 128], strides = [1, 1]} : vector<64x128xf32> to vector<8x128xf32>
    %cst_33 = arith.constant dense<0.000000e+00> : vector<8x128xf32>
    %179 = tpu.matmul %177, %7, %cst_33 {dimension_numbers = #tpu.dot_dimension_numbers<[1], [0], [0], [1], [0, 0, 1, 1], [], []>} : vector<8x32xf32>, vector<32x128xf32>, vector<8x128xf32> -> vector<8x128xf32>
    %180 = arith.addf %178, %179 : vector<8x128xf32>
    %181 = vector.extract_strided_slice %180 {offsets = [0, 0], sizes = [8, 32], strides = [1, 1]} : vector<8x128xf32> to vector<8x32xf32>
    %182 = arith.negf %181 : vector<8x32xf32>
    %183 = math.exp %182 : vector<8x32xf32>
    %cst_34 = arith.constant 1.000000e+00 : f32
    %184 = vector.broadcast %cst_34 : f32 to vector<8x32xf32>
    %185 = arith.addf %184, %183 : vector<8x32xf32>
    %186 = arith.divf %184, %185 : vector<8x32xf32>
    %187 = vector.extract_strided_slice %180 {offsets = [0, 32], sizes = [8, 32], strides = [1, 1]} : vector<8x128xf32> to vector<8x32xf32>
    %188 = arith.negf %187 : vector<8x32xf32>
    %189 = math.exp %188 : vector<8x32xf32>
    %cst_35 = arith.constant 1.000000e+00 : f32
    %190 = vector.broadcast %cst_35 : f32 to vector<8x32xf32>
    %191 = arith.addf %190, %189 : vector<8x32xf32>
    %192 = arith.divf %190, %191 : vector<8x32xf32>
    %193 = vector.extract_strided_slice %180 {offsets = [0, 64], sizes = [8, 32], strides = [1, 1]} : vector<8x128xf32> to vector<8x32xf32>
    %194 = math.tanh %193 : vector<8x32xf32>
    %195 = vector.extract_strided_slice %180 {offsets = [0, 96], sizes = [8, 32], strides = [1, 1]} : vector<8x128xf32> to vector<8x32xf32>
    %196 = arith.negf %195 : vector<8x32xf32>
    %197 = math.exp %196 : vector<8x32xf32>
    %cst_36 = arith.constant 1.000000e+00 : f32
    %198 = vector.broadcast %cst_36 : f32 to vector<8x32xf32>
    %199 = arith.addf %198, %197 : vector<8x32xf32>
    %200 = arith.divf %198, %199 : vector<8x32xf32>
    %201 = arith.mulf %192, %175 : vector<8x32xf32>
    %202 = arith.mulf %186, %194 : vector<8x32xf32>
    %203 = arith.addf %201, %202 : vector<8x32xf32>
    %204 = math.tanh %203 : vector<8x32xf32>
    %205 = arith.mulf %200, %204 : vector<8x32xf32>
    %206 = vector.extract_strided_slice %6 {offsets = [48, 0], sizes = [8, 128], strides = [1, 1]} : vector<64x128xf32> to vector<8x128xf32>
    %cst_37 = arith.constant dense<0.000000e+00> : vector<8x128xf32>
    %207 = tpu.matmul %205, %7, %cst_37 {dimension_numbers = #tpu.dot_dimension_numbers<[1], [0], [0], [1], [0, 0, 1, 1], [], []>} : vector<8x32xf32>, vector<32x128xf32>, vector<8x128xf32> -> vector<8x128xf32>
    %208 = arith.addf %206, %207 : vector<8x128xf32>
    %209 = vector.extract_strided_slice %208 {offsets = [0, 0], sizes = [8, 32], strides = [1, 1]} : vector<8x128xf32> to vector<8x32xf32>
    %210 = arith.negf %209 : vector<8x32xf32>
    %211 = math.exp %210 : vector<8x32xf32>
    %cst_38 = arith.constant 1.000000e+00 : f32
    %212 = vector.broadcast %cst_38 : f32 to vector<8x32xf32>
    %213 = arith.addf %212, %211 : vector<8x32xf32>
    %214 = arith.divf %212, %213 : vector<8x32xf32>
    %215 = vector.extract_strided_slice %208 {offsets = [0, 32], sizes = [8, 32], strides = [1, 1]} : vector<8x128xf32> to vector<8x32xf32>
    %216 = arith.negf %215 : vector<8x32xf32>
    %217 = math.exp %216 : vector<8x32xf32>
    %cst_39 = arith.constant 1.000000e+00 : f32
    %218 = vector.broadcast %cst_39 : f32 to vector<8x32xf32>
    %219 = arith.addf %218, %217 : vector<8x32xf32>
    %220 = arith.divf %218, %219 : vector<8x32xf32>
    %221 = vector.extract_strided_slice %208 {offsets = [0, 64], sizes = [8, 32], strides = [1, 1]} : vector<8x128xf32> to vector<8x32xf32>
    %222 = math.tanh %221 : vector<8x32xf32>
    %223 = vector.extract_strided_slice %208 {offsets = [0, 96], sizes = [8, 32], strides = [1, 1]} : vector<8x128xf32> to vector<8x32xf32>
    %224 = arith.negf %223 : vector<8x32xf32>
    %225 = math.exp %224 : vector<8x32xf32>
    %cst_40 = arith.constant 1.000000e+00 : f32
    %226 = vector.broadcast %cst_40 : f32 to vector<8x32xf32>
    %227 = arith.addf %226, %225 : vector<8x32xf32>
    %228 = arith.divf %226, %227 : vector<8x32xf32>
    %229 = arith.mulf %220, %203 : vector<8x32xf32>
    %230 = arith.mulf %214, %222 : vector<8x32xf32>
    %231 = arith.addf %229, %230 : vector<8x32xf32>
    %232 = math.tanh %231 : vector<8x32xf32>
    %233 = arith.mulf %228, %232 : vector<8x32xf32>
    %234 = tpu.concatenate %37, %65, %93, %121, %149, %177, %205, %233 in 0 : vector<8x32xf32>, vector<8x32xf32>, vector<8x32xf32>, vector<8x32xf32>, vector<8x32xf32>, vector<8x32xf32>, vector<8x32xf32>, vector<8x32xf32> -> vector<64x32xf32>
    %235 = tpu.concatenate %234, %0 in 1 : vector<64x32xf32>, vector<64x16xf32> -> vector<64x48xf32>
    %c56 = arith.constant 56 : index
    %c0_41 = arith.constant 0 : index
    %236 = vector.load %arg2[%c56, %c0_41] : memref<144x128xf32, #tpu.memory_space<vmem>>, vector<48x128xf32>
    %cst_42 = arith.constant dense<0.000000e+00> : vector<64x128xf32>
    %237 = tpu.matmul %235, %236, %cst_42 {dimension_numbers = #tpu.dot_dimension_numbers<[1], [0], [0], [1], [0, 0, 1, 1], [], []>} : vector<64x48xf32>, vector<48x128xf32>, vector<64x128xf32> -> vector<64x128xf32>
    %c136 = arith.constant 136 : index
    %c0_43 = arith.constant 0 : index
    %238 = vector.load %arg2[%c136, %c0_43] : memref<144x128xf32, #tpu.memory_space<vmem>>, vector<1x128xf32>
    %239 = vector.broadcast %238 : vector<1x128xf32> to vector<64x128xf32>
    %240 = arith.addf %237, %239 : vector<64x128xf32>
    %c104 = arith.constant 104 : index
    %c0_44 = arith.constant 0 : index
    %241 = vector.load %arg2[%c104, %c0_44] : memref<144x128xf32, #tpu.memory_space<vmem>>, vector<32x128xf32>
    %cst_45 = arith.constant 0.000000e+00 : f32
    %242 = vector.broadcast %cst_45 : f32 to vector<8x32xf32>
    %cst_46 = arith.constant 0.000000e+00 : f32
    %243 = vector.broadcast %cst_46 : f32 to vector<8x32xf32>
    %244 = vector.extract_strided_slice %240 {offsets = [56, 0], sizes = [8, 128], strides = [1, 1]} : vector<64x128xf32> to vector<8x128xf32>
    %cst_47 = arith.constant dense<0.000000e+00> : vector<8x128xf32>
    %245 = tpu.matmul %242, %241, %cst_47 {dimension_numbers = #tpu.dot_dimension_numbers<[1], [0], [0], [1], [0, 0, 1, 1], [], []>} : vector<8x32xf32>, vector<32x128xf32>, vector<8x128xf32> -> vector<8x128xf32>
    %246 = arith.addf %244, %245 : vector<8x128xf32>
    %247 = vector.extract_strided_slice %246 {offsets = [0, 0], sizes = [8, 32], strides = [1, 1]} : vector<8x128xf32> to vector<8x32xf32>
    %248 = arith.negf %247 : vector<8x32xf32>
    %249 = math.exp %248 : vector<8x32xf32>
    %cst_48 = arith.constant 1.000000e+00 : f32
    %250 = vector.broadcast %cst_48 : f32 to vector<8x32xf32>
    %251 = arith.addf %250, %249 : vector<8x32xf32>
    %252 = arith.divf %250, %251 : vector<8x32xf32>
    %253 = vector.extract_strided_slice %246 {offsets = [0, 32], sizes = [8, 32], strides = [1, 1]} : vector<8x128xf32> to vector<8x32xf32>
    %254 = arith.negf %253 : vector<8x32xf32>
    %255 = math.exp %254 : vector<8x32xf32>
    %cst_49 = arith.constant 1.000000e+00 : f32
    %256 = vector.broadcast %cst_49 : f32 to vector<8x32xf32>
    %257 = arith.addf %256, %255 : vector<8x32xf32>
    %258 = arith.divf %256, %257 : vector<8x32xf32>
    %259 = vector.extract_strided_slice %246 {offsets = [0, 64], sizes = [8, 32], strides = [1, 1]} : vector<8x128xf32> to vector<8x32xf32>
    %260 = math.tanh %259 : vector<8x32xf32>
    %261 = vector.extract_strided_slice %246 {offsets = [0, 96], sizes = [8, 32], strides = [1, 1]} : vector<8x128xf32> to vector<8x32xf32>
    %262 = arith.negf %261 : vector<8x32xf32>
    %263 = math.exp %262 : vector<8x32xf32>
    %cst_50 = arith.constant 1.000000e+00 : f32
    %264 = vector.broadcast %cst_50 : f32 to vector<8x32xf32>
    %265 = arith.addf %264, %263 : vector<8x32xf32>
    %266 = arith.divf %264, %265 : vector<8x32xf32>
    %267 = arith.mulf %258, %243 : vector<8x32xf32>
    %268 = arith.mulf %252, %260 : vector<8x32xf32>
    %269 = arith.addf %267, %268 : vector<8x32xf32>
    %270 = math.tanh %269 : vector<8x32xf32>
    %271 = arith.mulf %266, %270 : vector<8x32xf32>
    %272 = vector.extract_strided_slice %240 {offsets = [48, 0], sizes = [8, 128], strides = [1, 1]} : vector<64x128xf32> to vector<8x128xf32>
    %cst_51 = arith.constant dense<0.000000e+00> : vector<8x128xf32>
    %273 = tpu.matmul %271, %241, %cst_51 {dimension_numbers = #tpu.dot_dimension_numbers<[1], [0], [0], [1], [0, 0, 1, 1], [], []>} : vector<8x32xf32>, vector<32x128xf32>, vector<8x128xf32> -> vector<8x128xf32>
    %274 = arith.addf %272, %273 : vector<8x128xf32>
    %275 = vector.extract_strided_slice %274 {offsets = [0, 0], sizes = [8, 32], strides = [1, 1]} : vector<8x128xf32> to vector<8x32xf32>
    %276 = arith.negf %275 : vector<8x32xf32>
    %277 = math.exp %276 : vector<8x32xf32>
    %cst_52 = arith.constant 1.000000e+00 : f32
    %278 = vector.broadcast %cst_52 : f32 to vector<8x32xf32>
    %279 = arith.addf %278, %277 : vector<8x32xf32>
    %280 = arith.divf %278, %279 : vector<8x32xf32>
    %281 = vector.extract_strided_slice %274 {offsets = [0, 32], sizes = [8, 32], strides = [1, 1]} : vector<8x128xf32> to vector<8x32xf32>
    %282 = arith.negf %281 : vector<8x32xf32>
    %283 = math.exp %282 : vector<8x32xf32>
    %cst_53 = arith.constant 1.000000e+00 : f32
    %284 = vector.broadcast %cst_53 : f32 to vector<8x32xf32>
    %285 = arith.addf %284, %283 : vector<8x32xf32>
    %286 = arith.divf %284, %285 : vector<8x32xf32>
    %287 = vector.extract_strided_slice %274 {offsets = [0, 64], sizes = [8, 32], strides = [1, 1]} : vector<8x128xf32> to vector<8x32xf32>
    %288 = math.tanh %287 : vector<8x32xf32>
    %289 = vector.extract_strided_slice %274 {offsets = [0, 96], sizes = [8, 32], strides = [1, 1]} : vector<8x128xf32> to vector<8x32xf32>
    %290 = arith.negf %289 : vector<8x32xf32>
    %291 = math.exp %290 : vector<8x32xf32>
    %cst_54 = arith.constant 1.000000e+00 : f32
    %292 = vector.broadcast %cst_54 : f32 to vector<8x32xf32>
    %293 = arith.addf %292, %291 : vector<8x32xf32>
    %294 = arith.divf %292, %293 : vector<8x32xf32>
    %295 = arith.mulf %286, %269 : vector<8x32xf32>
    %296 = arith.mulf %280, %288 : vector<8x32xf32>
    %297 = arith.addf %295, %296 : vector<8x32xf32>
    %298 = math.tanh %297 : vector<8x32xf32>
    %299 = arith.mulf %294, %298 : vector<8x32xf32>
    %300 = vector.extract_strided_slice %240 {offsets = [40, 0], sizes = [8, 128], strides = [1, 1]} : vector<64x128xf32> to vector<8x128xf32>
    %cst_55 = arith.constant dense<0.000000e+00> : vector<8x128xf32>
    %301 = tpu.matmul %299, %241, %cst_55 {dimension_numbers = #tpu.dot_dimension_numbers<[1], [0], [0], [1], [0, 0, 1, 1], [], []>} : vector<8x32xf32>, vector<32x128xf32>, vector<8x128xf32> -> vector<8x128xf32>
    %302 = arith.addf %300, %301 : vector<8x128xf32>
    %303 = vector.extract_strided_slice %302 {offsets = [0, 0], sizes = [8, 32], strides = [1, 1]} : vector<8x128xf32> to vector<8x32xf32>
    %304 = arith.negf %303 : vector<8x32xf32>
    %305 = math.exp %304 : vector<8x32xf32>
    %cst_56 = arith.constant 1.000000e+00 : f32
    %306 = vector.broadcast %cst_56 : f32 to vector<8x32xf32>
    %307 = arith.addf %306, %305 : vector<8x32xf32>
    %308 = arith.divf %306, %307 : vector<8x32xf32>
    %309 = vector.extract_strided_slice %302 {offsets = [0, 32], sizes = [8, 32], strides = [1, 1]} : vector<8x128xf32> to vector<8x32xf32>
    %310 = arith.negf %309 : vector<8x32xf32>
    %311 = math.exp %310 : vector<8x32xf32>
    %cst_57 = arith.constant 1.000000e+00 : f32
    %312 = vector.broadcast %cst_57 : f32 to vector<8x32xf32>
    %313 = arith.addf %312, %311 : vector<8x32xf32>
    %314 = arith.divf %312, %313 : vector<8x32xf32>
    %315 = vector.extract_strided_slice %302 {offsets = [0, 64], sizes = [8, 32], strides = [1, 1]} : vector<8x128xf32> to vector<8x32xf32>
    %316 = math.tanh %315 : vector<8x32xf32>
    %317 = vector.extract_strided_slice %302 {offsets = [0, 96], sizes = [8, 32], strides = [1, 1]} : vector<8x128xf32> to vector<8x32xf32>
    %318 = arith.negf %317 : vector<8x32xf32>
    %319 = math.exp %318 : vector<8x32xf32>
    %cst_58 = arith.constant 1.000000e+00 : f32
    %320 = vector.broadcast %cst_58 : f32 to vector<8x32xf32>
    %321 = arith.addf %320, %319 : vector<8x32xf32>
    %322 = arith.divf %320, %321 : vector<8x32xf32>
    %323 = arith.mulf %314, %297 : vector<8x32xf32>
    %324 = arith.mulf %308, %316 : vector<8x32xf32>
    %325 = arith.addf %323, %324 : vector<8x32xf32>
    %326 = math.tanh %325 : vector<8x32xf32>
    %327 = arith.mulf %322, %326 : vector<8x32xf32>
    %328 = vector.extract_strided_slice %240 {offsets = [32, 0], sizes = [8, 128], strides = [1, 1]} : vector<64x128xf32> to vector<8x128xf32>
    %cst_59 = arith.constant dense<0.000000e+00> : vector<8x128xf32>
    %329 = tpu.matmul %327, %241, %cst_59 {dimension_numbers = #tpu.dot_dimension_numbers<[1], [0], [0], [1], [0, 0, 1, 1], [], []>} : vector<8x32xf32>, vector<32x128xf32>, vector<8x128xf32> -> vector<8x128xf32>
    %330 = arith.addf %328, %329 : vector<8x128xf32>
    %331 = vector.extract_strided_slice %330 {offsets = [0, 0], sizes = [8, 32], strides = [1, 1]} : vector<8x128xf32> to vector<8x32xf32>
    %332 = arith.negf %331 : vector<8x32xf32>
    %333 = math.exp %332 : vector<8x32xf32>
    %cst_60 = arith.constant 1.000000e+00 : f32
    %334 = vector.broadcast %cst_60 : f32 to vector<8x32xf32>
    %335 = arith.addf %334, %333 : vector<8x32xf32>
    %336 = arith.divf %334, %335 : vector<8x32xf32>
    %337 = vector.extract_strided_slice %330 {offsets = [0, 32], sizes = [8, 32], strides = [1, 1]} : vector<8x128xf32> to vector<8x32xf32>
    %338 = arith.negf %337 : vector<8x32xf32>
    %339 = math.exp %338 : vector<8x32xf32>
    %cst_61 = arith.constant 1.000000e+00 : f32
    %340 = vector.broadcast %cst_61 : f32 to vector<8x32xf32>
    %341 = arith.addf %340, %339 : vector<8x32xf32>
    %342 = arith.divf %340, %341 : vector<8x32xf32>
    %343 = vector.extract_strided_slice %330 {offsets = [0, 64], sizes = [8, 32], strides = [1, 1]} : vector<8x128xf32> to vector<8x32xf32>
    %344 = math.tanh %343 : vector<8x32xf32>
    %345 = vector.extract_strided_slice %330 {offsets = [0, 96], sizes = [8, 32], strides = [1, 1]} : vector<8x128xf32> to vector<8x32xf32>
    %346 = arith.negf %345 : vector<8x32xf32>
    %347 = math.exp %346 : vector<8x32xf32>
    %cst_62 = arith.constant 1.000000e+00 : f32
    %348 = vector.broadcast %cst_62 : f32 to vector<8x32xf32>
    %349 = arith.addf %348, %347 : vector<8x32xf32>
    %350 = arith.divf %348, %349 : vector<8x32xf32>
    %351 = arith.mulf %342, %325 : vector<8x32xf32>
    %352 = arith.mulf %336, %344 : vector<8x32xf32>
    %353 = arith.addf %351, %352 : vector<8x32xf32>
    %354 = math.tanh %353 : vector<8x32xf32>
    %355 = arith.mulf %350, %354 : vector<8x32xf32>
    %356 = vector.extract_strided_slice %240 {offsets = [24, 0], sizes = [8, 128], strides = [1, 1]} : vector<64x128xf32> to vector<8x128xf32>
    %cst_63 = arith.constant dense<0.000000e+00> : vector<8x128xf32>
    %357 = tpu.matmul %355, %241, %cst_63 {dimension_numbers = #tpu.dot_dimension_numbers<[1], [0], [0], [1], [0, 0, 1, 1], [], []>} : vector<8x32xf32>, vector<32x128xf32>, vector<8x128xf32> -> vector<8x128xf32>
    %358 = arith.addf %356, %357 : vector<8x128xf32>
    %359 = vector.extract_strided_slice %358 {offsets = [0, 0], sizes = [8, 32], strides = [1, 1]} : vector<8x128xf32> to vector<8x32xf32>
    %360 = arith.negf %359 : vector<8x32xf32>
    %361 = math.exp %360 : vector<8x32xf32>
    %cst_64 = arith.constant 1.000000e+00 : f32
    %362 = vector.broadcast %cst_64 : f32 to vector<8x32xf32>
    %363 = arith.addf %362, %361 : vector<8x32xf32>
    %364 = arith.divf %362, %363 : vector<8x32xf32>
    %365 = vector.extract_strided_slice %358 {offsets = [0, 32], sizes = [8, 32], strides = [1, 1]} : vector<8x128xf32> to vector<8x32xf32>
    %366 = arith.negf %365 : vector<8x32xf32>
    %367 = math.exp %366 : vector<8x32xf32>
    %cst_65 = arith.constant 1.000000e+00 : f32
    %368 = vector.broadcast %cst_65 : f32 to vector<8x32xf32>
    %369 = arith.addf %368, %367 : vector<8x32xf32>
    %370 = arith.divf %368, %369 : vector<8x32xf32>
    %371 = vector.extract_strided_slice %358 {offsets = [0, 64], sizes = [8, 32], strides = [1, 1]} : vector<8x128xf32> to vector<8x32xf32>
    %372 = math.tanh %371 : vector<8x32xf32>
    %373 = vector.extract_strided_slice %358 {offsets = [0, 96], sizes = [8, 32], strides = [1, 1]} : vector<8x128xf32> to vector<8x32xf32>
    %374 = arith.negf %373 : vector<8x32xf32>
    %375 = math.exp %374 : vector<8x32xf32>
    %cst_66 = arith.constant 1.000000e+00 : f32
    %376 = vector.broadcast %cst_66 : f32 to vector<8x32xf32>
    %377 = arith.addf %376, %375 : vector<8x32xf32>
    %378 = arith.divf %376, %377 : vector<8x32xf32>
    %379 = arith.mulf %370, %353 : vector<8x32xf32>
    %380 = arith.mulf %364, %372 : vector<8x32xf32>
    %381 = arith.addf %379, %380 : vector<8x32xf32>
    %382 = math.tanh %381 : vector<8x32xf32>
    %383 = arith.mulf %378, %382 : vector<8x32xf32>
    %384 = vector.extract_strided_slice %240 {offsets = [16, 0], sizes = [8, 128], strides = [1, 1]} : vector<64x128xf32> to vector<8x128xf32>
    %cst_67 = arith.constant dense<0.000000e+00> : vector<8x128xf32>
    %385 = tpu.matmul %383, %241, %cst_67 {dimension_numbers = #tpu.dot_dimension_numbers<[1], [0], [0], [1], [0, 0, 1, 1], [], []>} : vector<8x32xf32>, vector<32x128xf32>, vector<8x128xf32> -> vector<8x128xf32>
    %386 = arith.addf %384, %385 : vector<8x128xf32>
    %387 = vector.extract_strided_slice %386 {offsets = [0, 0], sizes = [8, 32], strides = [1, 1]} : vector<8x128xf32> to vector<8x32xf32>
    %388 = arith.negf %387 : vector<8x32xf32>
    %389 = math.exp %388 : vector<8x32xf32>
    %cst_68 = arith.constant 1.000000e+00 : f32
    %390 = vector.broadcast %cst_68 : f32 to vector<8x32xf32>
    %391 = arith.addf %390, %389 : vector<8x32xf32>
    %392 = arith.divf %390, %391 : vector<8x32xf32>
    %393 = vector.extract_strided_slice %386 {offsets = [0, 32], sizes = [8, 32], strides = [1, 1]} : vector<8x128xf32> to vector<8x32xf32>
    %394 = arith.negf %393 : vector<8x32xf32>
    %395 = math.exp %394 : vector<8x32xf32>
    %cst_69 = arith.constant 1.000000e+00 : f32
    %396 = vector.broadcast %cst_69 : f32 to vector<8x32xf32>
    %397 = arith.addf %396, %395 : vector<8x32xf32>
    %398 = arith.divf %396, %397 : vector<8x32xf32>
    %399 = vector.extract_strided_slice %386 {offsets = [0, 64], sizes = [8, 32], strides = [1, 1]} : vector<8x128xf32> to vector<8x32xf32>
    %400 = math.tanh %399 : vector<8x32xf32>
    %401 = vector.extract_strided_slice %386 {offsets = [0, 96], sizes = [8, 32], strides = [1, 1]} : vector<8x128xf32> to vector<8x32xf32>
    %402 = arith.negf %401 : vector<8x32xf32>
    %403 = math.exp %402 : vector<8x32xf32>
    %cst_70 = arith.constant 1.000000e+00 : f32
    %404 = vector.broadcast %cst_70 : f32 to vector<8x32xf32>
    %405 = arith.addf %404, %403 : vector<8x32xf32>
    %406 = arith.divf %404, %405 : vector<8x32xf32>
    %407 = arith.mulf %398, %381 : vector<8x32xf32>
    %408 = arith.mulf %392, %400 : vector<8x32xf32>
    %409 = arith.addf %407, %408 : vector<8x32xf32>
    %410 = math.tanh %409 : vector<8x32xf32>
    %411 = arith.mulf %406, %410 : vector<8x32xf32>
    %412 = vector.extract_strided_slice %240 {offsets = [8, 0], sizes = [8, 128], strides = [1, 1]} : vector<64x128xf32> to vector<8x128xf32>
    %cst_71 = arith.constant dense<0.000000e+00> : vector<8x128xf32>
    %413 = tpu.matmul %411, %241, %cst_71 {dimension_numbers = #tpu.dot_dimension_numbers<[1], [0], [0], [1], [0, 0, 1, 1], [], []>} : vector<8x32xf32>, vector<32x128xf32>, vector<8x128xf32> -> vector<8x128xf32>
    %414 = arith.addf %412, %413 : vector<8x128xf32>
    %415 = vector.extract_strided_slice %414 {offsets = [0, 0], sizes = [8, 32], strides = [1, 1]} : vector<8x128xf32> to vector<8x32xf32>
    %416 = arith.negf %415 : vector<8x32xf32>
    %417 = math.exp %416 : vector<8x32xf32>
    %cst_72 = arith.constant 1.000000e+00 : f32
    %418 = vector.broadcast %cst_72 : f32 to vector<8x32xf32>
    %419 = arith.addf %418, %417 : vector<8x32xf32>
    %420 = arith.divf %418, %419 : vector<8x32xf32>
    %421 = vector.extract_strided_slice %414 {offsets = [0, 32], sizes = [8, 32], strides = [1, 1]} : vector<8x128xf32> to vector<8x32xf32>
    %422 = arith.negf %421 : vector<8x32xf32>
    %423 = math.exp %422 : vector<8x32xf32>
    %cst_73 = arith.constant 1.000000e+00 : f32
    %424 = vector.broadcast %cst_73 : f32 to vector<8x32xf32>
    %425 = arith.addf %424, %423 : vector<8x32xf32>
    %426 = arith.divf %424, %425 : vector<8x32xf32>
    %427 = vector.extract_strided_slice %414 {offsets = [0, 64], sizes = [8, 32], strides = [1, 1]} : vector<8x128xf32> to vector<8x32xf32>
    %428 = math.tanh %427 : vector<8x32xf32>
    %429 = vector.extract_strided_slice %414 {offsets = [0, 96], sizes = [8, 32], strides = [1, 1]} : vector<8x128xf32> to vector<8x32xf32>
    %430 = arith.negf %429 : vector<8x32xf32>
    %431 = math.exp %430 : vector<8x32xf32>
    %cst_74 = arith.constant 1.000000e+00 : f32
    %432 = vector.broadcast %cst_74 : f32 to vector<8x32xf32>
    %433 = arith.addf %432, %431 : vector<8x32xf32>
    %434 = arith.divf %432, %433 : vector<8x32xf32>
    %435 = arith.mulf %426, %409 : vector<8x32xf32>
    %436 = arith.mulf %420, %428 : vector<8x32xf32>
    %437 = arith.addf %435, %436 : vector<8x32xf32>
    %438 = math.tanh %437 : vector<8x32xf32>
    %439 = arith.mulf %434, %438 : vector<8x32xf32>
    %440 = vector.extract_strided_slice %240 {offsets = [0, 0], sizes = [8, 128], strides = [1, 1]} : vector<64x128xf32> to vector<8x128xf32>
    %cst_75 = arith.constant dense<0.000000e+00> : vector<8x128xf32>
    %441 = tpu.matmul %439, %241, %cst_75 {dimension_numbers = #tpu.dot_dimension_numbers<[1], [0], [0], [1], [0, 0, 1, 1], [], []>} : vector<8x32xf32>, vector<32x128xf32>, vector<8x128xf32> -> vector<8x128xf32>
    %442 = arith.addf %440, %441 : vector<8x128xf32>
    %443 = vector.extract_strided_slice %442 {offsets = [0, 0], sizes = [8, 32], strides = [1, 1]} : vector<8x128xf32> to vector<8x32xf32>
    %444 = arith.negf %443 : vector<8x32xf32>
    %445 = math.exp %444 : vector<8x32xf32>
    %cst_76 = arith.constant 1.000000e+00 : f32
    %446 = vector.broadcast %cst_76 : f32 to vector<8x32xf32>
    %447 = arith.addf %446, %445 : vector<8x32xf32>
    %448 = arith.divf %446, %447 : vector<8x32xf32>
    %449 = vector.extract_strided_slice %442 {offsets = [0, 32], sizes = [8, 32], strides = [1, 1]} : vector<8x128xf32> to vector<8x32xf32>
    %450 = arith.negf %449 : vector<8x32xf32>
    %451 = math.exp %450 : vector<8x32xf32>
    %cst_77 = arith.constant 1.000000e+00 : f32
    %452 = vector.broadcast %cst_77 : f32 to vector<8x32xf32>
    %453 = arith.addf %452, %451 : vector<8x32xf32>
    %454 = arith.divf %452, %453 : vector<8x32xf32>
    %455 = vector.extract_strided_slice %442 {offsets = [0, 64], sizes = [8, 32], strides = [1, 1]} : vector<8x128xf32> to vector<8x32xf32>
    %456 = math.tanh %455 : vector<8x32xf32>
    %457 = vector.extract_strided_slice %442 {offsets = [0, 96], sizes = [8, 32], strides = [1, 1]} : vector<8x128xf32> to vector<8x32xf32>
    %458 = arith.negf %457 : vector<8x32xf32>
    %459 = math.exp %458 : vector<8x32xf32>
    %cst_78 = arith.constant 1.000000e+00 : f32
    %460 = vector.broadcast %cst_78 : f32 to vector<8x32xf32>
    %461 = arith.addf %460, %459 : vector<8x32xf32>
    %462 = arith.divf %460, %461 : vector<8x32xf32>
    %463 = arith.mulf %454, %437 : vector<8x32xf32>
    %464 = arith.mulf %448, %456 : vector<8x32xf32>
    %465 = arith.addf %463, %464 : vector<8x32xf32>
    %466 = math.tanh %465 : vector<8x32xf32>
    %467 = arith.mulf %462, %466 : vector<8x32xf32>
    %468 = tpu.concatenate %467, %439, %411, %383, %355, %327, %299, %271 in 0 : vector<8x32xf32>, vector<8x32xf32>, vector<8x32xf32>, vector<8x32xf32>, vector<8x32xf32>, vector<8x32xf32>, vector<8x32xf32>, vector<8x32xf32> -> vector<64x32xf32>
    %c0_79 = arith.constant 0 : index
    %c0_80 = arith.constant 0 : index
    %469 = vector.load %arg3[%c0_79, %c0_80] : memref<408x32xf32, #tpu.memory_space<vmem>>, vector<32x32xf32>
    %cst_81 = arith.constant dense<0.000000e+00> : vector<64x32xf32>
    %470 = tpu.matmul %468, %469, %cst_81 {dimension_numbers = #tpu.dot_dimension_numbers<[1], [0], [0], [1], [0, 0, 1, 1], [], []>} : vector<64x32xf32>, vector<32x32xf32>, vector<64x32xf32> -> vector<64x32xf32>
    %c48_82 = arith.constant 48 : index
    %c0_83 = arith.constant 0 : index
    %471 = vector.load %arg3[%c48_82, %c0_83] : memref<408x32xf32, #tpu.memory_space<vmem>>, vector<1x32xf32>
    %472 = vector.broadcast %471 : vector<1x32xf32> to vector<64x32xf32>
    %473 = arith.addf %470, %472 : vector<64x32xf32>
    %c32 = arith.constant 32 : index
    %c0_84 = arith.constant 0 : index
    %474 = vector.load %arg3[%c32, %c0_84] : memref<408x32xf32, #tpu.memory_space<vmem>>, vector<16x32xf32>
    %c56_85 = arith.constant 56 : index
    %c0_86 = arith.constant 0 : index
    %475 = vector.load %arg3[%c56_85, %c0_86] : memref<408x32xf32, #tpu.memory_space<vmem>>, vector<32x32xf32>
    %c88 = arith.constant 88 : index
    %c0_87 = arith.constant 0 : index
    %476 = vector.load %arg3[%c88, %c0_87] : memref<408x32xf32, #tpu.memory_space<vmem>>, vector<1x32xf32>
    %c96 = arith.constant 96 : index
    %c0_88 = arith.constant 0 : index
    %477 = vector.load %arg3[%c96, %c0_88] : memref<408x32xf32, #tpu.memory_space<vmem>>, vector<32x32xf32>
    %c128 = arith.constant 128 : index
    %c0_89 = arith.constant 0 : index
    %478 = vector.load %arg3[%c128, %c0_89] : memref<408x32xf32, #tpu.memory_space<vmem>>, vector<1x32xf32>
    %cst_90 = arith.constant 0.000000e+00 : f32
    %479 = vector.broadcast %cst_90 : f32 to vector<8x16xf32>
    %480 = vector.extract_strided_slice %473 {offsets = [0, 0], sizes = [8, 32], strides = [1, 1]} : vector<64x32xf32> to vector<8x32xf32>
    %cst_91 = arith.constant dense<0.000000e+00> : vector<8x32xf32>
    %481 = tpu.matmul %479, %474, %cst_91 {dimension_numbers = #tpu.dot_dimension_numbers<[1], [0], [0], [1], [0, 0, 1, 1], [], []>} : vector<8x16xf32>, vector<16x32xf32>, vector<8x32xf32> -> vector<8x32xf32>
    %482 = arith.addf %480, %481 : vector<8x32xf32>
    %483 = math.tanh %482 : vector<8x32xf32>
    %cst_92 = arith.constant dense<0.000000e+00> : vector<8x32xf32>
    %484 = tpu.matmul %483, %475, %cst_92 {dimension_numbers = #tpu.dot_dimension_numbers<[1], [0], [0], [1], [0, 0, 1, 1], [], []>} : vector<8x32xf32>, vector<32x32xf32>, vector<8x32xf32> -> vector<8x32xf32>
    %485 = vector.broadcast %476 : vector<1x32xf32> to vector<8x32xf32>
    %486 = arith.addf %484, %485 : vector<8x32xf32>
    %487 = math.tanh %486 : vector<8x32xf32>
    %cst_93 = arith.constant dense<0.000000e+00> : vector<8x32xf32>
    %488 = tpu.matmul %487, %477, %cst_93 {dimension_numbers = #tpu.dot_dimension_numbers<[1], [0], [0], [1], [0, 0, 1, 1], [], []>} : vector<8x32xf32>, vector<32x32xf32>, vector<8x32xf32> -> vector<8x32xf32>
    %489 = vector.broadcast %478 : vector<1x32xf32> to vector<8x32xf32>
    %490 = arith.addf %488, %489 : vector<8x32xf32>
    %491 = vector.extract_strided_slice %490 {offsets = [0, 0], sizes = [8, 16], strides = [1, 1]} : vector<8x32xf32> to vector<8x16xf32>
    %492 = vector.extract_strided_slice %490 {offsets = [0, 16], sizes = [8, 16], strides = [1, 1]} : vector<8x32xf32> to vector<8x16xf32>
    %493 = vector.extract_strided_slice %1 {offsets = [0, 0], sizes = [8, 16], strides = [1, 1]} : vector<64x16xf32> to vector<8x16xf32>
    %cst_94 = arith.constant 5.000000e-01 : f32
    %494 = vector.broadcast %cst_94 : f32 to vector<8x16xf32>
    %495 = arith.mulf %494, %492 : vector<8x16xf32>
    %496 = math.exp %495 : vector<8x16xf32>
    %497 = arith.mulf %493, %496 : vector<8x16xf32>
    %498 = arith.addf %491, %497 : vector<8x16xf32>
    %499 = vector.extract_strided_slice %473 {offsets = [8, 0], sizes = [8, 32], strides = [1, 1]} : vector<64x32xf32> to vector<8x32xf32>
    %cst_95 = arith.constant dense<0.000000e+00> : vector<8x32xf32>
    %500 = tpu.matmul %498, %474, %cst_95 {dimension_numbers = #tpu.dot_dimension_numbers<[1], [0], [0], [1], [0, 0, 1, 1], [], []>} : vector<8x16xf32>, vector<16x32xf32>, vector<8x32xf32> -> vector<8x32xf32>
    %501 = arith.addf %499, %500 : vector<8x32xf32>
    %502 = math.tanh %501 : vector<8x32xf32>
    %cst_96 = arith.constant dense<0.000000e+00> : vector<8x32xf32>
    %503 = tpu.matmul %502, %475, %cst_96 {dimension_numbers = #tpu.dot_dimension_numbers<[1], [0], [0], [1], [0, 0, 1, 1], [], []>} : vector<8x32xf32>, vector<32x32xf32>, vector<8x32xf32> -> vector<8x32xf32>
    %504 = vector.broadcast %476 : vector<1x32xf32> to vector<8x32xf32>
    %505 = arith.addf %503, %504 : vector<8x32xf32>
    %506 = math.tanh %505 : vector<8x32xf32>
    %cst_97 = arith.constant dense<0.000000e+00> : vector<8x32xf32>
    %507 = tpu.matmul %506, %477, %cst_97 {dimension_numbers = #tpu.dot_dimension_numbers<[1], [0], [0], [1], [0, 0, 1, 1], [], []>} : vector<8x32xf32>, vector<32x32xf32>, vector<8x32xf32> -> vector<8x32xf32>
    %508 = vector.broadcast %478 : vector<1x32xf32> to vector<8x32xf32>
    %509 = arith.addf %507, %508 : vector<8x32xf32>
    %510 = vector.extract_strided_slice %509 {offsets = [0, 0], sizes = [8, 16], strides = [1, 1]} : vector<8x32xf32> to vector<8x16xf32>
    %511 = vector.extract_strided_slice %509 {offsets = [0, 16], sizes = [8, 16], strides = [1, 1]} : vector<8x32xf32> to vector<8x16xf32>
    %512 = vector.extract_strided_slice %1 {offsets = [8, 0], sizes = [8, 16], strides = [1, 1]} : vector<64x16xf32> to vector<8x16xf32>
    %cst_98 = arith.constant 5.000000e-01 : f32
    %513 = vector.broadcast %cst_98 : f32 to vector<8x16xf32>
    %514 = arith.mulf %513, %511 : vector<8x16xf32>
    %515 = math.exp %514 : vector<8x16xf32>
    %516 = arith.mulf %512, %515 : vector<8x16xf32>
    %517 = arith.addf %510, %516 : vector<8x16xf32>
    %518 = vector.extract_strided_slice %473 {offsets = [16, 0], sizes = [8, 32], strides = [1, 1]} : vector<64x32xf32> to vector<8x32xf32>
    %cst_99 = arith.constant dense<0.000000e+00> : vector<8x32xf32>
    %519 = tpu.matmul %517, %474, %cst_99 {dimension_numbers = #tpu.dot_dimension_numbers<[1], [0], [0], [1], [0, 0, 1, 1], [], []>} : vector<8x16xf32>, vector<16x32xf32>, vector<8x32xf32> -> vector<8x32xf32>
    %520 = arith.addf %518, %519 : vector<8x32xf32>
    %521 = math.tanh %520 : vector<8x32xf32>
    %cst_100 = arith.constant dense<0.000000e+00> : vector<8x32xf32>
    %522 = tpu.matmul %521, %475, %cst_100 {dimension_numbers = #tpu.dot_dimension_numbers<[1], [0], [0], [1], [0, 0, 1, 1], [], []>} : vector<8x32xf32>, vector<32x32xf32>, vector<8x32xf32> -> vector<8x32xf32>
    %523 = vector.broadcast %476 : vector<1x32xf32> to vector<8x32xf32>
    %524 = arith.addf %522, %523 : vector<8x32xf32>
    %525 = math.tanh %524 : vector<8x32xf32>
    %cst_101 = arith.constant dense<0.000000e+00> : vector<8x32xf32>
    %526 = tpu.matmul %525, %477, %cst_101 {dimension_numbers = #tpu.dot_dimension_numbers<[1], [0], [0], [1], [0, 0, 1, 1], [], []>} : vector<8x32xf32>, vector<32x32xf32>, vector<8x32xf32> -> vector<8x32xf32>
    %527 = vector.broadcast %478 : vector<1x32xf32> to vector<8x32xf32>
    %528 = arith.addf %526, %527 : vector<8x32xf32>
    %529 = vector.extract_strided_slice %528 {offsets = [0, 0], sizes = [8, 16], strides = [1, 1]} : vector<8x32xf32> to vector<8x16xf32>
    %530 = vector.extract_strided_slice %528 {offsets = [0, 16], sizes = [8, 16], strides = [1, 1]} : vector<8x32xf32> to vector<8x16xf32>
    %531 = vector.extract_strided_slice %1 {offsets = [16, 0], sizes = [8, 16], strides = [1, 1]} : vector<64x16xf32> to vector<8x16xf32>
    %cst_102 = arith.constant 5.000000e-01 : f32
    %532 = vector.broadcast %cst_102 : f32 to vector<8x16xf32>
    %533 = arith.mulf %532, %530 : vector<8x16xf32>
    %534 = math.exp %533 : vector<8x16xf32>
    %535 = arith.mulf %531, %534 : vector<8x16xf32>
    %536 = arith.addf %529, %535 : vector<8x16xf32>
    %537 = vector.extract_strided_slice %473 {offsets = [24, 0], sizes = [8, 32], strides = [1, 1]} : vector<64x32xf32> to vector<8x32xf32>
    %cst_103 = arith.constant dense<0.000000e+00> : vector<8x32xf32>
    %538 = tpu.matmul %536, %474, %cst_103 {dimension_numbers = #tpu.dot_dimension_numbers<[1], [0], [0], [1], [0, 0, 1, 1], [], []>} : vector<8x16xf32>, vector<16x32xf32>, vector<8x32xf32> -> vector<8x32xf32>
    %539 = arith.addf %537, %538 : vector<8x32xf32>
    %540 = math.tanh %539 : vector<8x32xf32>
    %cst_104 = arith.constant dense<0.000000e+00> : vector<8x32xf32>
    %541 = tpu.matmul %540, %475, %cst_104 {dimension_numbers = #tpu.dot_dimension_numbers<[1], [0], [0], [1], [0, 0, 1, 1], [], []>} : vector<8x32xf32>, vector<32x32xf32>, vector<8x32xf32> -> vector<8x32xf32>
    %542 = vector.broadcast %476 : vector<1x32xf32> to vector<8x32xf32>
    %543 = arith.addf %541, %542 : vector<8x32xf32>
    %544 = math.tanh %543 : vector<8x32xf32>
    %cst_105 = arith.constant dense<0.000000e+00> : vector<8x32xf32>
    %545 = tpu.matmul %544, %477, %cst_105 {dimension_numbers = #tpu.dot_dimension_numbers<[1], [0], [0], [1], [0, 0, 1, 1], [], []>} : vector<8x32xf32>, vector<32x32xf32>, vector<8x32xf32> -> vector<8x32xf32>
    %546 = vector.broadcast %478 : vector<1x32xf32> to vector<8x32xf32>
    %547 = arith.addf %545, %546 : vector<8x32xf32>
    %548 = vector.extract_strided_slice %547 {offsets = [0, 0], sizes = [8, 16], strides = [1, 1]} : vector<8x32xf32> to vector<8x16xf32>
    %549 = vector.extract_strided_slice %547 {offsets = [0, 16], sizes = [8, 16], strides = [1, 1]} : vector<8x32xf32> to vector<8x16xf32>
    %550 = vector.extract_strided_slice %1 {offsets = [24, 0], sizes = [8, 16], strides = [1, 1]} : vector<64x16xf32> to vector<8x16xf32>
    %cst_106 = arith.constant 5.000000e-01 : f32
    %551 = vector.broadcast %cst_106 : f32 to vector<8x16xf32>
    %552 = arith.mulf %551, %549 : vector<8x16xf32>
    %553 = math.exp %552 : vector<8x16xf32>
    %554 = arith.mulf %550, %553 : vector<8x16xf32>
    %555 = arith.addf %548, %554 : vector<8x16xf32>
    %556 = vector.extract_strided_slice %473 {offsets = [32, 0], sizes = [8, 32], strides = [1, 1]} : vector<64x32xf32> to vector<8x32xf32>
    %cst_107 = arith.constant dense<0.000000e+00> : vector<8x32xf32>
    %557 = tpu.matmul %555, %474, %cst_107 {dimension_numbers = #tpu.dot_dimension_numbers<[1], [0], [0], [1], [0, 0, 1, 1], [], []>} : vector<8x16xf32>, vector<16x32xf32>, vector<8x32xf32> -> vector<8x32xf32>
    %558 = arith.addf %556, %557 : vector<8x32xf32>
    %559 = math.tanh %558 : vector<8x32xf32>
    %cst_108 = arith.constant dense<0.000000e+00> : vector<8x32xf32>
    %560 = tpu.matmul %559, %475, %cst_108 {dimension_numbers = #tpu.dot_dimension_numbers<[1], [0], [0], [1], [0, 0, 1, 1], [], []>} : vector<8x32xf32>, vector<32x32xf32>, vector<8x32xf32> -> vector<8x32xf32>
    %561 = vector.broadcast %476 : vector<1x32xf32> to vector<8x32xf32>
    %562 = arith.addf %560, %561 : vector<8x32xf32>
    %563 = math.tanh %562 : vector<8x32xf32>
    %cst_109 = arith.constant dense<0.000000e+00> : vector<8x32xf32>
    %564 = tpu.matmul %563, %477, %cst_109 {dimension_numbers = #tpu.dot_dimension_numbers<[1], [0], [0], [1], [0, 0, 1, 1], [], []>} : vector<8x32xf32>, vector<32x32xf32>, vector<8x32xf32> -> vector<8x32xf32>
    %565 = vector.broadcast %478 : vector<1x32xf32> to vector<8x32xf32>
    %566 = arith.addf %564, %565 : vector<8x32xf32>
    %567 = vector.extract_strided_slice %566 {offsets = [0, 0], sizes = [8, 16], strides = [1, 1]} : vector<8x32xf32> to vector<8x16xf32>
    %568 = vector.extract_strided_slice %566 {offsets = [0, 16], sizes = [8, 16], strides = [1, 1]} : vector<8x32xf32> to vector<8x16xf32>
    %569 = vector.extract_strided_slice %1 {offsets = [32, 0], sizes = [8, 16], strides = [1, 1]} : vector<64x16xf32> to vector<8x16xf32>
    %cst_110 = arith.constant 5.000000e-01 : f32
    %570 = vector.broadcast %cst_110 : f32 to vector<8x16xf32>
    %571 = arith.mulf %570, %568 : vector<8x16xf32>
    %572 = math.exp %571 : vector<8x16xf32>
    %573 = arith.mulf %569, %572 : vector<8x16xf32>
    %574 = arith.addf %567, %573 : vector<8x16xf32>
    %575 = vector.extract_strided_slice %473 {offsets = [40, 0], sizes = [8, 32], strides = [1, 1]} : vector<64x32xf32> to vector<8x32xf32>
    %cst_111 = arith.constant dense<0.000000e+00> : vector<8x32xf32>
    %576 = tpu.matmul %574, %474, %cst_111 {dimension_numbers = #tpu.dot_dimension_numbers<[1], [0], [0], [1], [0, 0, 1, 1], [], []>} : vector<8x16xf32>, vector<16x32xf32>, vector<8x32xf32> -> vector<8x32xf32>
    %577 = arith.addf %575, %576 : vector<8x32xf32>
    %578 = math.tanh %577 : vector<8x32xf32>
    %cst_112 = arith.constant dense<0.000000e+00> : vector<8x32xf32>
    %579 = tpu.matmul %578, %475, %cst_112 {dimension_numbers = #tpu.dot_dimension_numbers<[1], [0], [0], [1], [0, 0, 1, 1], [], []>} : vector<8x32xf32>, vector<32x32xf32>, vector<8x32xf32> -> vector<8x32xf32>
    %580 = vector.broadcast %476 : vector<1x32xf32> to vector<8x32xf32>
    %581 = arith.addf %579, %580 : vector<8x32xf32>
    %582 = math.tanh %581 : vector<8x32xf32>
    %cst_113 = arith.constant dense<0.000000e+00> : vector<8x32xf32>
    %583 = tpu.matmul %582, %477, %cst_113 {dimension_numbers = #tpu.dot_dimension_numbers<[1], [0], [0], [1], [0, 0, 1, 1], [], []>} : vector<8x32xf32>, vector<32x32xf32>, vector<8x32xf32> -> vector<8x32xf32>
    %584 = vector.broadcast %478 : vector<1x32xf32> to vector<8x32xf32>
    %585 = arith.addf %583, %584 : vector<8x32xf32>
    %586 = vector.extract_strided_slice %585 {offsets = [0, 0], sizes = [8, 16], strides = [1, 1]} : vector<8x32xf32> to vector<8x16xf32>
    %587 = vector.extract_strided_slice %585 {offsets = [0, 16], sizes = [8, 16], strides = [1, 1]} : vector<8x32xf32> to vector<8x16xf32>
    %588 = vector.extract_strided_slice %1 {offsets = [40, 0], sizes = [8, 16], strides = [1, 1]} : vector<64x16xf32> to vector<8x16xf32>
    %cst_114 = arith.constant 5.000000e-01 : f32
    %589 = vector.broadcast %cst_114 : f32 to vector<8x16xf32>
    %590 = arith.mulf %589, %587 : vector<8x16xf32>
    %591 = math.exp %590 : vector<8x16xf32>
    %592 = arith.mulf %588, %591 : vector<8x16xf32>
    %593 = arith.addf %586, %592 : vector<8x16xf32>
    %594 = vector.extract_strided_slice %473 {offsets = [48, 0], sizes = [8, 32], strides = [1, 1]} : vector<64x32xf32> to vector<8x32xf32>
    %cst_115 = arith.constant dense<0.000000e+00> : vector<8x32xf32>
    %595 = tpu.matmul %593, %474, %cst_115 {dimension_numbers = #tpu.dot_dimension_numbers<[1], [0], [0], [1], [0, 0, 1, 1], [], []>} : vector<8x16xf32>, vector<16x32xf32>, vector<8x32xf32> -> vector<8x32xf32>
    %596 = arith.addf %594, %595 : vector<8x32xf32>
    %597 = math.tanh %596 : vector<8x32xf32>
    %cst_116 = arith.constant dense<0.000000e+00> : vector<8x32xf32>
    %598 = tpu.matmul %597, %475, %cst_116 {dimension_numbers = #tpu.dot_dimension_numbers<[1], [0], [0], [1], [0, 0, 1, 1], [], []>} : vector<8x32xf32>, vector<32x32xf32>, vector<8x32xf32> -> vector<8x32xf32>
    %599 = vector.broadcast %476 : vector<1x32xf32> to vector<8x32xf32>
    %600 = arith.addf %598, %599 : vector<8x32xf32>
    %601 = math.tanh %600 : vector<8x32xf32>
    %cst_117 = arith.constant dense<0.000000e+00> : vector<8x32xf32>
    %602 = tpu.matmul %601, %477, %cst_117 {dimension_numbers = #tpu.dot_dimension_numbers<[1], [0], [0], [1], [0, 0, 1, 1], [], []>} : vector<8x32xf32>, vector<32x32xf32>, vector<8x32xf32> -> vector<8x32xf32>
    %603 = vector.broadcast %478 : vector<1x32xf32> to vector<8x32xf32>
    %604 = arith.addf %602, %603 : vector<8x32xf32>
    %605 = vector.extract_strided_slice %604 {offsets = [0, 0], sizes = [8, 16], strides = [1, 1]} : vector<8x32xf32> to vector<8x16xf32>
    %606 = vector.extract_strided_slice %604 {offsets = [0, 16], sizes = [8, 16], strides = [1, 1]} : vector<8x32xf32> to vector<8x16xf32>
    %607 = vector.extract_strided_slice %1 {offsets = [48, 0], sizes = [8, 16], strides = [1, 1]} : vector<64x16xf32> to vector<8x16xf32>
    %cst_118 = arith.constant 5.000000e-01 : f32
    %608 = vector.broadcast %cst_118 : f32 to vector<8x16xf32>
    %609 = arith.mulf %608, %606 : vector<8x16xf32>
    %610 = math.exp %609 : vector<8x16xf32>
    %611 = arith.mulf %607, %610 : vector<8x16xf32>
    %612 = arith.addf %605, %611 : vector<8x16xf32>
    %613 = vector.extract_strided_slice %473 {offsets = [56, 0], sizes = [8, 32], strides = [1, 1]} : vector<64x32xf32> to vector<8x32xf32>
    %cst_119 = arith.constant dense<0.000000e+00> : vector<8x32xf32>
    %614 = tpu.matmul %612, %474, %cst_119 {dimension_numbers = #tpu.dot_dimension_numbers<[1], [0], [0], [1], [0, 0, 1, 1], [], []>} : vector<8x16xf32>, vector<16x32xf32>, vector<8x32xf32> -> vector<8x32xf32>
    %615 = arith.addf %613, %614 : vector<8x32xf32>
    %616 = math.tanh %615 : vector<8x32xf32>
    %cst_120 = arith.constant dense<0.000000e+00> : vector<8x32xf32>
    %617 = tpu.matmul %616, %475, %cst_120 {dimension_numbers = #tpu.dot_dimension_numbers<[1], [0], [0], [1], [0, 0, 1, 1], [], []>} : vector<8x32xf32>, vector<32x32xf32>, vector<8x32xf32> -> vector<8x32xf32>
    %618 = vector.broadcast %476 : vector<1x32xf32> to vector<8x32xf32>
    %619 = arith.addf %617, %618 : vector<8x32xf32>
    %620 = math.tanh %619 : vector<8x32xf32>
    %cst_121 = arith.constant dense<0.000000e+00> : vector<8x32xf32>
    %621 = tpu.matmul %620, %477, %cst_121 {dimension_numbers = #tpu.dot_dimension_numbers<[1], [0], [0], [1], [0, 0, 1, 1], [], []>} : vector<8x32xf32>, vector<32x32xf32>, vector<8x32xf32> -> vector<8x32xf32>
    %622 = vector.broadcast %478 : vector<1x32xf32> to vector<8x32xf32>
    %623 = arith.addf %621, %622 : vector<8x32xf32>
    %624 = vector.extract_strided_slice %623 {offsets = [0, 0], sizes = [8, 16], strides = [1, 1]} : vector<8x32xf32> to vector<8x16xf32>
    %625 = vector.extract_strided_slice %623 {offsets = [0, 16], sizes = [8, 16], strides = [1, 1]} : vector<8x32xf32> to vector<8x16xf32>
    %626 = vector.extract_strided_slice %1 {offsets = [56, 0], sizes = [8, 16], strides = [1, 1]} : vector<64x16xf32> to vector<8x16xf32>
    %cst_122 = arith.constant 5.000000e-01 : f32
    %627 = vector.broadcast %cst_122 : f32 to vector<8x16xf32>
    %628 = arith.mulf %627, %625 : vector<8x16xf32>
    %629 = math.exp %628 : vector<8x16xf32>
    %630 = arith.mulf %626, %629 : vector<8x16xf32>
    %631 = arith.addf %624, %630 : vector<8x16xf32>
    %632 = tpu.concatenate %498, %517, %536, %555, %574, %593, %612, %631 in 0 : vector<8x16xf32>, vector<8x16xf32>, vector<8x16xf32>, vector<8x16xf32>, vector<8x16xf32>, vector<8x16xf32>, vector<8x16xf32>, vector<8x16xf32> -> vector<64x16xf32>
    %633 = tpu.concatenate %491, %510, %529, %548, %567, %586, %605, %624 in 0 : vector<8x16xf32>, vector<8x16xf32>, vector<8x16xf32>, vector<8x16xf32>, vector<8x16xf32>, vector<8x16xf32>, vector<8x16xf32>, vector<8x16xf32> -> vector<64x16xf32>
    %634 = tpu.concatenate %492, %511, %530, %549, %568, %587, %606, %625 in 0 : vector<8x16xf32>, vector<8x16xf32>, vector<8x16xf32>, vector<8x16xf32>, vector<8x16xf32>, vector<8x16xf32>, vector<8x16xf32>, vector<8x16xf32> -> vector<64x16xf32>
    %cst_123 = arith.constant 0.000000e+00 : f32
    %635 = vector.broadcast %cst_123 : f32 to vector<8x16xf32>
    %636 = tpu.concatenate %635, %498, %517, %536, %555, %574, %593, %612 in 0 : vector<8x16xf32>, vector<8x16xf32>, vector<8x16xf32>, vector<8x16xf32>, vector<8x16xf32>, vector<8x16xf32>, vector<8x16xf32>, vector<8x16xf32> -> vector<64x16xf32>
    %637 = tpu.concatenate %234, %636 in 1 : vector<64x32xf32>, vector<64x16xf32> -> vector<64x48xf32>
    %c136_124 = arith.constant 136 : index
    %c0_125 = arith.constant 0 : index
    %638 = vector.load %arg3[%c136_124, %c0_125] : memref<408x32xf32, #tpu.memory_space<vmem>>, vector<48x32xf32>
    %cst_126 = arith.constant dense<0.000000e+00> : vector<64x32xf32>
    %639 = tpu.matmul %637, %638, %cst_126 {dimension_numbers = #tpu.dot_dimension_numbers<[1], [0], [0], [1], [0, 0, 1, 1], [], []>} : vector<64x48xf32>, vector<48x32xf32>, vector<64x32xf32> -> vector<64x32xf32>
    %c184 = arith.constant 184 : index
    %c0_127 = arith.constant 0 : index
    %640 = vector.load %arg3[%c184, %c0_127] : memref<408x32xf32, #tpu.memory_space<vmem>>, vector<1x32xf32>
    %641 = vector.broadcast %640 : vector<1x32xf32> to vector<64x32xf32>
    %642 = arith.addf %639, %641 : vector<64x32xf32>
    %643 = math.tanh %642 : vector<64x32xf32>
    %c192 = arith.constant 192 : index
    %c0_128 = arith.constant 0 : index
    %644 = vector.load %arg3[%c192, %c0_128] : memref<408x32xf32, #tpu.memory_space<vmem>>, vector<32x32xf32>
    %cst_129 = arith.constant dense<0.000000e+00> : vector<64x32xf32>
    %645 = tpu.matmul %643, %644, %cst_129 {dimension_numbers = #tpu.dot_dimension_numbers<[1], [0], [0], [1], [0, 0, 1, 1], [], []>} : vector<64x32xf32>, vector<32x32xf32>, vector<64x32xf32> -> vector<64x32xf32>
    %c224 = arith.constant 224 : index
    %c0_130 = arith.constant 0 : index
    %646 = vector.load %arg3[%c224, %c0_130] : memref<408x32xf32, #tpu.memory_space<vmem>>, vector<1x32xf32>
    %647 = vector.broadcast %646 : vector<1x32xf32> to vector<64x32xf32>
    %648 = arith.addf %645, %647 : vector<64x32xf32>
    %649 = math.tanh %648 : vector<64x32xf32>
    %c232 = arith.constant 232 : index
    %c0_131 = arith.constant 0 : index
    %650 = vector.load %arg3[%c232, %c0_131] : memref<408x32xf32, #tpu.memory_space<vmem>>, vector<32x32xf32>
    %cst_132 = arith.constant dense<0.000000e+00> : vector<64x32xf32>
    %651 = tpu.matmul %649, %650, %cst_132 {dimension_numbers = #tpu.dot_dimension_numbers<[1], [0], [0], [1], [0, 0, 1, 1], [], []>} : vector<64x32xf32>, vector<32x32xf32>, vector<64x32xf32> -> vector<64x32xf32>
    %c264 = arith.constant 264 : index
    %c0_133 = arith.constant 0 : index
    %652 = vector.load %arg3[%c264, %c0_133] : memref<408x32xf32, #tpu.memory_space<vmem>>, vector<1x32xf32>
    %653 = vector.broadcast %652 : vector<1x32xf32> to vector<64x32xf32>
    %654 = arith.addf %651, %653 : vector<64x32xf32>
    %655 = tpu.concatenate %234, %632 in 1 : vector<64x32xf32>, vector<64x16xf32> -> vector<64x48xf32>
    %c272 = arith.constant 272 : index
    %c0_134 = arith.constant 0 : index
    %656 = vector.load %arg3[%c272, %c0_134] : memref<408x32xf32, #tpu.memory_space<vmem>>, vector<48x32xf32>
    %cst_135 = arith.constant dense<0.000000e+00> : vector<64x32xf32>
    %657 = tpu.matmul %655, %656, %cst_135 {dimension_numbers = #tpu.dot_dimension_numbers<[1], [0], [0], [1], [0, 0, 1, 1], [], []>} : vector<64x48xf32>, vector<48x32xf32>, vector<64x32xf32> -> vector<64x32xf32>
    %c320 = arith.constant 320 : index
    %c0_136 = arith.constant 0 : index
    %658 = vector.load %arg3[%c320, %c0_136] : memref<408x32xf32, #tpu.memory_space<vmem>>, vector<1x32xf32>
    %659 = vector.broadcast %658 : vector<1x32xf32> to vector<64x32xf32>
    %660 = arith.addf %657, %659 : vector<64x32xf32>
    %661 = math.tanh %660 : vector<64x32xf32>
    %c328 = arith.constant 328 : index
    %c0_137 = arith.constant 0 : index
    %662 = vector.load %arg3[%c328, %c0_137] : memref<408x32xf32, #tpu.memory_space<vmem>>, vector<32x32xf32>
    %cst_138 = arith.constant dense<0.000000e+00> : vector<64x32xf32>
    %663 = tpu.matmul %661, %662, %cst_138 {dimension_numbers = #tpu.dot_dimension_numbers<[1], [0], [0], [1], [0, 0, 1, 1], [], []>} : vector<64x32xf32>, vector<32x32xf32>, vector<64x32xf32> -> vector<64x32xf32>
    %c360 = arith.constant 360 : index
    %c0_139 = arith.constant 0 : index
    %664 = vector.load %arg3[%c360, %c0_139] : memref<408x32xf32, #tpu.memory_space<vmem>>, vector<1x32xf32>
    %665 = vector.broadcast %664 : vector<1x32xf32> to vector<64x32xf32>
    %666 = arith.addf %663, %665 : vector<64x32xf32>
    %667 = math.tanh %666 : vector<64x32xf32>
    %c368 = arith.constant 368 : index
    %c0_140 = arith.constant 0 : index
    %668 = vector.load %arg3[%c368, %c0_140] : memref<408x32xf32, #tpu.memory_space<vmem>>, vector<32x32xf32>
    %cst_141 = arith.constant dense<0.000000e+00> : vector<64x32xf32>
    %669 = tpu.matmul %667, %668, %cst_141 {dimension_numbers = #tpu.dot_dimension_numbers<[1], [0], [0], [1], [0, 0, 1, 1], [], []>} : vector<64x32xf32>, vector<32x32xf32>, vector<64x32xf32> -> vector<64x32xf32>
    %c400 = arith.constant 400 : index
    %c0_142 = arith.constant 0 : index
    %670 = vector.load %arg3[%c400, %c0_142] : memref<408x32xf32, #tpu.memory_space<vmem>>, vector<1x32xf32>
    %671 = vector.broadcast %670 : vector<1x32xf32> to vector<64x32xf32>
    %672 = arith.addf %669, %671 : vector<64x32xf32>
    %cst_143 = arith.constant 0.000000e+00 : f32
    %673 = vector.broadcast %cst_143 : f32 to vector<64x16xf32>
    %674 = tpu.concatenate %632, %633, %634, %654, %672, %673 in 1 : vector<64x16xf32>, vector<64x16xf32>, vector<64x16xf32>, vector<64x32xf32>, vector<64x32xf32>, vector<64x16xf32> -> vector<64x128xf32>
    %c0_144 = arith.constant 0 : index
    %c0_145 = arith.constant 0 : index
    %675 = vector.load %arg4[%c0_144, %c0_145] : memref<64x128xf32, #tpu.memory_space<vmem>>, vector<64x128xf32>
    tpu.vector_store %arg4[%c0_144, %c0_145], %674 {strides = array<i32>} : memref<64x128xf32, #tpu.memory_space<vmem>>, vector<64x128xf32>,
    return
  }
}

</mosaic_0001>

<bundles_post_ra>
// kernel: srnn_forward.1
= control target key start
LH: loop header
LB: loop body
LE: loop exit
PB: predicated region body
PF: predicated region fallthrough
CT: control target
= control target key end

     0   :  { %v6275_v0 = vmov 0.0   ;;  %vm6276_vm0 = vmmov 0   ;;  %s6277_s25 = smov 64   ;;  %s6278_s26 = smov 32   ;;  %vm40_vm1 = vcmask 130048   ;;  %vm173_vm2 = vcmask 261120   ;;  %s7605_s2 = inlined_call_operand.vmem [shape: f32[144,128], index: 2, kind: input, shape index: {}]   ;;  %s7606_s0 = inlined_call_operand.vmem [shape: f32[64,16], index: 0, kind: input, shape index: {}]   ;;  %s7607_s3 = inlined_call_operand.vmem [shape: f32[408,32], index: 3, kind: input, shape index: {}]   ;;  %s7608_s1 = inlined_call_operand.vmem [shape: f32[64,16], index: 1, kind: input, shape index: {}]   ;;  %s7609_s4 = inlined_call_operand.vmem [shape: f32[64,128], index: 4, kind: output, shape index: {}]  }
   0x1   :  { %5447 = vmatprep.subr.mxu1 %v6275_v0  ;;  %v6312_v1 = vld [vmem:[%s7605_s2 + $0x28] sm:$0xff]  ;;  %v6317_v2 = vld [vmem:[%s7605_s2 + $0x20] sm:$0xff]  ;;  %5455 = vmatprep.mubr.msk.f32.mxu1 %vm6276_vm0, %v6275_v0  ;;  %v6326_v3 = vld [vmem:[%s7605_s2 + $0x18] sm:$0xff]  ;;  %vm1026_vm3 = vcmask 392192   ;;  %s6279_s23 = smov 112   ;;  %s6280_s7 = smov 16  }
   0x2   :  { %5448 = vmatpush3.msra.mxu1 %v6312_v1  ;;  %v6333_v4 = vld [vmem:[%s7605_s2 + $0x10] sm:$0xff]  ;;  %v35_v19 = vld [vmem:[%s7605_s2 + $0x8] sm:$0xff]  ;;  %v34_v20 = vld [vmem:[%s7605_s2] sm:$0xff]  ;;  %s6282_s30 = smov 80   ;;  %vm4969_vm4 = vcmask 654336   ;;  %vm4978_vm5 = vcmask 916480  }
   0x3   :  { %5449 = vmatprep.subr.mxu1 %v6275_v0  ;;  %v6353_v5 = vld [vmem:[%s7605_s2 + $0x30] ss:$0 sm:$0xff]  ;;  %5431 = vmatprep.subr.mxu0 %v35_v19  ;;  %v6367_v21 = vld [vmem:[%s7606_s0] sm:$0xff]  ;;  %v6374_v22 = vld [vmem:[%s7606_s0 + $0x8] sm:$0xff] }
   0x4   :  { %5450 = vmatpush3.msra.mxu1 %v6317_v2  ;;  %5432 = vmatpush3.msra.mxu0 %v35_v19  ;;  %v6409_v43 = vld [vmem:[%s7606_s0 + $0x10] sm:$0xff]  ;;  %v6414_v44 = vld [vmem:[%s7606_s0 + $0x18] sm:$0xff]  ;;  %v6419_v45 = vld [vmem:[%s7606_s0 + $0x20] sm:$0xff] }
   0x5   :  { %5451 = vmatprep.subr.mxu1 %v6275_v0  ;;  %5435 = vmatprep.mubr.msk.f32.mxu0 %vm40_vm1, %v6367_v21  ;;  %v6430_v46 = vld [vmem:[%s7606_s0 + $0x28] sm:$0xff]  ;;  %v6435_v47 = vld [vmem:[%s7606_s0 + $0x30] sm:$0xff]  ;;  %v6444_v48 = vld [vmem:[%s7606_s0 + $0x38] sm:$0xff] }
   0x6   :  { %5452 = vmatpush3.msra.mxu1 %v6326_v3  ;;  %5433 = vmatprep.subr.mxu0 %v34_v20 }
   0x7   :  { %5453 = vmatprep.subr.mxu1 %v6275_v0  ;;  %5434 = vmatpush3.msra.mxu0 %v34_v20 }
   0x8   :  { %5454 = vmatpush3.msra.mxu1 %v6333_v4  ;;  %5436 = vmatmul.mubr.msk.f32.vlgmr.msra.gmra.mxu0 %vm40_vm1, %v6374_v22 }
   0x9   :  { %5456 = vmatmul.mubr.f32.vlgmr.msra.gmra.mxu1 %v6275_v0  ;;  %5458 = vmatprep.subr.mxu1 %v6275_v0 }
   0xa   :  { %5459 = vmatpush3.msra.mxu1 %v6312_v1  ;;  %5466 = vmatprep.mubr.msk.f32.mxu1 %vm6276_vm0, %v6275_v0 }
   0xb   :  { %5460 = vmatprep.subr.mxu1 %v6275_v0  ;;  %5469 = vmatprep.subr.mxu0 %v6275_v0 }
   0xc   :  { %5461 = vmatpush3.msra.mxu1 %v6317_v2  ;;  %5470 = vmatpush3.msra.mxu0 %v6312_v1 }
   0xd   :  { %5462 = vmatprep.subr.mxu1 %v6275_v0  ;;  %5471 = vmatprep.subr.mxu0 %v6275_v0 }
   0xe   :  { %5463 = vmatpush3.msra.mxu1 %v6326_v3  ;;  %5472 = vmatpush3.msra.mxu0 %v6317_v2 }
   0xf   :  { %5464 = vmatprep.subr.mxu1 %v6275_v0  ;;  %5473 = vmatprep.subr.mxu0 %v6275_v0 }
  0x10   :  { %5465 = vmatpush3.msra.mxu1 %v6333_v4  ;;  %5474 = vmatpush3.msra.mxu0 %v6326_v3 }
  0x11   :  { %5480 = vmatprep.subr.mxu1 %v6275_v0  ;;  %5475 = vmatprep.subr.mxu0 %v6275_v0 }
  0x12   :  { %5476 = vmatpush3.msra.mxu0 %v6333_v4  ;;  %5438 = vmatprep.mubr.msk.f32.mxu0 %vm40_vm1, %v6409_v43 }
  0x13   :  { %5491 = vmatprep.subr.mxu0 %v6275_v0  ;;  %5439 = vmatmul.mubr.msk.f32.gmra.mxu0 %vm40_vm1, %v6414_v44 }
  0x14   :  { %5441 = vmatprep.mubr.msk.f32.mxu0 %vm40_vm1, %v6419_v45 }
  0x17   :  { %5442 = vmatmul.mubr.msk.f32.gmra.mxu0 %vm40_vm1, %v6430_v46 }
  0x18   :  { %5444 = vmatprep.mubr.msk.f32.mxu0 %vm40_vm1, %v6435_v47 }
  0x1b   :  { %5445 = vmatmul.mubr.msk.f32.gmra.mxu0 %vm40_vm1, %v6444_v48 }
  0x1c   :  { %5477 = vmatprep.mubr.msk.f32.mxu0 %vm6276_vm0, %v6275_v0 }
  0xc8   :  { %v5437_v27 = vpop.f32.mrf.mxu0 }
  0xc9   :  { %v243_v6 = vpop.f32.mrf.mxu1  ;;  %v137_v59 = vadd.f32 %v5437_v27, %v6353_v5 }
  0xca   :  { %v247_v7 = vadd.f32 %v6353_v5, %v243_v6  ;;  %v131_v28 = vpop.f32.mrf.mxu0 }
  0xcb   :  { %v5457_v8 = vpop.f32.mrf.mxu1  ;;  %v132_v29 = vadd.f32 %v6353_v5, %v131_v28 }
  0xcc   :  { %6035 = vtanh.f32 %v247_v7  ;;  %v5008_v10 = vmul.f32 -1.442695, %v247_v7 }
  0xce   :  { %6037 = vpow2.f32 %v5008_v10 }
  0xd3   :  { %v6452_v52 = vpop.f32.mrf.mxu0 }
  0xd5   :  { %v141_v53 = vpop.f32.mrf.mxu0 }
  0xd6   :  { %v142_v19 = vadd.f32 %v6353_v5, %v141_v53 }
  0xd7   :  { %v6454_v54 = vpop.f32.mrf.mxu0 }
  0xd9   :  { %v6036_v9 = vpop.eup %6035  ;;  %v6456_v55 = vpop.f32.mrf.mxu0 }
  0xda   :  { %257 = vrot.lane.b32.xlu0 %v6036_v9, %s6277_s25 }
  0xdb   :  { %v6038_v11 = vpop.eup %6037  ;;  %v5446_v56 = vpop.f32.mrf.mxu0 }
  0xdc   :  { %v251_v12 = vadd.f32 1.0, %v6038_v11 }
  0xdd   :  { %v6472_v58 = vpop.f32.mrf.mxu0 }
  0xde   :  { %6039 = vrcp.f32 %v251_v12 }
  0xeb   :  { %v6040_v13 = vpop.eup %6039 }
  0xec   :  { %v255_v16 = vmul.f32 0.0, %v6040_v13 }
 0x14c   :  { %v258_v14 = vpop.permute.xlu0 %257 }
 0x14d   :  { %v260_v15 = vmul.f32 %v6040_v13, %v258_v14 }
 0x14f   :  { %262 = vrot.lane.b32.xlu0 %v260_v15, %s6278_s26 }
 0x1c1   :  { %v263_v17 = vpop.permute.xlu0 %262 }
 0x1c2   :  { %v265_v18 = vadd.f32 %v263_v17, %v255_v16 }
 0x1c4   :  { %6041 = vtanh.f32 %v265_v18 }
 0x1d1   :  { %v6042_v23 = vpop.eup %6041 }
 0x1d2   :  { %268 = vrot.lane.b32.xlu1 %v6042_v23, %s6277_s25 }
 0x244   :  { %v269_v24 = vpop.permute.xlu1 %268 }
 0x245   :  { %v271_v25 = vmul.f32 %v6040_v13, %v269_v24 }
 0x247   :  { %273 = vrot.lane.b32.xlu1 %v271_v25, %s6278_s26 }
 0x2b9   :  { %v6389_v26 = vpop.permute.xlu1 %273 }
 0x2ba   :  { %5467 = vmatmul.mubr.msk.f32.vlgmr.msra.gmra.mxu1 %vm173_vm2, %v6389_v26 }
 0x2bb   :  { %5481 = vmatpush3.msra.mxu1 %v6312_v1  ;;  %5488 = vmatprep.mubr.msk.f32.mxu1 %vm6276_vm0, %v6275_v0 }
 0x2bc   :  { %5482 = vmatprep.subr.mxu1 %v6275_v0 }
 0x2bd   :  { %5483 = vmatpush3.msra.mxu1 %v6317_v2 }
 0x2be   :  { %5484 = vmatprep.subr.mxu1 %v6275_v0 }
 0x2bf   :  { %5485 = vmatpush3.msra.mxu1 %v6326_v3 }
 0x2c0   :  { %5486 = vmatprep.subr.mxu1 %v6275_v0 }
 0x2c1   :  { %5487 = vmatpush3.msra.mxu1 %v6333_v4 }
 0x2c2   :  { %5502 = vmatprep.subr.mxu1 %v6275_v0 }
 0x37a   :  { %v343_v30 = vpop.f32.mrf.mxu1 }
 0x37b   :  { %v347_v31 = vadd.f32 %v343_v30, %v132_v29 }
 0x37c   :  { %v5468_v32 = vpop.f32.mrf.mxu1 }
 0x37d   :  { %6043 = vtanh.f32 %v347_v31  ;;  %v5010_v34 = vmul.f32 -1.442695, %v347_v31 }
 0x37f   :  { %6045 = vpow2.f32 %v5010_v34 }
 0x38a   :  { %v6044_v33 = vpop.eup %6043 }
 0x38b   :  { %357 = vrot.lane.b32.xlu0 %v6044_v33, %s6277_s25 }
 0x38c   :  { %v6046_v35 = vpop.eup %6045 }
 0x38d   :  { %v351_v36 = vadd.f32 1.0, %v6046_v35 }
 0x38f   :  { %6047 = vrcp.f32 %v351_v36 }
 0x39c   :  { %v6048_v37 = vpop.eup %6047 }
 0x39d   :  { %v355_v40 = vmul.f32 %v6048_v37, %v265_v18 }
 0x3fd   :  { %v358_v38 = vpop.permute.xlu0 %357 }
 0x3fe   :  { %v360_v39 = vmul.f32 %v6048_v37, %v358_v38 }
 0x400   :  { %362 = vrot.lane.b32.xlu1 %v360_v39, %s6278_s26 }
 0x472   :  { %v363_v41 = vpop.permute.xlu1 %362 }
 0x473   :  { %v365_v42 = vadd.f32 %v363_v41, %v355_v40  ;;  %v147_v40 = vadd.f32 %v6452_v52, %v6353_v5 }
 0x475   :  { %6049 = vtanh.f32 %v365_v42 }
 0x482   :  { %v6050_v49 = vpop.eup %6049 }
 0x483   :  { %368 = vrot.lane.b32.xlu0 %v6050_v49, %s6277_s25 }
 0x4f5   :  { %v369_v50 = vpop.permute.xlu0 %368 }
 0x4f6   :  { %v371_v51 = vmul.f32 %v6048_v37, %v369_v50 }
 0x4f8   :  { %373 = vrot.lane.b32.xlu1 %v371_v51, %s6278_s26 }
 0x56a   :  { %v6458_v57 = vpop.permute.xlu1 %373 }
 0x56b   :  { %5478 = vmatmul.mubr.msk.f32.vlgmr.msra.gmra.mxu0 %vm173_vm2, %v6458_v57 }
 0x56c   :  { %5492 = vmatpush3.msra.mxu0 %v6312_v1  ;;  %5499 = vmatprep.mubr.msk.f32.mxu0 %vm6276_vm0, %v6275_v0 }
 0x56d   :  { %5493 = vmatprep.subr.mxu0 %v6275_v0 }
 0x56e   :  { %5494 = vmatpush3.msra.mxu0 %v6317_v2 }
 0x56f   :  { %5495 = vmatprep.subr.mxu0 %v6275_v0 }
 0x570   :  { %5496 = vmatpush3.msra.mxu0 %v6326_v3 }
 0x571   :  { %5497 = vmatprep.subr.mxu0 %v6275_v0 }
 0x572   :  { %5498 = vmatpush3.msra.mxu0 %v6333_v4 }
 0x573   :  { %5513 = vmatprep.subr.mxu0 %v6275_v0 }
 0x62b   :  { %v443_v60 = vpop.f32.mrf.mxu0 }
 0x62c   :  { %v447_v61 = vadd.f32 %v443_v60, %v137_v59 }
 0x62d   :  { %v5479_v62 = vpop.f32.mrf.mxu0 }
 0x62e   :  { %6051 = vtanh.f32 %v447_v61  ;;  %v5012_v6 = vmul.f32 -1.442695, %v447_v61 }
 0x630   :  { %6053 = vpow2.f32 %v5012_v6 }
 0x63b   :  { %v6052_v63 = vpop.eup %6051 }
 0x63c   :  { %457 = vrot.lane.b32.xlu0 %v6052_v63, %s6277_s25 }
 0x63d   :  { %v6054_v7 = vpop.eup %6053 }
 0x63e   :  { %v451_v8 = vadd.f32 1.0, %v6054_v7 }
 0x640   :  { %6055 = vrcp.f32 %v451_v8 }
 0x64d   :  { %v6056_v9 = vpop.eup %6055 }
 0x64e   :  { %v455_v12 = vmul.f32 %v6056_v9, %v365_v42 }
 0x6ae   :  { %v458_v10 = vpop.permute.xlu0 %457 }
 0x6af   :  { %v460_v11 = vmul.f32 %v6056_v9, %v458_v10 }
 0x6b1   :  { %462 = vrot.lane.b32.xlu1 %v460_v11, %s6278_s26 }
 0x723   :  { %v463_v13 = vpop.permute.xlu1 %462 }
 0x724   :  { %v465_v14 = vadd.f32 %v463_v13, %v455_v12 }
 0x726   :  { %6057 = vtanh.f32 %v465_v14 }
 0x733   :  { %v6058_v15 = vpop.eup %6057 }
 0x734   :  { %468 = vrot.lane.b32.xlu0 %v6058_v15, %s6277_s25 }
 0x7a6   :  { %v469_v16 = vpop.permute.xlu0 %468 }
 0x7a7   :  { %v471_v17 = vmul.f32 %v6056_v9, %v469_v16 }
 0x7a9   :  { %473 = vrot.lane.b32.xlu1 %v471_v17, %s6278_s26 }
 0x81b   :  { %v6479_v18 = vpop.permute.xlu1 %473 }
 0x81c   :  { %5489 = vmatmul.mubr.msk.f32.vlgmr.msra.gmra.mxu1 %vm173_vm2, %v6479_v18 }
 0x81d   :  { %5503 = vmatpush3.msra.mxu1 %v6312_v1  ;;  %5510 = vmatprep.mubr.msk.f32.mxu1 %vm6276_vm0, %v6275_v0 }
 0x81e   :  { %5504 = vmatprep.subr.mxu1 %v6275_v0 }
 0x81f   :  { %5505 = vmatpush3.msra.mxu1 %v6317_v2 }
 0x820   :  { %5506 = vmatprep.subr.mxu1 %v6275_v0 }
 0x821   :  { %5507 = vmatpush3.msra.mxu1 %v6326_v3 }
 0x822   :  { %5508 = vmatprep.subr.mxu1 %v6275_v0 }
 0x823   :  { %5509 = vmatpush3.msra.mxu1 %v6333_v4 }
 0x824   :  { %5524 = vmatprep.subr.mxu1 %v6275_v0 }
 0x8dc   :  { %v543_v20 = vpop.f32.mrf.mxu1 }
 0x8dd   :  { %v547_v23 = vadd.f32 %v543_v20, %v142_v19 }
 0x8de   :  { %v5490_v24 = vpop.f32.mrf.mxu1 }
 0x8df   :  { %6059 = vtanh.f32 %v547_v23  ;;  %v5014_v27 = vmul.f32 -1.442695, %v547_v23 }
 0x8e1   :  { %6061 = vpow2.f32 %v5014_v27  ;;  %v157_v27 = vadd.f32 %v6454_v54, %v6353_v5 }
 0x8ec   :  { %v6060_v25 = vpop.eup %6059 }
 0x8ed   :  { %557 = vrot.lane.b32.xlu0 %v6060_v25, %s6277_s25 }
 0x8ee   :  { %v6062_v28 = vpop.eup %6061 }
 0x8ef   :  { %v551_v29 = vadd.f32 1.0, %v6062_v28 }
 0x8f1   :  { %6063 = vrcp.f32 %v551_v29 }
 0x8fe   :  { %v6064_v30 = vpop.eup %6063 }
 0x8ff   :  { %v555_v33 = vmul.f32 %v6064_v30, %v465_v14 }
 0x95f   :  { %v558_v31 = vpop.permute.xlu0 %557 }
 0x960   :  { %v560_v32 = vmul.f32 %v6064_v30, %v558_v31 }
 0x962   :  { %562 = vrot.lane.b32.xlu1 %v560_v32, %s6278_s26 }
 0x9d4   :  { %v563_v34 = vpop.permute.xlu1 %562 }
 0x9d5   :  { %v565_v35 = vadd.f32 %v563_v34, %v555_v33 }
 0x9d7   :  { %6065 = vtanh.f32 %v565_v35 }
 0x9e4   :  { %v6066_v36 = vpop.eup %6065 }
 0x9e5   :  { %568 = vrot.lane.b32.xlu0 %v6066_v36, %s6277_s25 }
 0xa57   :  { %v569_v37 = vpop.permute.xlu0 %568 }
 0xa58   :  { %v571_v38 = vmul.f32 %v6064_v30, %v569_v37 }
 0xa5a   :  { %573 = vrot.lane.b32.xlu1 %v571_v38, %s6278_s26 }
 0xacc   :  { %v6498_v39 = vpop.permute.xlu1 %573 }
 0xacd   :  { %5500 = vmatmul.mubr.msk.f32.vlgmr.msra.gmra.mxu0 %vm173_vm2, %v6498_v39 }
 0xace   :  { %5514 = vmatpush3.msra.mxu0 %v6312_v1  ;;  %5521 = vmatprep.mubr.msk.f32.mxu0 %vm6276_vm0, %v6275_v0 }
 0xacf   :  { %5515 = vmatprep.subr.mxu0 %v6275_v0 }
 0xad0   :  { %5516 = vmatpush3.msra.mxu0 %v6317_v2 }
 0xad1   :  { %5517 = vmatprep.subr.mxu0 %v6275_v0 }
 0xad2   :  { %5518 = vmatpush3.msra.mxu0 %v6326_v3 }
 0xad3   :  { %5519 = vmatprep.subr.mxu0 %v6275_v0 }
 0xad4   :  { %5520 = vmatpush3.msra.mxu0 %v6333_v4 }
 0xb8d   :  { %v643_v41 = vpop.f32.mrf.mxu0 }
 0xb8e   :  { %v647_v42 = vadd.f32 %v643_v41, %v147_v40 }
 0xb8f   :  { %v5501_v49 = vpop.f32.mrf.mxu0 }
 0xb90   :  { %6067 = vtanh.f32 %v647_v42  ;;  %v5016_v51 = vmul.f32 -1.442695, %v647_v42 }
 0xb92   :  { %6069 = vpow2.f32 %v5016_v51  ;;  %v162_v51 = vadd.f32 %v6353_v5, %v6472_v58  ;;  %v1019_v58 = vld [vmem:[%s7605_s2 + $0x58] sm:$0xff] }
 0xb9d   :  { %v6068_v50 = vpop.eup %6067 }
 0xb9e   :  { %657 = vrot.lane.b32.xlu0 %v6068_v50, %s6277_s25 }
 0xb9f   :  { %v6070_v53 = vpop.eup %6069 }
 0xba0   :  { %v651_v56 = vadd.f32 1.0, %v6070_v53 }
 0xba2   :  { %6071 = vrcp.f32 %v651_v56 }
 0xbaf   :  { %v6072_v59 = vpop.eup %6071 }
 0xbb0   :  { %v655_v62 = vmul.f32 %v6072_v59, %v565_v35 }
 0xc10   :  { %v658_v60 = vpop.permute.xlu0 %657 }
 0xc11   :  { %v660_v61 = vmul.f32 %v6072_v59, %v658_v60 }
 0xc13   :  { %662 = vrot.lane.b32.xlu1 %v660_v61, %s6278_s26 }
 0xc85   :  { %v663_v63 = vpop.permute.xlu1 %662 }
 0xc86   :  { %v665_v52 = vadd.f32 %v663_v63, %v655_v62 }
 0xc88   :  { %6073 = vtanh.f32 %v665_v52 }
 0xc95   :  { %v6074_v6 = vpop.eup %6073 }
 0xc96   :  { %668 = vrot.lane.b32.xlu0 %v6074_v6, %s6277_s25 }
 0xd08   :  { %v669_v7 = vpop.permute.xlu0 %668 }
 0xd09   :  { %v671_v8 = vmul.f32 %v6072_v59, %v669_v7 }
 0xd0b   :  { %673 = vrot.lane.b32.xlu1 %v671_v8, %s6278_s26 }
 0xd7d   :  { %v6517_v9 = vpop.permute.xlu1 %673 }
 0xd7e   :  { %5511 = vmatmul.mubr.msk.f32.vlgmr.msra.gmra.mxu1 %vm173_vm2, %v6517_v9 }
 0xd7f   :  { %5525 = vmatpush3.msra.mxu1 %v6312_v1  ;;  %5532 = vmatprep.mubr.msk.f32.mxu1 %vm6276_vm0, %v6275_v0  ;;  %v152_v1 = vadd.f32 %v6353_v5, %v6456_v55  ;;  %v1020_v5 = vld [vmem:[%s7605_s2 + $0x60] sm:$0xff] }
 0xd80   :  { %5526 = vmatprep.subr.mxu1 %v6275_v0  ;;  %5535 = vmatprep.subr.mxu0 %v1020_v5 }
 0xd81   :  { %5527 = vmatpush3.msra.mxu1 %v6317_v2 }
 0xd82   :  { %5528 = vmatprep.subr.mxu1 %v6275_v0 }
 0xd83   :  { %5529 = vmatpush3.msra.mxu1 %v6326_v3 }
 0xd84   :  { %5530 = vmatprep.subr.mxu1 %v6275_v0 }
 0xd85   :  { %5531 = vmatpush3.msra.mxu1 %v6333_v4 }
 0xd86   :  { %5559 = vmatprep.subr.mxu1 %v6275_v0 }
 0xe3e   :  { %v743_v10 = vpop.f32.mrf.mxu1 }
 0xe3f   :  { %v747_v11 = vadd.f32 %v743_v10, %v152_v1  ;;  %v1016_v10 = vld [vmem:[%s7605_s2 + $0x40] sm:$0xff] }
 0xe40   :  { %v5512_v12 = vpop.f32.mrf.mxu1 }
 0xe41   :  { %6075 = vtanh.f32 %v747_v11  ;;  %v5018_v2 = vmul.f32 -1.442695, %v747_v11 }
 0xe43   :  { %6077 = vpow2.f32 %v5018_v2  ;;  %v6602_v2 = vld [vmem:[%s7605_s2 + $0x78] sm:$0xff] }
 0xe4e   :  { %v6076_v13 = vpop.eup %6075 }
 0xe4f   :  { %757 = vrot.lane.b32.xlu0 %v6076_v13, %s6277_s25  ;;  %v6597_v13 = vld [vmem:[%s7605_s2 + $0x80] sm:$0xff] }
 0xe50   :  { %v6078_v14 = vpop.eup %6077 }
 0xe51   :  { %v751_v3 = vadd.f32 1.0, %v6078_v14  ;;  %v6609_v14 = vld [vmem:[%s7605_s2 + $0x70] sm:$0xff] }
 0xe53   :  { %6079 = vrcp.f32 %v751_v3  ;;  %v6624_v3 = vld [vmem:[%s7605_s2 + $0x68] sm:$0xff] }
 0xe60   :  { %v6080_v15 = vpop.eup %6079 }
 0xe61   :  { %v755_v17 = vmul.f32 %v6080_v15, %v665_v52 }
 0xec1   :  { %v758_v16 = vpop.permute.xlu0 %757 }
 0xec2   :  { %v760_v4 = vmul.f32 %v6080_v15, %v758_v16 }
 0xec4   :  { %762 = vrot.lane.b32.xlu1 %v760_v4, %s6278_s26 }
 0xf36   :  { %v763_v19 = vpop.permute.xlu1 %762 }
 0xf37   :  { %v765_v55 = vadd.f32 %v763_v19, %v755_v17 }
 0xf39   :  { %6081 = vtanh.f32 %v765_v55 }
 0xf46   :  { %v6082_v20 = vpop.eup %6081 }
 0xf47   :  { %768 = vrot.lane.b32.xlu0 %v6082_v20, %s6277_s25 }
 0xfb9   :  { %v769_v23 = vpop.permute.xlu0 %768 }
 0xfba   :  { %v771_v24 = vmul.f32 %v6080_v15, %v769_v23 }
 0xfbc   :  { %773 = vrot.lane.b32.xlu1 %v771_v24, %s6278_s26 }
0x102e   :  { %v6537_v25 = vpop.permute.xlu1 %773 }
0x102f   :  { %5522 = vmatmul.mubr.msk.f32.vlgmr.msra.gmra.mxu0 %vm173_vm2, %v6537_v25 }
0x1030   :  { %5536 = vmatpush3.msra.mxu0 %v1020_v5 }
0x1031   :  { %5537 = vmatprep.subr.mxu0 %v1019_v58 }
0x1032   :  { %5538 = vmatpush3.msra.mxu0 %v1019_v58 }
0x10ef   :  { %v843_v28 = vpop.f32.mrf.mxu0 }
0x10f0   :  { %v847_v29 = vadd.f32 %v843_v28, %v157_v27 }
0x10f1   :  { %v5523_v30 = vpop.f32.mrf.mxu0 }
0x10f2   :  { %6083 = vtanh.f32 %v847_v29  ;;  %v5020_v32 = vmul.f32 -1.442695, %v847_v29 }
0x10f4   :  { %6085 = vpow2.f32 %v5020_v32 }
0x10ff   :  { %v6084_v31 = vpop.eup %6083 }
0x1100   :  { %857 = vrot.lane.b32.xlu0 %v6084_v31, %s6277_s25 }
0x1101   :  { %v6086_v33 = vpop.eup %6085 }
0x1102   :  { %v851_v34 = vadd.f32 1.0, %v6086_v33 }
0x1104   :  { %6087 = vrcp.f32 %v851_v34 }
0x1111   :  { %v6088_v35 = vpop.eup %6087 }
0x1112   :  { %v855_v38 = vmul.f32 %v6088_v35, %v765_v55 }
0x1172   :  { %v858_v36 = vpop.permute.xlu0 %857 }
0x1173   :  { %v860_v37 = vmul.f32 %v6088_v35, %v858_v36 }
0x1175   :  { %862 = vrot.lane.b32.xlu1 %v860_v37, %s6278_s26 }
0x11e7   :  { %v863_v40 = vpop.permute.xlu1 %862 }
0x11e8   :  { %v865_v54 = vadd.f32 %v863_v40, %v855_v38 }
0x11ea   :  { %6089 = vtanh.f32 %v865_v54 }
0x11f7   :  { %v6090_v41 = vpop.eup %6089 }
0x11f8   :  { %868 = vrot.lane.b32.xlu0 %v6090_v41, %s6277_s25 }
0x126a   :  { %v869_v42 = vpop.permute.xlu0 %868 }
0x126b   :  { %v871_v49 = vmul.f32 %v6088_v35, %v869_v42 }
0x126d   :  { %873 = vrot.lane.b32.xlu1 %v871_v49, %s6278_s26 }
0x12df   :  { %v6547_v50 = vpop.permute.xlu1 %873 }
0x12e0   :  { %5533 = vmatmul.mubr.msk.f32.vlgmr.msra.gmra.mxu1 %vm173_vm2, %v6547_v50 }
0x12e1   :  { %5567 = vmatprep.mubr.msk.f32.mxu1 %vm6276_vm0, %v6275_v0  ;;  %5560 = vmatpush3.msra.mxu1 %v6597_v13 }
0x12e2   :  { %5561 = vmatprep.subr.mxu1 %v6275_v0 }
0x12e3   :  { %5562 = vmatpush3.msra.mxu1 %v6602_v2 }
0x12e4   :  { %5563 = vmatprep.subr.mxu1 %v6275_v0 }
0x12e5   :  { %5564 = vmatpush3.msra.mxu1 %v6609_v14 }
0x12e6   :  { %5565 = vmatprep.subr.mxu1 %v6275_v0 }
0x12e7   :  { %5566 = vmatpush3.msra.mxu1 %v6624_v3 }
0x12e8   :  { %5568 = vmatmul.mubr.f32.vlgmr.msra.gmra.mxu1 %v6275_v0  ;;  %5570 = vmatprep.subr.mxu1 %v6275_v0 }
0x12e9   :  { %5571 = vmatpush3.msra.mxu1 %v6597_v13  ;;  %5578 = vmatprep.mubr.msk.f32.mxu1 %vm6276_vm0, %v6275_v0 }
0x12ea   :  { %5572 = vmatprep.subr.mxu1 %v6275_v0 }
0x12eb   :  { %5573 = vmatpush3.msra.mxu1 %v6602_v2 }
0x12ec   :  { %5574 = vmatprep.subr.mxu1 %v6275_v0 }
0x12ed   :  { %5575 = vmatpush3.msra.mxu1 %v6609_v14 }
0x12ee   :  { %5576 = vmatprep.subr.mxu1 %v6275_v0 }
0x12ef   :  { %5577 = vmatpush3.msra.mxu1 %v6624_v3 }
0x12f0   :  { %5592 = vmatprep.subr.mxu1 %v6275_v0 }
0x13a0   :  { %v943_v53 = vpop.f32.mrf.mxu1 }
0x13a1   :  { %v947_v56 = vadd.f32 %v943_v53, %v162_v51 }
0x13a2   :  { %v5534_v59 = vpop.f32.mrf.mxu1 }
0x13a3   :  { %6091 = vtanh.f32 %v947_v56  ;;  %v5022_v61 = vmul.f32 -1.442695, %v947_v56 }
0x13a5   :  { %6093 = vpow2.f32 %v5022_v61 }
0x13a8   :  { %v1226_v32 = vpop.f32.mrf.mxu1 }
0x13aa   :  { %v5569_v33 = vpop.f32.mrf.mxu1 }
0x13b0   :  { %v6092_v60 = vpop.eup %6091 }
0x13b1   :  { %957 = vrot.lane.b32.xlu0 %v6092_v60, %s6277_s25 }
0x13b2   :  { %v6094_v62 = vpop.eup %6093 }
0x13b3   :  { %v951_v63 = vadd.f32 1.0, %v6094_v62 }
0x13b5   :  { %6095 = vrcp.f32 %v951_v63 }
0x13c2   :  { %v6556_v52 = vpop.eup %6095 }
0x1423   :  { %v958_v6 = vpop.permute.xlu0 %957 }
0x1424   :  { %v960_v7 = vmul.f32 %v6556_v52, %v958_v6 }
0x1426   :  { %962 = vrot.lane.b32.xlu1 %v960_v7, %s6278_s26 }
0x142a   :  { %983 = vrot.lane.b32.xlu1 %v6367_v21, %s6278_s26  ;;  %v1018_v21 = vld [vmem:[%s7605_s2 + $0x50] sm:$0xff] }
0x142b   :  { %5539 = vmatprep.subr.mxu0 %v1018_v21 }
0x142c   :  { %5540 = vmatpush3.msra.mxu0 %v1018_v21 }
0x142e   :  { %987 = vrot.lane.b32.xlu1 %v6409_v43, %s6278_s26  ;;  %v1017_v43 = vld [vmem:[%s7605_s2 + $0x48] sm:$0xff] }
0x142f   :  { %5541 = vmatprep.subr.mxu0 %v1017_v43 }
0x1430   :  { %5542 = vmatpush3.msra.mxu0 %v1017_v43 }
0x1431   :  { %5543 = vmatprep.subr.mxu0 %v1016_v10 }
0x1432   :  { %991 = vrot.lane.b32.xlu1 %v6419_v45, %s6278_s26  ;;  %v955_v45 = vmul.f32 %v6556_v52, %v865_v54  ;;  %5544 = vmatpush3.msra.mxu0 %v1016_v10  ;;  %v6689_v54 = vld [vmem:[%s7605_s2 + $0x88] ss:$0 sm:$0xff] }
0x1436   :  { %995 = vrot.lane.b32.xlu1 %v6435_v47, %s6278_s26 }
0x143a   :  { %997 = vrot.lane.b32.xlu1 %v6444_v48, %s6278_s26  ;;  %v1015_v48 = vld [vmem:[%s7605_s2 + $0x38] sm:$0xff] }
0x143b   :  { %5545 = vmatprep.subr.mxu0 %v1015_v48 }
0x143c   :  { %5546 = vmatpush3.msra.mxu0 %v1015_v48 }
0x143d   :  { %5581 = vmatprep.subr.mxu0 %v6275_v0 }
0x1498   :  { %v963_v47 = vpop.permute.xlu1 %962 }
0x1499   :  { %v965_v8 = vadd.f32 %v963_v47, %v955_v45 }
0x149b   :  { %6097 = vtanh.f32 %v965_v8 }
0x149c   :  { %v984_v1 = vpop.permute.xlu1 %983 }
0x149d   :  { %v1007_v11 = vsel %vm173_vm2, %v6389_v26, %v984_v1 }
0x149e   :  { %5547 = vmatprep.mubr.msk.f32.mxu0 %vm1026_vm3, %v1007_v11 }
0x14a8   :  { %v6098_v12 = vpop.eup %6097 }
0x14a9   :  { %968 = vrot.lane.b32.xlu0 %v6098_v12, %s6277_s25 }
0x14ad   :  { %985 = vrot.lane.b32.xlu0 %v6374_v22, %s6278_s26  ;;  %v988_v22 = vpop.permute.xlu1 %987 }
0x14ae   :  { %v1009_v17 = vsel %vm173_vm2, %v6479_v18, %v988_v22 }
0x14b1   :  { %989 = vrot.lane.b32.xlu0 %v6414_v44, %s6278_s26  ;;  %v992_v16 = vpop.permute.xlu1 %991 }
0x14b2   :  { %v1011_v20 = vsel %vm173_vm2, %v6517_v9, %v992_v16 }
0x14b5   :  { %993 = vrot.lane.b32.xlu0 %v6430_v46, %s6278_s26  ;;  %v996_v23 = vpop.permute.xlu1 %995 }
0x14b6   :  { %v1013_v28 = vsel %vm173_vm2, %v6547_v50, %v996_v23 }
0x14b9   :  { %v998_v29 = vpop.permute.xlu1 %997 }
0x151b   :  { %v969_v44 = vpop.permute.xlu0 %968 }
0x151c   :  { %v971_v46 = vmul.f32 %v6556_v52, %v969_v44 }
0x151e   :  { %973 = vrot.lane.b32.xlu0 %v971_v46, %s6278_s26 }
0x151f   :  { %v986_v15 = vpop.permute.xlu0 %985 }
0x1520   :  { %v1008_v4 = vsel %vm173_vm2, %v6458_v57, %v986_v15 }
0x1521   :  { %5548 = vmatmul.mubr.msk.f32.vlgmr.msra.gmra.mxu0 %vm1026_vm3, %v1008_v4 }
0x1522   :  { %5550 = vmatprep.mubr.msk.f32.mxu0 %vm1026_vm3, %v1009_v17  ;;  %5582 = vmatpush3.msra.mxu0 %v6597_v13 }
0x1523   :  { %v990_v19 = vpop.permute.xlu0 %989  ;;  %5583 = vmatprep.subr.mxu0 %v6275_v0 }
0x1524   :  { %v1010_v55 = vsel %vm173_vm2, %v6498_v39, %v990_v19  ;;  %5584 = vmatpush3.msra.mxu0 %v6602_v2 }
0x1525   :  { %5551 = vmatmul.mubr.msk.f32.gmra.mxu0 %vm1026_vm3, %v1010_v55  ;;  %5585 = vmatprep.subr.mxu0 %v6275_v0 }
0x1526   :  { %5553 = vmatprep.mubr.msk.f32.mxu0 %vm1026_vm3, %v1011_v20  ;;  %5586 = vmatpush3.msra.mxu0 %v6609_v14 }
0x1527   :  { %v994_v24 = vpop.permute.xlu0 %993  ;;  %5587 = vmatprep.subr.mxu0 %v6275_v0 }
0x1528   :  { %v1012_v27 = vsel %vm173_vm2, %v6537_v25, %v994_v24  ;;  %5588 = vmatpush3.msra.mxu0 %v6624_v3 }
0x1529   :  { %5554 = vmatmul.mubr.msk.f32.gmra.mxu0 %vm1026_vm3, %v1012_v27  ;;  %5603 = vmatprep.subr.mxu0 %v6275_v0 }
0x152a   :  { %5556 = vmatprep.mubr.msk.f32.mxu0 %vm1026_vm3, %v1013_v28 }
0x1590   :  { %v6667_v30 = vpop.permute.xlu0 %973 }
0x1591   :  { %v1014_v31 = vsel %vm173_vm2, %v6667_v30, %v998_v29 }
0x1592   :  { %5557 = vmatmul.mubr.msk.f32.gmra.mxu0 %vm1026_vm3, %v1014_v31 }
0x1593   :  { %5589 = vmatprep.mubr.msk.f32.mxu0 %vm6276_vm0, %v6275_v0 }
0x15e1   :  { %v6674_v34 = vpop.f32.mrf.mxu0 }
0x15e3   :  { %v6676_v35 = vpop.f32.mrf.mxu0 }
0x15e5   :  { %v6678_v36 = vpop.f32.mrf.mxu0 }
0x15e7   :  { %v6680_v37 = vpop.f32.mrf.mxu0 }
0x15e9   :  { %v6682_v38 = vpop.f32.mrf.mxu0 }
0x15ea   :  { %v1143_v23 = vadd.f32 %v6682_v38, %v6689_v54 }
0x15eb   :  { %v6684_v40 = vpop.f32.mrf.mxu0 }
0x1652   :  { %v5558_v41 = vpop.f32.mrf.mxu0 }
0x1653   :  { %v1153_v42 = vadd.f32 %v5558_v41, %v6689_v54 }
0x1654   :  { %v1147_v43 = vpop.f32.mrf.mxu0 }
0x1655   :  { %v1230_v49 = vadd.f32 %v1226_v32, %v1153_v42  ;;  %v1148_v45 = vadd.f32 %v6689_v54, %v1147_v43 }
0x1657   :  { %6099 = vtanh.f32 %v1230_v49  ;;  %v5032_v53 = vmul.f32 -1.442695, %v1230_v49 }
0x1659   :  { %6101 = vpow2.f32 %v5032_v53 }
0x1664   :  { %v6100_v51 = vpop.eup %6099 }
0x1665   :  { %1240 = vrot.lane.b32.xlu0 %v6100_v51, %s6277_s25 }
0x1666   :  { %v6102_v56 = vpop.eup %6101 }
0x1667   :  { %v1234_v59 = vadd.f32 1.0, %v6102_v56 }
0x1669   :  { %6103 = vrcp.f32 %v1234_v59 }
0x1676   :  { %v6104_v60 = vpop.eup %6103 }
0x1677   :  { %v1238_v63 = vmul.f32 0.0, %v6104_v60 }
0x16d7   :  { %v1241_v61 = vpop.permute.xlu0 %1240 }
0x16d8   :  { %v1243_v62 = vmul.f32 %v6104_v60, %v1241_v61 }
0x16da   :  { %1245 = vrot.lane.b32.xlu1 %v1243_v62, %s6278_s26  ;;  %v1138_v62 = vadd.f32 %v6689_v54, %v6684_v40 }
0x174c   :  { %v1246_v52 = vpop.permute.xlu1 %1245 }
0x174d   :  { %v1248_v6 = vadd.f32 %v1246_v52, %v1238_v63 }
0x174f   :  { %6105 = vtanh.f32 %v1248_v6 }
0x175c   :  { %v6106_v7 = vpop.eup %6105 }
0x175d   :  { %1251 = vrot.lane.b32.xlu0 %v6106_v7, %s6277_s25 }
0x17cf   :  { %v1252_v5 = vpop.permute.xlu0 %1251 }
0x17d0   :  { %v1254_v58 = vmul.f32 %v6104_v60, %v1252_v5 }
0x17d2   :  { %1256 = vrot.lane.b32.xlu1 %v1254_v58, %s6278_s26 }
0x1844   :  { %v6696_v21 = vpop.permute.xlu1 %1256 }
0x1845   :  { %5579 = vmatmul.mubr.msk.f32.vlgmr.msra.gmra.mxu1 %vm173_vm2, %v6696_v21 }
0x1846   :  { %5593 = vmatpush3.msra.mxu1 %v6597_v13  ;;  %5600 = vmatprep.mubr.msk.f32.mxu1 %vm6276_vm0, %v6275_v0 }
0x1847   :  { %5594 = vmatprep.subr.mxu1 %v6275_v0 }
0x1848   :  { %5595 = vmatpush3.msra.mxu1 %v6602_v2 }
0x1849   :  { %5596 = vmatprep.subr.mxu1 %v6275_v0 }
0x184a   :  { %5597 = vmatpush3.msra.mxu1 %v6609_v14 }
0x184b   :  { %5598 = vmatprep.subr.mxu1 %v6275_v0 }
0x184c   :  { %5599 = vmatpush3.msra.mxu1 %v6624_v3 }
0x184d   :  { %5614 = vmatprep.subr.mxu1 %v6275_v0 }
0x1905   :  { %v1326_v47 = vpop.f32.mrf.mxu1 }
0x1906   :  { %v1330_v8 = vadd.f32 %v1326_v47, %v1148_v45 }
0x1907   :  { %v5580_v1 = vpop.f32.mrf.mxu1 }
0x1908   :  { %6107 = vtanh.f32 %v1330_v8  ;;  %v5034_v11 = vmul.f32 -1.442695, %v1330_v8 }
0x190a   :  { %6109 = vpow2.f32 %v5034_v11 }
0x1915   :  { %v6108_v10 = vpop.eup %6107 }
0x1916   :  { %1340 = vrot.lane.b32.xlu0 %v6108_v10, %s6277_s25 }
0x1917   :  { %v6110_v48 = vpop.eup %6109 }
0x1918   :  { %v1334_v12 = vadd.f32 1.0, %v6110_v48 }
0x191a   :  { %6111 = vrcp.f32 %v1334_v12 }
0x1927   :  { %v6112_v22 = vpop.eup %6111 }
0x1928   :  { %v1338_v15 = vmul.f32 %v6112_v22, %v1248_v6 }
0x1988   :  { %v1341_v44 = vpop.permute.xlu0 %1340 }
0x1989   :  { %v1343_v46 = vmul.f32 %v6112_v22, %v1341_v44  ;;  %v1133_v44 = vadd.f32 %v6678_v36, %v6689_v54 }
0x198b   :  { %1345 = vrot.lane.b32.xlu1 %v1343_v46, %s6278_s26 }
0x19fd   :  { %v1346_v16 = vpop.permute.xlu1 %1345 }
0x19fe   :  { %v1348_v4 = vadd.f32 %v1346_v16, %v1338_v15 }
0x1a00   :  { %6113 = vtanh.f32 %v1348_v4 }
0x1a0d   :  { %v6114_v17 = vpop.eup %6113 }
0x1a0e   :  { %1351 = vrot.lane.b32.xlu0 %v6114_v17, %s6277_s25 }
0x1a80   :  { %v1352_v19 = vpop.permute.xlu0 %1351 }
0x1a81   :  { %v1354_v55 = vmul.f32 %v6112_v22, %v1352_v19 }
0x1a83   :  { %1356 = vrot.lane.b32.xlu1 %v1354_v55, %s6278_s26 }
0x1af5   :  { %v6715_v20 = vpop.permute.xlu1 %1356 }
0x1af6   :  { %5590 = vmatmul.mubr.msk.f32.vlgmr.msra.gmra.mxu0 %vm173_vm2, %v6715_v20 }
0x1af7   :  { %5604 = vmatpush3.msra.mxu0 %v6597_v13  ;;  %5611 = vmatprep.mubr.msk.f32.mxu0 %vm6276_vm0, %v6275_v0 }
0x1af8   :  { %5605 = vmatprep.subr.mxu0 %v6275_v0 }
0x1af9   :  { %5606 = vmatpush3.msra.mxu0 %v6602_v2 }
0x1afa   :  { %5607 = vmatprep.subr.mxu0 %v6275_v0 }
0x1afb   :  { %5608 = vmatpush3.msra.mxu0 %v6609_v14 }
0x1afc   :  { %5609 = vmatprep.subr.mxu0 %v6275_v0 }
0x1afd   :  { %5610 = vmatpush3.msra.mxu0 %v6624_v3 }
0x1afe   :  { %5625 = vmatprep.subr.mxu0 %v6275_v0 }
0x1bb6   :  { %v1426_v24 = vpop.f32.mrf.mxu0 }
0x1bb7   :  { %v1430_v27 = vadd.f32 %v1426_v24, %v1143_v23 }
0x1bb8   :  { %v5591_v28 = vpop.f32.mrf.mxu0 }
0x1bb9   :  { %6115 = vtanh.f32 %v1430_v27  ;;  %v5036_v31 = vmul.f32 -1.442695, %v1430_v27 }
0x1bbb   :  { %6117 = vpow2.f32 %v5036_v31 }
0x1bc6   :  { %v6116_v29 = vpop.eup %6115 }
0x1bc7   :  { %1440 = vrot.lane.b32.xlu0 %v6116_v29, %s6277_s25 }
0x1bc8   :  { %v6118_v32 = vpop.eup %6117 }
0x1bc9   :  { %v1434_v33 = vadd.f32 1.0, %v6118_v32 }
0x1bcb   :  { %6119 = vrcp.f32 %v1434_v33 }
0x1bd8   :  { %v6120_v41 = vpop.eup %6119 }
0x1bd9   :  { %v1438_v51 = vmul.f32 %v6120_v41, %v1348_v4 }
0x1c39   :  { %v1441_v42 = vpop.permute.xlu0 %1440 }
0x1c3a   :  { %v1443_v49 = vmul.f32 %v6120_v41, %v1441_v42 }
0x1c3c   :  { %1445 = vrot.lane.b32.xlu1 %v1443_v49, %s6278_s26 }
0x1cae   :  { %v1446_v53 = vpop.permute.xlu1 %1445 }
0x1caf   :  { %v1448_v38 = vadd.f32 %v1446_v53, %v1438_v51 }
0x1cb1   :  { %6121 = vtanh.f32 %v1448_v38 }
0x1cbe   :  { %v6122_v56 = vpop.eup %6121 }
0x1cbf   :  { %1451 = vrot.lane.b32.xlu0 %v6122_v56, %s6277_s25 }
0x1d31   :  { %v1452_v59 = vpop.permute.xlu0 %1451 }
0x1d32   :  { %v1454_v60 = vmul.f32 %v6120_v41, %v1452_v59 }
0x1d34   :  { %1456 = vrot.lane.b32.xlu1 %v1454_v60, %s6278_s26 }
0x1da6   :  { %v6735_v61 = vpop.permute.xlu1 %1456 }
0x1da7   :  { %5601 = vmatmul.mubr.msk.f32.vlgmr.msra.gmra.mxu1 %vm173_vm2, %v6735_v61 }
0x1da8   :  { %5615 = vmatpush3.msra.mxu1 %v6597_v13  ;;  %5622 = vmatprep.mubr.msk.f32.mxu1 %vm6276_vm0, %v6275_v0 }
0x1da9   :  { %5616 = vmatprep.subr.mxu1 %v6275_v0 }
0x1daa   :  { %5617 = vmatpush3.msra.mxu1 %v6602_v2 }
0x1dab   :  { %5618 = vmatprep.subr.mxu1 %v6275_v0 }
0x1dac   :  { %5619 = vmatpush3.msra.mxu1 %v6609_v14 }
0x1dad   :  { %5620 = vmatprep.subr.mxu1 %v6275_v0 }
0x1dae   :  { %5621 = vmatpush3.msra.mxu1 %v6624_v3 }
0x1daf   :  { %5636 = vmatprep.subr.mxu1 %v6275_v0 }
0x1e67   :  { %v1526_v63 = vpop.f32.mrf.mxu1 }
0x1e68   :  { %v1530_v52 = vadd.f32 %v1526_v63, %v1138_v62 }
0x1e69   :  { %v5602_v6 = vpop.f32.mrf.mxu1 }
0x1e6a   :  { %6123 = vtanh.f32 %v1530_v52  ;;  %v5038_v5 = vmul.f32 -1.442695, %v1530_v52 }
0x1e6c   :  { %6125 = vpow2.f32 %v5038_v5  ;;  %v1123_v5 = vadd.f32 %v6674_v34, %v6689_v54 }
0x1e77   :  { %v6124_v7 = vpop.eup %6123 }
0x1e78   :  { %1540 = vrot.lane.b32.xlu0 %v6124_v7, %s6277_s25 }
0x1e79   :  { %v6126_v58 = vpop.eup %6125 }
0x1e7a   :  { %v1534_v43 = vadd.f32 1.0, %v6126_v58 }
0x1e7c   :  { %6127 = vrcp.f32 %v1534_v43 }
0x1e89   :  { %v6128_v45 = vpop.eup %6127 }
0x1e8a   :  { %v1538_v1 = vmul.f32 %v6128_v45, %v1448_v38 }
0x1eea   :  { %v1541_v47 = vpop.permute.xlu0 %1540 }
0x1eeb   :  { %v1543_v8 = vmul.f32 %v6128_v45, %v1541_v47 }
0x1eed   :  { %1545 = vrot.lane.b32.xlu1 %v1543_v8, %s6278_s26 }
0x1f5f   :  { %v1546_v10 = vpop.permute.xlu1 %1545 }
0x1f60   :  { %v1548_v40 = vadd.f32 %v1546_v10, %v1538_v1 }
0x1f62   :  { %6129 = vtanh.f32 %v1548_v40 }
0x1f6f   :  { %v6130_v11 = vpop.eup %6129 }
0x1f70   :  { %1551 = vrot.lane.b32.xlu0 %v6130_v11, %s6277_s25 }
0x1fe2   :  { %v1552_v48 = vpop.permute.xlu0 %1551 }
0x1fe3   :  { %v1554_v12 = vmul.f32 %v6128_v45, %v1552_v48 }
0x1fe5   :  { %1556 = vrot.lane.b32.xlu1 %v1554_v12, %s6278_s26 }
0x2057   :  { %v6755_v22 = vpop.permute.xlu1 %1556 }
0x2058   :  { %5612 = vmatmul.mubr.msk.f32.vlgmr.msra.gmra.mxu0 %vm173_vm2, %v6755_v22 }
0x2059   :  { %5626 = vmatpush3.msra.mxu0 %v6597_v13  ;;  %5633 = vmatprep.mubr.msk.f32.mxu0 %vm6276_vm0, %v6275_v0 }
0x205a   :  { %5627 = vmatprep.subr.mxu0 %v6275_v0 }
0x205b   :  { %5628 = vmatpush3.msra.mxu0 %v6602_v2 }
0x205c   :  { %5629 = vmatprep.subr.mxu0 %v6275_v0 }
0x205d   :  { %5630 = vmatpush3.msra.mxu0 %v6609_v14 }
0x205e   :  { %5631 = vmatprep.subr.mxu0 %v6275_v0 }
0x205f   :  { %5632 = vmatpush3.msra.mxu0 %v6624_v3 }
0x2118   :  { %v1626_v46 = vpop.f32.mrf.mxu0 }
0x2119   :  { %v1630_v15 = vadd.f32 %v1626_v46, %v1133_v44 }
0x211a   :  { %v5613_v16 = vpop.f32.mrf.mxu0 }
0x211b   :  { %6131 = vtanh.f32 %v1630_v15  ;;  %v5040_v17 = vmul.f32 -1.442695, %v1630_v15 }
0x211d   :  { %6133 = vpow2.f32 %v5040_v17  ;;  %v1118_v17 = vadd.f32 %v6689_v54, %v6676_v35 }
0x2128   :  { %v6132_v4 = vpop.eup %6131 }
0x2129   :  { %1640 = vrot.lane.b32.xlu0 %v6132_v4, %s6277_s25 }
0x212a   :  { %v6134_v19 = vpop.eup %6133 }
0x212b   :  { %v1634_v55 = vadd.f32 1.0, %v6134_v19 }
0x212d   :  { %6135 = vrcp.f32 %v1634_v55 }
0x213a   :  { %v6136_v23 = vpop.eup %6135 }
0x213b   :  { %v1638_v28 = vmul.f32 %v6136_v23, %v1548_v40 }
0x219b   :  { %v1641_v24 = vpop.permute.xlu0 %1640 }
0x219c   :  { %v1643_v27 = vmul.f32 %v6136_v23, %v1641_v24 }
0x219e   :  { %1645 = vrot.lane.b32.xlu1 %v1643_v27, %s6278_s26 }
0x2210   :  { %v1646_v29 = vpop.permute.xlu1 %1645 }
0x2211   :  { %v1648_v36 = vadd.f32 %v1646_v29, %v1638_v28 }
0x2213   :  { %6137 = vtanh.f32 %v1648_v36 }
0x2220   :  { %v6138_v31 = vpop.eup %6137 }
0x2221   :  { %1651 = vrot.lane.b32.xlu0 %v6138_v31, %s6277_s25 }
0x2293   :  { %v1652_v32 = vpop.permute.xlu0 %1651 }
0x2294   :  { %v1654_v33 = vmul.f32 %v6136_v23, %v1652_v32 }
0x2296   :  { %1656 = vrot.lane.b32.xlu1 %v1654_v33, %s6278_s26 }
0x2308   :  { %v6774_v41 = vpop.permute.xlu1 %1656 }
0x2309   :  { %5623 = vmatmul.mubr.msk.f32.vlgmr.msra.gmra.mxu1 %vm173_vm2, %v6774_v41 }
0x230a   :  { %5637 = vmatpush3.msra.mxu1 %v6597_v13  ;;  %5644 = vmatprep.mubr.msk.f32.mxu1 %vm6276_vm0, %v6275_v0  ;;  %v1128_v13 = vadd.f32 %v6689_v54, %v6680_v37  ;;  %v1958_v54 = vld [vmem:[%s7607_s3 + $0x18] sm:$0xff] }
0x230b   :  { %5638 = vmatprep.subr.mxu1 %v6275_v0  ;;  %5647 = vmatprep.subr.mxu0 %v1958_v54 }
0x230c   :  { %5639 = vmatpush3.msra.mxu1 %v6602_v2 }
0x230d   :  { %5640 = vmatprep.subr.mxu1 %v6275_v0 }
0x230e   :  { %5641 = vmatpush3.msra.mxu1 %v6609_v14 }
0x230f   :  { %5642 = vmatprep.subr.mxu1 %v6275_v0 }
0x2310   :  { %5643 = vmatpush3.msra.mxu1 %v6624_v3 }
0x2311   :  { %5667 = vmatprep.subr.mxu1 %v6275_v0 }
0x23c9   :  { %v1726_v42 = vpop.f32.mrf.mxu1 }
0x23ca   :  { %v1730_v49 = vadd.f32 %v1726_v42, %v1128_v13  ;;  %v1957_v42 = vld [vmem:[%s7607_s3 + $0x10] sm:$0xff] }
0x23cb   :  { %v5624_v51 = vpop.f32.mrf.mxu1 }
0x23cc   :  { %6139 = vtanh.f32 %v1730_v49  ;;  %v5042_v2 = vmul.f32 -1.442695, %v1730_v49  ;;  %v1956_v49 = vld [vmem:[%s7607_s3 + $0x8] sm:$0xff]  ;;  %v1955_v51 = vld [vmem:[%s7607_s3] sm:$0xff] }
0x23ce   :  { %6141 = vpow2.f32 %v5042_v2  ;;  %v6828_v2 = vld [vmem:[%s7607_s3 + $0x28] sm:$0xff] }
0x23d9   :  { %v6140_v53 = vpop.eup %6139 }
0x23da   :  { %1740 = vrot.lane.b32.xlu0 %v6140_v53, %s6277_s25 }
0x23db   :  { %v6142_v38 = vpop.eup %6141 }
0x23dc   :  { %v1734_v14 = vadd.f32 1.0, %v6142_v38  ;;  %v6835_v38 = vld [vmem:[%s7607_s3 + $0x20] sm:$0xff] }
0x23de   :  { %6143 = vrcp.f32 %v1734_v14 }
0x23eb   :  { %v6144_v56 = vpop.eup %6143 }
0x23ec   :  { %v1738_v60 = vmul.f32 %v6144_v56, %v1648_v36 }
0x244c   :  { %v1741_v59 = vpop.permute.xlu0 %1740 }
0x244d   :  { %v1743_v3 = vmul.f32 %v6144_v56, %v1741_v59 }
0x244f   :  { %1745 = vrot.lane.b32.xlu1 %v1743_v3, %s6278_s26 }
0x24c1   :  { %v1746_v62 = vpop.permute.xlu1 %1745 }
0x24c2   :  { %v1748_v37 = vadd.f32 %v1746_v62, %v1738_v60 }
0x24c4   :  { %6145 = vtanh.f32 %v1748_v37 }
0x24d1   :  { %v6146_v63 = vpop.eup %6145 }
0x24d2   :  { %1751 = vrot.lane.b32.xlu0 %v6146_v63, %s6277_s25 }
0x2544   :  { %v1752_v52 = vpop.permute.xlu0 %1751 }
0x2545   :  { %v1754_v6 = vmul.f32 %v6144_v56, %v1752_v52 }
0x2547   :  { %1756 = vrot.lane.b32.xlu1 %v1754_v6, %s6278_s26 }
0x25b9   :  { %v6794_v7 = vpop.permute.xlu1 %1756 }
0x25ba   :  { %5634 = vmatmul.mubr.msk.f32.vlgmr.msra.gmra.mxu0 %vm173_vm2, %v6794_v7 }
0x25bb   :  { %5648 = vmatpush3.msra.mxu0 %v1958_v54 }
0x25bc   :  { %5649 = vmatprep.subr.mxu0 %v1957_v42 }
0x25bd   :  { %5650 = vmatpush3.msra.mxu0 %v1957_v42 }
0x25be   :  { %5651 = vmatprep.subr.mxu0 %v1956_v49 }
0x25bf   :  { %5652 = vmatpush3.msra.mxu0 %v1956_v49 }
0x25c0   :  { %5653 = vmatprep.subr.mxu0 %v1955_v51 }
0x25c1   :  { %5654 = vmatpush3.msra.mxu0 %v1955_v51 }
0x25c2   :  { %5696 = vmatprep.subr.mxu0 %v6275_v0 }
0x267a   :  { %v1826_v58 = vpop.f32.mrf.mxu0 }
0x267b   :  { %v1830_v43 = vadd.f32 %v1826_v58, %v1123_v5 }
0x267c   :  { %v5635_v45 = vpop.f32.mrf.mxu0 }
0x267d   :  { %6147 = vtanh.f32 %v1830_v43  ;;  %v5044_v8 = vmul.f32 -1.442695, %v1830_v43 }
0x267f   :  { %6149 = vpow2.f32 %v5044_v8 }
0x268a   :  { %v6148_v47 = vpop.eup %6147 }
0x268b   :  { %1840 = vrot.lane.b32.xlu0 %v6148_v47, %s6277_s25 }
0x268c   :  { %v6150_v1 = vpop.eup %6149 }
0x268d   :  { %v1834_v10 = vadd.f32 1.0, %v6150_v1 }
0x268f   :  { %6151 = vrcp.f32 %v1834_v10 }
0x269c   :  { %v6152_v40 = vpop.eup %6151 }
0x269d   :  { %v1838_v12 = vmul.f32 %v6152_v40, %v1748_v37 }
0x26fd   :  { %v1841_v11 = vpop.permute.xlu0 %1840 }
0x26fe   :  { %v1843_v48 = vmul.f32 %v6152_v40, %v1841_v11 }
0x2700   :  { %1845 = vrot.lane.b32.xlu1 %v1843_v48, %s6278_s26  ;;  %v6921_v48 = vld [vmem:[%s7607_s3 + $0x78] sm:$0xff] }
0x2772   :  { %v1846_v44 = vpop.permute.xlu1 %1845 }
0x2773   :  { %v1848_v34 = vadd.f32 %v1846_v44, %v1838_v12  ;;  %v6926_v12 = vld [vmem:[%s7607_s3 + $0x70] sm:$0xff]  ;;  %v6933_v44 = vld [vmem:[%s7607_s3 + $0x68] sm:$0xff] }
0x2775   :  { %6153 = vtanh.f32 %v1848_v34 }
0x2782   :  { %v6154_v46 = vpop.eup %6153 }
0x2783   :  { %1851 = vrot.lane.b32.xlu0 %v6154_v46, %s6277_s25  ;;  %v6949_v46 = vld [vmem:[%s7607_s3 + $0x58] ss:$0 sm:$0xff] }
0x27f5   :  { %v1852_v15 = vpop.permute.xlu0 %1851 }
0x27f6   :  { %v1854_v16 = vmul.f32 %v6152_v40, %v1852_v15 }
0x27f8   :  { %1856 = vrot.lane.b32.xlu1 %v1854_v16, %s6278_s26 }
0x286a   :  { %v1857_v4 = vpop.permute.xlu1 %1856 }
0x286b   :  { %5645 = vmatmul.mubr.msk.f32.vlgmr.msra.gmra.mxu1 %vm173_vm2, %v1857_v4 }
0x286c   :  { %5671 = vmatprep.mubr.msk.f32.mxu1 %vm6276_vm0, %v6275_v0  ;;  %5668 = vmatpush3.msra.mxu1 %v6828_v2 }
0x286d   :  { %5669 = vmatprep.subr.mxu1 %v6275_v0 }
0x286e   :  { %5670 = vmatpush3.msra.mxu1 %v6835_v38 }
0x286f   :  { %5672 = vmatmul.mubr.f32.vlgmr.msra.gmra.mxu1 %v6275_v0  ;;  %5674 = vmatprep.subr.mxu1 %v6275_v0 }
0x2870   :  { %5682 = vmatprep.mubr.msk.f32.mxu1 %vm6276_vm0, %v6275_v0 }
0x292b   :  { %v1926_v19 = vpop.f32.mrf.mxu1 }
0x292c   :  { %v1930_v55 = vadd.f32 %v1926_v19, %v1118_v17  ;;  %v6966_v19 = vld [vmem:[%s7607_s3 + $0x80] ss:$0 sm:$0xff] }
0x292d   :  { %v5646_v23 = vpop.f32.mrf.mxu1 }
0x292e   :  { %6155 = vtanh.f32 %v1930_v55  ;;  %v5046_v27 = vmul.f32 -1.442695, %v1930_v55 }
0x292f   :  { %v2154_v3 = vpop.f32.mrf.mxu1 }
0x2930   :  { %6157 = vpow2.f32 %v5046_v27 }
0x2931   :  { %v5673_v60 = vpop.f32.mrf.mxu1 }
0x293b   :  { %v6156_v24 = vpop.eup %6155 }
0x293c   :  { %1940 = vrot.lane.b32.xlu0 %v6156_v24, %s6277_s25 }
0x293d   :  { %v6158_v28 = vpop.eup %6157 }
0x293e   :  { %v1934_v29 = vadd.f32 1.0, %v6158_v28 }
0x2940   :  { %6159 = vrcp.f32 %v1934_v29 }
0x294d   :  { %v6160_v36 = vpop.eup %6159 }
0x294e   :  { %v1938_v33 = vmul.f32 %v6160_v36, %v1848_v34  ;;  %v6940_v34 = vld [vmem:[%s7607_s3 + $0x60] sm:$0xff] }
0x29ae   :  { %v1941_v31 = vpop.permute.xlu0 %1940 }
0x29af   :  { %v1943_v32 = vmul.f32 %v6160_v36, %v1941_v31 }
0x29b1   :  { %1945 = vrot.lane.b32.xlu1 %v1943_v32, %s6278_s26 }
0x2a23   :  { %v1946_v13 = vpop.permute.xlu1 %1945 }
0x2a24   :  { %v1948_v35 = vadd.f32 %v1946_v13, %v1938_v33 }
0x2a26   :  { %6161 = vtanh.f32 %v1948_v35 }
0x2a33   :  { %v6162_v53 = vpop.eup %6161 }
0x2a34   :  { %1951 = vrot.lane.b32.xlu0 %v6162_v53, %s6277_s25 }
0x2aa6   :  { %v1952_v14 = vpop.permute.xlu0 %1951 }
0x2aa7   :  { %v1954_v56 = vmul.f32 %v6160_v36, %v1952_v14  ;;  %v25_v36 = vld [vmem:[%s7608_s1] sm:$0xff] }
0x2aa9   :  { %1965 = vrot.lane.b32.xlu1 %v1954_v56, %s6278_s26 }
0x2b1b   :  { %v1966_v59 = vpop.permute.xlu1 %1965 }
0x2b1c   :  { %5655 = vmatprep.mubr.msk.f32.mxu0 %vm173_vm2, %v1966_v59 }
0x2b1d   :  { %5656 = vmatmul.mubr.msk.f32.vlgmr.msra.gmra.mxu0 %vm173_vm2, %v1857_v4 }
0x2b1e   :  { %5658 = vmatprep.mubr.msk.f32.mxu0 %vm173_vm2, %v6794_v7  ;;  %5697 = vmatpush3.msra.mxu0 %v6828_v2 }
0x2b1f   :  { %5698 = vmatprep.subr.mxu0 %v6275_v0 }
0x2b20   :  { %5699 = vmatpush3.msra.mxu0 %v6835_v38 }
0x2b21   :  { %5659 = vmatmul.mubr.msk.f32.gmra.mxu0 %vm173_vm2, %v6774_v41  ;;  %5714 = vmatprep.subr.mxu0 %v6275_v0  ;;  %v6866_v41 = vld [vmem:[%s7607_s3 + $0x50] sm:$0xff] }
0x2b22   :  { %5661 = vmatprep.mubr.msk.f32.mxu0 %vm173_vm2, %v6755_v22  ;;  %5675 = vmatpush3.msra.mxu1 %v6866_v41  ;;  %v6894_v22 = vld [vmem:[%s7607_s3 + $0x30] ss:$0 sm:$0xff] }
0x2b23   :  { %5676 = vmatprep.subr.mxu1 %v6275_v0 }
0x2b25   :  { %5662 = vmatmul.mubr.msk.f32.gmra.mxu0 %vm173_vm2, %v6735_v61  ;;  %v6885_v61 = vld [vmem:[%s7607_s3 + $0x38] sm:$0xff] }
0x2b26   :  { %5664 = vmatprep.mubr.msk.f32.mxu0 %vm173_vm2, %v6715_v20  ;;  %v6873_v20 = vld [vmem:[%s7607_s3 + $0x48] sm:$0xff] }
0x2b27   :  { %5677 = vmatpush3.msra.mxu1 %v6873_v20 }
0x2b28   :  { %5678 = vmatprep.subr.mxu1 %v6275_v0 }
0x2b29   :  { %5665 = vmatmul.mubr.msk.f32.gmra.mxu0 %vm173_vm2, %v6696_v21  ;;  %v6878_v21 = vld [vmem:[%s7607_s3 + $0x40] sm:$0xff] }
0x2b2a   :  { %5700 = vmatprep.mubr.msk.f32.mxu0 %vm6276_vm0, %v6275_v0  ;;  %5679 = vmatpush3.msra.mxu1 %v6878_v21 }
0x2b2b   :  { %5680 = vmatprep.subr.mxu1 %v6275_v0 }
0x2b2c   :  { %5681 = vmatpush3.msra.mxu1 %v6885_v61 }
0x2b2d   :  { %5685 = vmatprep.subr.mxu1 %v6275_v0 }
0x2bdd   :  { %v5657_v62 = vpop.f32.mrf.mxu0 }
0x2bde   :  { %v6897_v37 = vadd.f32 %v5657_v62, %v6894_v22 }
0x2bdf   :  { %v2035_v63 = vpop.f32.mrf.mxu0 }
0x2be0   :  { %v2036_v52 = vadd.f32 %v6894_v22, %v2035_v63 }
0x2be1   :  { %v5660_v6 = vpop.f32.mrf.mxu0 }
0x2be2   :  { %v2158_v7 = vadd.f32 %v2154_v3, %v2036_v52  ;;  %v6901_v5 = vadd.f32 %v5660_v6, %v6894_v22  ;;  %v26_v52 = vld [vmem:[%s7608_s1 + $0x8] sm:$0xff] }
0x2be3   :  { %v2045_v58 = vpop.f32.mrf.mxu0 }
0x2be4   :  { %6163 = vtanh.f32 %v2158_v7  ;;  %v6904_v43 = vadd.f32 %v6894_v22, %v2045_v58 }
0x2be5   :  { %v5663_v45 = vpop.f32.mrf.mxu0 }
0x2be6   :  { %v6907_v47 = vadd.f32 %v5663_v45, %v6894_v22 }
0x2be7   :  { %v2055_v8 = vpop.f32.mrf.mxu0 }
0x2be8   :  { %v6910_v1 = vadd.f32 %v6894_v22, %v2055_v8 }
0x2be9   :  { %v5666_v10 = vpop.f32.mrf.mxu0 }
0x2bea   :  { %v6913_v40 = vadd.f32 %v5666_v10, %v6894_v22 }
0x2beb   :  { %v6991_v13 = vpop.f32.mrf.mxu0 }
0x2bf1   :  { %v6164_v11 = vpop.eup %6163 }
0x2bf2   :  { %5683 = vmatmul.mubr.msk.f32.vlgmr.msra.gmra.mxu1 %vm173_vm2, %v6164_v11 }
0x2bf3   :  { %5693 = vmatprep.mubr.msk.f32.mxu1 %vm6276_vm0, %v6275_v0  ;;  %5686 = vmatpush3.msra.mxu1 %v6921_v48 }
0x2bf4   :  { %5687 = vmatprep.subr.mxu1 %v6275_v0 }
0x2bf5   :  { %5688 = vmatpush3.msra.mxu1 %v6926_v12 }
0x2bf6   :  { %5689 = vmatprep.subr.mxu1 %v6275_v0 }
0x2bf7   :  { %5690 = vmatpush3.msra.mxu1 %v6933_v44 }
0x2bf8   :  { %5691 = vmatprep.subr.mxu1 %v6275_v0 }
0x2bf9   :  { %5692 = vmatpush3.msra.mxu1 %v6940_v34 }
0x2bfa   :  { %5703 = vmatprep.subr.mxu1 %v6275_v0 }
0x2cb2   :  { %v2233_v15 = vpop.f32.mrf.mxu1 }
0x2cb3   :  { %v2234_v16 = vadd.f32 %v6949_v46, %v2233_v15 }
0x2cb4   :  { %v5684_v4 = vpop.f32.mrf.mxu1 }
0x2cb5   :  { %6165 = vtanh.f32 %v2234_v16 }
0x2cc2   :  { %v6166_v17 = vpop.eup %6165 }
0x2cc3   :  { %5694 = vmatmul.mubr.msk.f32.vlgmr.msra.gmra.mxu1 %vm173_vm2, %v6166_v17 }
0x2cc4   :  { %5704 = vmatpush3.msra.mxu1 %v6866_v41  ;;  %5711 = vmatprep.mubr.msk.f32.mxu1 %vm6276_vm0, %v6275_v0 }
0x2cc5   :  { %5705 = vmatprep.subr.mxu1 %v6275_v0 }
0x2cc6   :  { %5706 = vmatpush3.msra.mxu1 %v6873_v20 }
0x2cc7   :  { %5707 = vmatprep.subr.mxu1 %v6275_v0 }
0x2cc8   :  { %5708 = vmatpush3.msra.mxu1 %v6878_v21 }
0x2cc9   :  { %5709 = vmatprep.subr.mxu1 %v6275_v0 }
0x2cca   :  { %5710 = vmatpush3.msra.mxu1 %v6885_v61 }
0x2ccb   :  { %5725 = vmatprep.subr.mxu1 %v6275_v0 }
0x2d83   :  { %v2311_v55 = vpop.f32.mrf.mxu1 }
0x2d84   :  { %v6969_v23 = vadd.f32 %v6966_v19, %v2311_v55 }
0x2d85   :  { %v5695_v24 = vpop.f32.mrf.mxu1 }
0x2d86   :  { %v2315_v27 = vmul.f32 0.5, %v6969_v23 }
0x2d88   :  { %v2316_v28 = vmul.f32 1.442695, %v2315_v27 }
0x2d8a   :  { %6167 = vpow2.f32 %v2316_v28 }
0x2d97   :  { %v6168_v29 = vpop.eup %6167 }
0x2d98   :  { %2319 = vrot.lane.b32.xlu0 %v6168_v29, %s6279_s23 }
0x2e0a   :  { %v2320_v31 = vpop.permute.xlu0 %2319 }
0x2e0b   :  { %v2322_v32 = vmul.f32 %v2320_v31, %v25_v36  ;;  %v27_v36 = vld [vmem:[%s7608_s1 + $0x10] sm:$0xff] }
0x2e0d   :  { %v6977_v33 = vadd.f32 %v2322_v32, %v6969_v23 }
0x2e0f   :  { %5701 = vmatmul.mubr.msk.f32.vlgmr.msra.gmra.mxu0 %vm40_vm1, %v6977_v33 }
0x2e10   :  { %5715 = vmatpush3.msra.mxu0 %v6921_v48  ;;  %5722 = vmatprep.mubr.msk.f32.mxu0 %vm6276_vm0, %v6275_v0 }
0x2e11   :  { %5716 = vmatprep.subr.mxu0 %v6275_v0 }
0x2e12   :  { %5717 = vmatpush3.msra.mxu0 %v6926_v12 }
0x2e13   :  { %5718 = vmatprep.subr.mxu0 %v6275_v0 }
0x2e14   :  { %5719 = vmatpush3.msra.mxu0 %v6933_v44 }
0x2e15   :  { %5720 = vmatprep.subr.mxu0 %v6275_v0 }
0x2e16   :  { %5721 = vmatpush3.msra.mxu0 %v6940_v34 }
0x2e17   :  { %5732 = vmatprep.subr.mxu0 %v6275_v0 }
0x2ecf   :  { %v2393_v35 = vpop.f32.mrf.mxu0 }
0x2ed0   :  { %v2397_v54 = vadd.f32 %v2393_v35, %v6897_v37 }
0x2ed1   :  { %v5702_v42 = vpop.f32.mrf.mxu0 }
0x2ed2   :  { %6169 = vtanh.f32 %v2397_v54 }
0x2edf   :  { %v6170_v49 = vpop.eup %6169 }
0x2ee0   :  { %5712 = vmatmul.mubr.msk.f32.vlgmr.msra.gmra.mxu1 %vm173_vm2, %v6170_v49 }
0x2ee1   :  { %5726 = vmatpush3.msra.mxu1 %v6828_v2  ;;  %5729 = vmatprep.mubr.msk.f32.mxu1 %vm6276_vm0, %v6275_v0 }
0x2ee2   :  { %5727 = vmatprep.subr.mxu1 %v6275_v0 }
0x2ee3   :  { %5728 = vmatpush3.msra.mxu1 %v6835_v38 }
0x2ee4   :  { %5743 = vmatprep.subr.mxu1 %v6275_v0 }
0x2fa0   :  { %v2468_v51 = vpop.f32.mrf.mxu1 }
0x2fa1   :  { %v2469_v53 = vadd.f32 %v6949_v46, %v2468_v51 }
0x2fa2   :  { %v5713_v14 = vpop.f32.mrf.mxu1 }
0x2fa3   :  { %6171 = vtanh.f32 %v2469_v53 }
0x2fb0   :  { %v6172_v56 = vpop.eup %6171 }
0x2fb1   :  { %5723 = vmatmul.mubr.msk.f32.vlgmr.msra.gmra.mxu0 %vm173_vm2, %v6172_v56 }
0x2fb2   :  { %5733 = vmatpush3.msra.mxu0 %v6866_v41  ;;  %5740 = vmatprep.mubr.msk.f32.mxu0 %vm6276_vm0, %v6275_v0 }
0x2fb3   :  { %5734 = vmatprep.subr.mxu0 %v6275_v0 }
0x2fb4   :  { %5735 = vmatpush3.msra.mxu0 %v6873_v20 }
0x2fb5   :  { %5736 = vmatprep.subr.mxu0 %v6275_v0 }
0x2fb6   :  { %5737 = vmatpush3.msra.mxu0 %v6878_v21 }
0x2fb7   :  { %5738 = vmatprep.subr.mxu0 %v6275_v0 }
0x2fb8   :  { %5739 = vmatpush3.msra.mxu0 %v6885_v61 }
0x2fb9   :  { %5754 = vmatprep.subr.mxu0 %v6275_v0 }
0x3071   :  { %v2542_v59 = vpop.f32.mrf.mxu0 }
0x3072   :  { %v7014_v3 = vadd.f32 %v6966_v19, %v2542_v59 }
0x3073   :  { %v5724_v60 = vpop.f32.mrf.mxu0 }
0x3074   :  { %v2546_v62 = vmul.f32 0.5, %v7014_v3 }
0x3076   :  { %v2547_v37 = vmul.f32 1.442695, %v2546_v62 }
0x3078   :  { %6173 = vpow2.f32 %v2547_v37 }
0x3085   :  { %v6174_v63 = vpop.eup %6173 }
0x3086   :  { %2550 = vrot.lane.b32.xlu1 %v6174_v63, %s6279_s23 }
0x30f8   :  { %v2551_v6 = vpop.permute.xlu1 %2550 }
0x30f9   :  { %v2553_v7 = vmul.f32 %v2551_v6, %v26_v52  ;;  %v28_v6 = vld [vmem:[%s7608_s1 + $0x18] sm:$0xff] }
0x30fb   :  { %v7022_v58 = vadd.f32 %v2553_v7, %v7014_v3 }
0x30fd   :  { %5730 = vmatmul.mubr.msk.f32.vlgmr.msra.gmra.mxu1 %vm40_vm1, %v7022_v58 }
0x30fe   :  { %5744 = vmatpush3.msra.mxu1 %v6921_v48  ;;  %5751 = vmatprep.mubr.msk.f32.mxu1 %vm6276_vm0, %v6275_v0 }
0x30ff   :  { %5745 = vmatprep.subr.mxu1 %v6275_v0 }
0x3100   :  { %5746 = vmatpush3.msra.mxu1 %v6926_v12 }
0x3101   :  { %5747 = vmatprep.subr.mxu1 %v6275_v0 }
0x3102   :  { %5748 = vmatpush3.msra.mxu1 %v6933_v44 }
0x3103   :  { %5749 = vmatprep.subr.mxu1 %v6275_v0 }
0x3104   :  { %5750 = vmatpush3.msra.mxu1 %v6940_v34 }
0x3105   :  { %5761 = vmatprep.subr.mxu1 %v6275_v0 }
0x31bd   :  { %v2624_v45 = vpop.f32.mrf.mxu1 }
0x31be   :  { %v2628_v8 = vadd.f32 %v2624_v45, %v6904_v43 }
0x31bf   :  { %v5731_v10 = vpop.f32.mrf.mxu1 }
0x31c0   :  { %6175 = vtanh.f32 %v2628_v8 }
0x31cd   :  { %v6176_v11 = vpop.eup %6175 }
0x31ce   :  { %5741 = vmatmul.mubr.msk.f32.vlgmr.msra.gmra.mxu0 %vm173_vm2, %v6176_v11 }
0x31cf   :  { %5755 = vmatpush3.msra.mxu0 %v6828_v2  ;;  %5758 = vmatprep.mubr.msk.f32.mxu0 %vm6276_vm0, %v6275_v0 }
0x31d0   :  { %5756 = vmatprep.subr.mxu0 %v6275_v0 }
0x31d1   :  { %5757 = vmatpush3.msra.mxu0 %v6835_v38 }
0x31d2   :  { %5772 = vmatprep.subr.mxu0 %v6275_v0 }
0x328e   :  { %v2699_v15 = vpop.f32.mrf.mxu0 }
0x328f   :  { %v2700_v16 = vadd.f32 %v6949_v46, %v2699_v15 }
0x3290   :  { %v5742_v43 = vpop.f32.mrf.mxu0 }
0x3291   :  { %6177 = vtanh.f32 %v2700_v16 }
0x329e   :  { %v6178_v4 = vpop.eup %6177 }
0x329f   :  { %5752 = vmatmul.mubr.msk.f32.vlgmr.msra.gmra.mxu1 %vm173_vm2, %v6178_v4 }
0x32a0   :  { %5762 = vmatpush3.msra.mxu1 %v6866_v41  ;;  %5769 = vmatprep.mubr.msk.f32.mxu1 %vm6276_vm0, %v6275_v0 }
0x32a1   :  { %5763 = vmatprep.subr.mxu1 %v6275_v0 }
0x32a2   :  { %5764 = vmatpush3.msra.mxu1 %v6873_v20 }
0x32a3   :  { %5765 = vmatprep.subr.mxu1 %v6275_v0 }
0x32a4   :  { %5766 = vmatpush3.msra.mxu1 %v6878_v21 }
0x32a5   :  { %5767 = vmatprep.subr.mxu1 %v6275_v0 }
0x32a6   :  { %5768 = vmatpush3.msra.mxu1 %v6885_v61 }
0x32a7   :  { %5783 = vmatprep.subr.mxu1 %v6275_v0 }
0x335f   :  { %v2773_v17 = vpop.f32.mrf.mxu1 }
0x3360   :  { %v7057_v55 = vadd.f32 %v6966_v19, %v2773_v17 }
0x3361   :  { %v5753_v24 = vpop.f32.mrf.mxu1 }
0x3362   :  { %v2777_v27 = vmul.f32 0.5, %v7057_v55 }
0x3364   :  { %v2778_v28 = vmul.f32 1.442695, %v2777_v27 }
0x3366   :  { %6179 = vpow2.f32 %v2778_v28 }
0x3373   :  { %v6180_v29 = vpop.eup %6179 }
0x3374   :  { %2781 = vrot.lane.b32.xlu0 %v6180_v29, %s6279_s23 }
0x33e6   :  { %v2782_v31 = vpop.permute.xlu0 %2781 }
0x33e7   :  { %v2784_v32 = vmul.f32 %v2782_v31, %v27_v36 }
0x33e9   :  { %v7065_v35 = vadd.f32 %v2784_v32, %v7057_v55  ;;  %v29_v32 = vld [vmem:[%s7608_s1 + $0x20] sm:$0xff] }
0x33eb   :  { %5759 = vmatmul.mubr.msk.f32.vlgmr.msra.gmra.mxu0 %vm40_vm1, %v7065_v35 }
0x33ec   :  { %5773 = vmatpush3.msra.mxu0 %v6921_v48  ;;  %5780 = vmatprep.mubr.msk.f32.mxu0 %vm6276_vm0, %v6275_v0 }
0x33ed   :  { %5774 = vmatprep.subr.mxu0 %v6275_v0 }
0x33ee   :  { %5775 = vmatpush3.msra.mxu0 %v6926_v12 }
0x33ef   :  { %5776 = vmatprep.subr.mxu0 %v6275_v0 }
0x33f0   :  { %5777 = vmatpush3.msra.mxu0 %v6933_v44 }
0x33f1   :  { %5778 = vmatprep.subr.mxu0 %v6275_v0 }
0x33f2   :  { %5779 = vmatpush3.msra.mxu0 %v6940_v34 }
0x33f3   :  { %5790 = vmatprep.subr.mxu0 %v6275_v0 }
0x34ab   :  { %v2855_v54 = vpop.f32.mrf.mxu0 }
0x34ac   :  { %v2859_v42 = vadd.f32 %v2855_v54, %v6901_v5 }
0x34ad   :  { %v5760_v49 = vpop.f32.mrf.mxu0 }
0x34ae   :  { %6181 = vtanh.f32 %v2859_v42 }
0x34bb   :  { %v6182_v51 = vpop.eup %6181 }
0x34bc   :  { %5770 = vmatmul.mubr.msk.f32.vlgmr.msra.gmra.mxu1 %vm173_vm2, %v6182_v51 }
0x34bd   :  { %5784 = vmatpush3.msra.mxu1 %v6828_v2  ;;  %5787 = vmatprep.mubr.msk.f32.mxu1 %vm6276_vm0, %v6275_v0 }
0x34be   :  { %5785 = vmatprep.subr.mxu1 %v6275_v0 }
0x34bf   :  { %5786 = vmatpush3.msra.mxu1 %v6835_v38 }
0x34c0   :  { %5801 = vmatprep.subr.mxu1 %v6275_v0 }
0x357c   :  { %v2930_v53 = vpop.f32.mrf.mxu1 }
0x357d   :  { %v2931_v14 = vadd.f32 %v6949_v46, %v2930_v53 }
0x357e   :  { %v5771_v5 = vpop.f32.mrf.mxu1 }
0x357f   :  { %6183 = vtanh.f32 %v2931_v14 }
0x358c   :  { %v6184_v56 = vpop.eup %6183 }
0x358d   :  { %5781 = vmatmul.mubr.msk.f32.vlgmr.msra.gmra.mxu0 %vm173_vm2, %v6184_v56 }
0x358e   :  { %5791 = vmatpush3.msra.mxu0 %v6866_v41  ;;  %5798 = vmatprep.mubr.msk.f32.mxu0 %vm6276_vm0, %v6275_v0 }
0x358f   :  { %5792 = vmatprep.subr.mxu0 %v6275_v0 }
0x3590   :  { %5793 = vmatpush3.msra.mxu0 %v6873_v20 }
0x3591   :  { %5794 = vmatprep.subr.mxu0 %v6275_v0 }
0x3592   :  { %5795 = vmatpush3.msra.mxu0 %v6878_v21 }
0x3593   :  { %5796 = vmatprep.subr.mxu0 %v6275_v0 }
0x3594   :  { %5797 = vmatpush3.msra.mxu0 %v6885_v61 }
0x3595   :  { %5812 = vmatprep.subr.mxu0 %v6275_v0 }
0x364d   :  { %v3004_v59 = vpop.f32.mrf.mxu0 }
0x364e   :  { %v7100_v60 = vadd.f32 %v6966_v19, %v3004_v59 }
0x364f   :  { %v5782_v62 = vpop.f32.mrf.mxu0 }
0x3650   :  { %v3008_v37 = vmul.f32 0.5, %v7100_v60 }
0x3652   :  { %v3009_v63 = vmul.f32 1.442695, %v3008_v37 }
0x3654   :  { %6185 = vpow2.f32 %v3009_v63 }
0x3661   :  { %v6186_v52 = vpop.eup %6185 }
0x3662   :  { %3012 = vrot.lane.b32.xlu1 %v6186_v52, %s6279_s23 }
0x36d4   :  { %v3013_v7 = vpop.permute.xlu1 %3012 }
0x36d5   :  { %v3015_v45 = vmul.f32 %v3013_v7, %v28_v6 }
0x36d7   :  { %v7108_v8 = vadd.f32 %v3015_v45, %v7100_v60 }
0x36d9   :  { %5788 = vmatmul.mubr.msk.f32.vlgmr.msra.gmra.mxu1 %vm40_vm1, %v7108_v8 }
0x36da   :  { %5802 = vmatpush3.msra.mxu1 %v6921_v48  ;;  %5809 = vmatprep.mubr.msk.f32.mxu1 %vm6276_vm0, %v6275_v0 }
0x36db   :  { %5803 = vmatprep.subr.mxu1 %v6275_v0 }
0x36dc   :  { %5804 = vmatpush3.msra.mxu1 %v6926_v12 }
0x36dd   :  { %5805 = vmatprep.subr.mxu1 %v6275_v0 }
0x36de   :  { %5806 = vmatpush3.msra.mxu1 %v6933_v44 }
0x36df   :  { %5807 = vmatprep.subr.mxu1 %v6275_v0 }
0x36e0   :  { %5808 = vmatpush3.msra.mxu1 %v6940_v34 }
0x36e1   :  { %5819 = vmatprep.subr.mxu1 %v6275_v0 }
0x3799   :  { %v3086_v10 = vpop.f32.mrf.mxu1 }
0x379a   :  { %v3090_v11 = vadd.f32 %v3086_v10, %v6910_v1  ;;  %v30_v10 = vld [vmem:[%s7608_s1 + $0x28] sm:$0xff] }
0x379b   :  { %v5789_v15 = vpop.f32.mrf.mxu1 }
0x379c   :  { %6187 = vtanh.f32 %v3090_v11 }
0x37a9   :  { %v6188_v16 = vpop.eup %6187 }
0x37aa   :  { %5799 = vmatmul.mubr.msk.f32.vlgmr.msra.gmra.mxu0 %vm173_vm2, %v6188_v16 }
0x37ab   :  { %5813 = vmatpush3.msra.mxu0 %v6828_v2  ;;  %5816 = vmatprep.mubr.msk.f32.mxu0 %vm6276_vm0, %v6275_v0 }
0x37ac   :  { %5814 = vmatprep.subr.mxu0 %v6275_v0 }
0x37ad   :  { %5815 = vmatpush3.msra.mxu0 %v6835_v38 }
0x37ae   :  { %5830 = vmatprep.subr.mxu0 %v6275_v0 }
0x386a   :  { %v3161_v43 = vpop.f32.mrf.mxu0 }
0x386b   :  { %v3162_v4 = vadd.f32 %v6949_v46, %v3161_v43  ;;  %v2066_v43 = vadd.f32 %v6894_v22, %v6991_v13 }
0x386c   :  { %v5800_v1 = vpop.f32.mrf.mxu0 }
0x386d   :  { %6189 = vtanh.f32 %v3162_v4 }
0x387a   :  { %v6190_v17 = vpop.eup %6189 }
0x387b   :  { %5810 = vmatmul.mubr.msk.f32.vlgmr.msra.gmra.mxu1 %vm173_vm2, %v6190_v17 }
0x387c   :  { %5820 = vmatpush3.msra.mxu1 %v6866_v41  ;;  %5827 = vmatprep.mubr.msk.f32.mxu1 %vm6276_vm0, %v6275_v0 }
0x387d   :  { %5821 = vmatprep.subr.mxu1 %v6275_v0 }
0x387e   :  { %5822 = vmatpush3.msra.mxu1 %v6873_v20 }
0x387f   :  { %5823 = vmatprep.subr.mxu1 %v6275_v0 }
0x3880   :  { %5824 = vmatpush3.msra.mxu1 %v6878_v21 }
0x3881   :  { %5825 = vmatprep.subr.mxu1 %v6275_v0 }
0x3882   :  { %5826 = vmatpush3.msra.mxu1 %v6885_v61 }
0x3883   :  { %5841 = vmatprep.subr.mxu1 %v6275_v0 }
0x393b   :  { %v3235_v24 = vpop.f32.mrf.mxu1 }
0x393c   :  { %v7143_v27 = vadd.f32 %v6966_v19, %v3235_v24 }
0x393d   :  { %v5811_v28 = vpop.f32.mrf.mxu1 }
0x393e   :  { %v3239_v29 = vmul.f32 0.5, %v7143_v27 }
0x3940   :  { %v3240_v36 = vmul.f32 1.442695, %v3239_v29 }
0x3942   :  { %6191 = vpow2.f32 %v3240_v36 }
0x394f   :  { %v6192_v31 = vpop.eup %6191 }
0x3950   :  { %3243 = vrot.lane.b32.xlu0 %v6192_v31, %s6279_s23 }
0x39c2   :  { %v3244_v54 = vpop.permute.xlu0 %3243 }
0x39c3   :  { %v3246_v42 = vmul.f32 %v3244_v54, %v29_v32 }
0x39c5   :  { %v7151_v49 = vadd.f32 %v3246_v42, %v7143_v27  ;;  %v3978_v42 = vld [vmem:[%s7607_s3 + $0xb0] sm:$0xff] }
0x39c7   :  { %5817 = vmatmul.mubr.msk.f32.vlgmr.msra.gmra.mxu0 %vm40_vm1, %v7151_v49 }
0x39c8   :  { %5831 = vmatpush3.msra.mxu0 %v6921_v48  ;;  %5838 = vmatprep.mubr.msk.f32.mxu0 %vm6276_vm0, %v6275_v0 }
0x39c9   :  { %5832 = vmatprep.subr.mxu0 %v6275_v0 }
0x39ca   :  { %5833 = vmatpush3.msra.mxu0 %v6926_v12 }
0x39cb   :  { %5834 = vmatprep.subr.mxu0 %v6275_v0 }
0x39cc   :  { %5835 = vmatpush3.msra.mxu0 %v6933_v44 }
0x39cd   :  { %5836 = vmatprep.subr.mxu0 %v6275_v0 }
0x39ce   :  { %5837 = vmatpush3.msra.mxu0 %v6940_v34 }
0x39cf   :  { %5848 = vmatprep.subr.mxu0 %v6275_v0 }
0x3a87   :  { %v3317_v51 = vpop.f32.mrf.mxu0 }
0x3a88   :  { %v3321_v53 = vadd.f32 %v3317_v51, %v6907_v47 }
0x3a89   :  { %v5818_v14 = vpop.f32.mrf.mxu0 }
0x3a8a   :  { %6193 = vtanh.f32 %v3321_v53 }
0x3a97   :  { %v6194_v5 = vpop.eup %6193 }
0x3a98   :  { %5828 = vmatmul.mubr.msk.f32.vlgmr.msra.gmra.mxu1 %vm173_vm2, %v6194_v5 }
0x3a99   :  { %5842 = vmatpush3.msra.mxu1 %v6828_v2  ;;  %5845 = vmatprep.mubr.msk.f32.mxu1 %vm6276_vm0, %v6275_v0 }
0x3a9a   :  { %5843 = vmatprep.subr.mxu1 %v6275_v0 }
0x3a9b   :  { %5844 = vmatpush3.msra.mxu1 %v6835_v38 }
0x3a9c   :  { %5859 = vmatprep.subr.mxu1 %v6275_v0 }
0x3b58   :  { %v3392_v56 = vpop.f32.mrf.mxu1 }
0x3b59   :  { %v3393_v59 = vadd.f32 %v6949_v46, %v3392_v56  ;;  %v3974_v56 = vld [vmem:[%s7607_s3 + $0x90] sm:$0xff] }
0x3b5a   :  { %v5829_v47 = vpop.f32.mrf.mxu1 }
0x3b5b   :  { %6195 = vtanh.f32 %v3393_v59  ;;  %v3973_v47 = vld [vmem:[%s7607_s3 + $0x88] sm:$0xff] }
0x3b68   :  { %v6196_v62 = vpop.eup %6195 }
0x3b69   :  { %5839 = vmatmul.mubr.msk.f32.vlgmr.msra.gmra.mxu0 %vm173_vm2, %v6196_v62  ;;  %v4422_v62 = vld [vmem:[%s7607_s3 + $0x138] sm:$0xff] }
0x3b6a   :  { %5849 = vmatpush3.msra.mxu0 %v6866_v41  ;;  %5856 = vmatprep.mubr.msk.f32.mxu0 %vm6276_vm0, %v6275_v0 }
0x3b6b   :  { %5850 = vmatprep.subr.mxu0 %v6275_v0 }
0x3b6c   :  { %5851 = vmatpush3.msra.mxu0 %v6873_v20 }
0x3b6d   :  { %5852 = vmatprep.subr.mxu0 %v6275_v0 }
0x3b6e   :  { %5853 = vmatpush3.msra.mxu0 %v6878_v21 }
0x3b6f   :  { %5854 = vmatprep.subr.mxu0 %v6275_v0 }
0x3b70   :  { %5855 = vmatpush3.msra.mxu0 %v6885_v61 }
0x3b71   :  { %5870 = vmatprep.subr.mxu0 %v6275_v0 }
0x3c29   :  { %v3466_v37 = vpop.f32.mrf.mxu0 }
0x3c2a   :  { %v7186_v63 = vadd.f32 %v6966_v19, %v3466_v37 }
0x3c2b   :  { %v5840_v52 = vpop.f32.mrf.mxu0 }
0x3c2c   :  { %v3470_v6 = vmul.f32 0.5, %v7186_v63 }
0x3c2e   :  { %v3471_v7 = vmul.f32 1.442695, %v3470_v6  ;;  %v4421_v6 = vld [vmem:[%s7607_s3 + $0x130] sm:$0xff] }
0x3c30   :  { %6197 = vpow2.f32 %v3471_v7 }
0x3c3d   :  { %v6198_v45 = vpop.eup %6197 }
0x3c3e   :  { %3474 = vrot.lane.b32.xlu1 %v6198_v45, %s6279_s23 }
0x3c42   :  { %3941 = vrot.lane.b32.xlu1 %v6275_v0, %s6278_s26 }
0x3c46   :  { %3945 = vrot.lane.b32.xlu1 %v7022_v58, %s6278_s26 }
0x3c4a   :  { %3949 = vrot.lane.b32.xlu1 %v7108_v8, %s6278_s26 }
0x3cb0   :  { %v3475_v11 = vpop.permute.xlu1 %3474 }
0x3cb1   :  { %v3477_v15 = vmul.f32 %v3475_v11, %v30_v10  ;;  %v4420_v10 = vld [vmem:[%s7607_s3 + $0x128] sm:$0xff] }
0x3cb3   :  { %v7200_v16 = vadd.f32 %v3477_v15, %v7186_v63  ;;  %v4419_v15 = vld [vmem:[%s7607_s3 + $0x120] sm:$0xff] }
0x3cb4   :  { %v3942_v14 = vpop.permute.xlu1 %3941 }
0x3cb5   :  { %3953 = vrot.lane.b32.xlu1 %v7200_v16, %s6278_s26  ;;  %5846 = vmatmul.mubr.msk.f32.vlgmr.msra.gmra.mxu1 %vm40_vm1, %v7200_v16 }
0x3cb6   :  { %5860 = vmatpush3.msra.mxu1 %v6921_v48  ;;  %5867 = vmatprep.mubr.msk.f32.mxu1 %vm6276_vm0, %v6275_v0 }
0x3cb7   :  { %5861 = vmatprep.subr.mxu1 %v6275_v0 }
0x3cb8   :  { %5862 = vmatpush3.msra.mxu1 %v6926_v12  ;;  %v3946_v59 = vpop.permute.xlu1 %3945 }
0x3cb9   :  { %5863 = vmatprep.subr.mxu1 %v6275_v0  ;;  %v3967_v7 = vsel %vm173_vm2, %v6479_v18, %v3946_v59 }
0x3cba   :  { %5864 = vmatpush3.msra.mxu1 %v6933_v44 }
0x3cbb   :  { %5865 = vmatprep.subr.mxu1 %v6275_v0 }
0x3cbc   :  { %5866 = vmatpush3.msra.mxu1 %v6940_v34  ;;  %v3950_v45 = vpop.permute.xlu1 %3949 }
0x3cbd   :  { %5877 = vmatprep.subr.mxu1 %v6275_v0 }
0x3d75   :  { %v3548_v4 = vpop.f32.mrf.mxu1 }
0x3d76   :  { %v3552_v1 = vadd.f32 %v3548_v4, %v2066_v43  ;;  %v3969_v43 = vsel %vm173_vm2, %v6517_v9, %v3950_v45 }
0x3d77   :  { %v5847_v17 = vpop.f32.mrf.mxu1 }
0x3d78   :  { %6199 = vtanh.f32 %v3552_v1  ;;  %v3954_v1 = vpop.permute.xlu1 %3953  ;;  %v4418_v17 = vld [vmem:[%s7607_s3 + $0x118] sm:$0xff] }
0x3d85   :  { %v6200_v24 = vpop.eup %6199 }
0x3d86   :  { %5857 = vmatmul.mubr.msk.f32.vlgmr.msra.gmra.mxu0 %vm173_vm2, %v6200_v24 }
0x3d87   :  { %5871 = vmatpush3.msra.mxu0 %v6828_v2  ;;  %5874 = vmatprep.mubr.msk.f32.mxu0 %vm6276_vm0, %v6275_v0 }
0x3d88   :  { %5872 = vmatprep.subr.mxu0 %v6275_v0 }
0x3d89   :  { %5873 = vmatpush3.msra.mxu0 %v6835_v38 }
0x3d8a   :  { %5888 = vmatprep.subr.mxu0 %v6275_v0 }
0x3e46   :  { %v3623_v28 = vpop.f32.mrf.mxu0 }
0x3e47   :  { %v3624_v22 = vadd.f32 %v6949_v46, %v3623_v28  ;;  %v4417_v28 = vld [vmem:[%s7607_s3 + $0x110] sm:$0xff] }
0x3e48   :  { %v5858_v13 = vpop.f32.mrf.mxu0 }
0x3e49   :  { %6201 = vtanh.f32 %v3624_v22  ;;  %v3971_v22 = vsel %vm173_vm2, %v6547_v50, %v3954_v1 }
0x3e56   :  { %v6202_v29 = vpop.eup %6201 }
0x3e57   :  { %5868 = vmatmul.mubr.msk.f32.vlgmr.msra.gmra.mxu1 %vm173_vm2, %v6202_v29 }
0x3e58   :  { %5878 = vmatpush3.msra.mxu1 %v6866_v41  ;;  %5885 = vmatprep.mubr.msk.f32.mxu1 %vm6276_vm0, %v6275_v0 }
0x3e59   :  { %5879 = vmatprep.subr.mxu1 %v6275_v0 }
0x3e5a   :  { %5880 = vmatpush3.msra.mxu1 %v6873_v20  ;;  %v31_v20 = vld [vmem:[%s7608_s1 + $0x30] sm:$0xff] }
0x3e5b   :  { %5881 = vmatprep.subr.mxu1 %v6275_v0 }
0x3e5c   :  { %5882 = vmatpush3.msra.mxu1 %v6878_v21 }
0x3e5d   :  { %5883 = vmatprep.subr.mxu1 %v6275_v0 }
0x3e5e   :  { %5884 = vmatpush3.msra.mxu1 %v6885_v61 }
0x3e5f   :  { %5899 = vmatprep.subr.mxu1 %v3978_v42 }
0x3f17   :  { %v3697_v2 = vpop.f32.mrf.mxu1 }
0x3f18   :  { %v7237_v38 = vadd.f32 %v6966_v19, %v3697_v2 }
0x3f19   :  { %v5869_v41 = vpop.f32.mrf.mxu1 }
0x3f1a   :  { %v3701_v36 = vmul.f32 0.5, %v7237_v38  ;;  %v4410_v41 = vsel %vm173_vm2, %v6458_v57, %v3946_v59 }
0x3f1c   :  { %v3702_v31 = vmul.f32 1.442695, %v3701_v36 }
0x3f1e   :  { %6203 = vpow2.f32 %v3702_v31  ;;  %v4412_v31 = vsel %vm173_vm2, %v6498_v39, %v3950_v45 }
0x3f2b   :  { %v6204_v32 = vpop.eup %6203 }
0x3f2c   :  { %3705 = vrot.lane.b32.xlu0 %v6204_v32, %s6279_s23 }
0x3f30   :  { %3943 = vrot.lane.b32.xlu0 %v6977_v33, %s6278_s26 }
0x3f34   :  { %3947 = vrot.lane.b32.xlu0 %v7065_v35, %s6278_s26 }
0x3f38   :  { %3951 = vrot.lane.b32.xlu0 %v7151_v49, %s6278_s26 }
0x3f9e   :  { %v3706_v21 = vpop.permute.xlu0 %3705 }
0x3f9f   :  { %v3708_v61 = vmul.f32 %v3706_v21, %v31_v20 }
0x3fa1   :  { %v7251_v54 = vadd.f32 %v3708_v61, %v7237_v38 }
0x3fa2   :  { %v3944_v5 = vpop.permute.xlu0 %3943 }
0x3fa3   :  { %3955 = vrot.lane.b32.xlu0 %v7251_v54, %s6278_s26  ;;  %5875 = vmatmul.mubr.msk.f32.vlgmr.msra.gmra.mxu0 %vm40_vm1, %v7251_v54  ;;  %v3966_v52 = vsel %vm173_vm2, %v6458_v57, %v3944_v5  ;;  %v4409_v2 = vsel %vm173_vm2, %v6389_v26, %v3944_v5  ;;  %v4414_v57 = vsel %vm173_vm2, %v6537_v25, %v3954_v1  ;;  %v4269_v1 = vld [vmem:[%s7607_s3 + $0xf8] sm:$0xff] }
0x3fa4   :  { %5889 = vmatpush3.msra.mxu0 %v6921_v48  ;;  %5896 = vmatprep.mubr.msk.f32.mxu0 %vm6276_vm0, %v6275_v0 }
0x3fa5   :  { %5890 = vmatprep.subr.mxu0 %v6275_v0 }
0x3fa6   :  { %5891 = vmatpush3.msra.mxu0 %v6926_v12  ;;  %v3948_v37 = vpop.permute.xlu0 %3947 }
0x3fa7   :  { %5892 = vmatprep.subr.mxu0 %v6275_v0  ;;  %v3968_v11 = vsel %vm173_vm2, %v6498_v39, %v3948_v37  ;;  %v4411_v36 = vsel %vm173_vm2, %v6479_v18, %v3948_v37  ;;  %v4124_v39 = vld [vmem:[%s7607_s3 + $0xd8] sm:$0xff] }
0x3fa8   :  { %5893 = vmatpush3.msra.mxu0 %v6933_v44  ;;  %v3977_v44 = vld [vmem:[%s7607_s3 + $0xa8] sm:$0xff] }
0x3fa9   :  { %5894 = vmatprep.subr.mxu0 %v6275_v0  ;;  %v3965_v0 = vsel %vm173_vm2, %v6389_v26, %v3942_v14 }
0x3faa   :  { %5895 = vmatpush3.msra.mxu0 %v6940_v34  ;;  %v3975_v34 = vld [vmem:[%s7607_s3 + $0x98] sm:$0xff]  ;;  %v3952_v4 = vpop.permute.xlu0 %3951 }
0x3fab   :  { %v3970_v24 = vsel %vm173_vm2, %v6537_v25, %v3952_v4  ;;  %v4413_v26 = vsel %vm173_vm2, %v6517_v9, %v3952_v4  ;;  %5923 = vmatprep.subr.mxu0 %v4124_v39  ;;  %v5081_v25 = vld [vmem:[%s7607_s3 + $0xb8] ss:$0 sm:$0xff]  ;;  %v4270_v4 = vld [vmem:[%s7607_s3 + $0x100] sm:$0xff] }
0x4015   :  { %v3956_v13 = vpop.permute.xlu0 %3955 }
0x4016   :  { %v3972_v29 = vsel %vm173_vm2, %v6667_v30, %v3956_v13  ;;  %v4415_v18 = vsel %vm173_vm2, %v6547_v50, %v3956_v13 }
0x4063   :  { %v3779_v48 = vpop.f32.mrf.mxu0 }
0x4064   :  { %v3783_v51 = vadd.f32 %v3779_v48, %v6913_v40  ;;  %v3976_v40 = vld [vmem:[%s7607_s3 + $0xa0] sm:$0xff] }
0x4065   :  { %v5876_v53 = vpop.f32.mrf.mxu0 }
0x4066   :  { %6205 = vtanh.f32 %v3783_v51  ;;  %v4123_v53 = vld [vmem:[%s7607_s3 + $0xd0] sm:$0xff] }
0x4073   :  { %v6206_v12 = vpop.eup %6205 }
0x4074   :  { %5886 = vmatmul.mubr.msk.f32.vlgmr.msra.gmra.mxu1 %vm173_vm2, %v6206_v12  ;;  %v4122_v12 = vld [vmem:[%s7607_s3 + $0xc8] sm:$0xff] }
0x4075   :  { %5900 = vmatpush3.msra.mxu1 %v3978_v42  ;;  %5911 = vmatprep.mubr.msk.f32.mxu1 %vm1026_vm3, %v3965_v0 }
0x4076   :  { %5901 = vmatprep.subr.mxu1 %v3977_v44 }
0x4077   :  { %5902 = vmatpush3.msra.mxu1 %v3977_v44 }
0x4078   :  { %5903 = vmatprep.subr.mxu1 %v3976_v40 }
0x4079   :  { %5904 = vmatpush3.msra.mxu1 %v3976_v40  ;;  %v4121_v40 = vld [vmem:[%s7607_s3 + $0xc0] sm:$0xff] }
0x407a   :  { %5905 = vmatprep.subr.mxu1 %v3975_v34 }
0x407b   :  { %5906 = vmatpush3.msra.mxu1 %v3975_v34 }
0x407c   :  { %5907 = vmatprep.subr.mxu1 %v3974_v56 }
0x407d   :  { %5908 = vmatpush3.msra.mxu1 %v3974_v56 }
0x407e   :  { %5909 = vmatprep.subr.mxu1 %v3973_v47 }
0x407f   :  { %5910 = vmatpush3.msra.mxu1 %v3973_v47 }
0x4080   :  { %5912 = vmatmul.mubr.msk.f32.vlgmr.msra.gmra.mxu1 %vm1026_vm3, %v3966_v52  ;;  %5963 = vmatprep.subr.mxu1 %v4422_v62 }
0x4081   :  { %5914 = vmatprep.mubr.msk.f32.mxu1 %vm1026_vm3, %v3967_v7  ;;  %5964 = vmatpush3.msra.mxu1 %v4422_v62 }
0x4082   :  { %5965 = vmatprep.subr.mxu1 %v4421_v6 }
0x4083   :  { %5966 = vmatpush3.msra.mxu1 %v4421_v6 }
0x4084   :  { %5915 = vmatmul.mubr.msk.f32.gmra.mxu1 %vm1026_vm3, %v3968_v11  ;;  %5967 = vmatprep.subr.mxu1 %v4420_v10 }
0x4085   :  { %5917 = vmatprep.mubr.msk.f32.mxu1 %vm1026_vm3, %v3969_v43  ;;  %5968 = vmatpush3.msra.mxu1 %v4420_v10 }
0x4086   :  { %5969 = vmatprep.subr.mxu1 %v4419_v15 }
0x4087   :  { %5970 = vmatpush3.msra.mxu1 %v4419_v15 }
0x4088   :  { %5918 = vmatmul.mubr.msk.f32.gmra.mxu1 %vm1026_vm3, %v3970_v24  ;;  %5971 = vmatprep.subr.mxu1 %v4418_v17  ;;  %v4267_v24 = vld [vmem:[%s7607_s3 + $0xe8] sm:$0xff] }
0x4089   :  { %5920 = vmatprep.mubr.msk.f32.mxu1 %vm1026_vm3, %v3971_v22  ;;  %5972 = vmatpush3.msra.mxu1 %v4418_v17  ;;  %v4268_v17 = vld [vmem:[%s7607_s3 + $0xf0] sm:$0xff] }
0x408a   :  { %5973 = vmatprep.subr.mxu1 %v4417_v28 }
0x408b   :  { %5974 = vmatpush3.msra.mxu1 %v4417_v28  ;;  %v4568_v28 = vld [vmem:[%s7607_s3 + $0x160] sm:$0xff] }
0x408c   :  { %5921 = vmatmul.mubr.msk.f32.gmra.mxu1 %vm1026_vm3, %v3972_v29 }
0x408d   :  { %5975 = vmatprep.mubr.msk.f32.mxu1 %vm1026_vm3, %v4409_v2 }
0x4090   :  { %5976 = vmatmul.mubr.msk.f32.vlgmr.msra.gmra.mxu1 %vm1026_vm3, %v4410_v41 }
0x4091   :  { %5978 = vmatprep.mubr.msk.f32.mxu1 %vm1026_vm3, %v4411_v36  ;;  %v5090_v36 = vld [vmem:[%s7607_s3 + $0xe0] ss:$0 sm:$0xff] }
0x4094   :  { %5979 = vmatmul.mubr.msk.f32.gmra.mxu1 %vm1026_vm3, %v4412_v31 }
0x4095   :  { %5981 = vmatprep.mubr.msk.f32.mxu1 %vm1026_vm3, %v4413_v26 }
0x4098   :  { %5982 = vmatmul.mubr.msk.f32.gmra.mxu1 %vm1026_vm3, %v4414_v57 }
0x4099   :  { %5984 = vmatprep.mubr.msk.f32.mxu1 %vm1026_vm3, %v4415_v18 }
0x4134   :  { %v3854_v9 = vpop.f32.mrf.mxu1 }
0x4135   :  { %v3855_v32 = vadd.f32 %v6949_v46, %v3854_v9 }
0x4136   :  { %v5887_v20 = vpop.f32.mrf.mxu1 }
0x4137   :  { %6207 = vtanh.f32 %v3855_v32 }
0x4140   :  { %v5913_v21 = vpop.f32.mrf.mxu1 }
0x4141   :  { %v4080_v50 = vadd.f32 %v5913_v21, %v5081_v25 }
0x4142   :  { %v4074_v61 = vpop.f32.mrf.mxu1 }
0x4143   :  { %v4075_v42 = vadd.f32 %v5081_v25, %v4074_v61 }
0x4144   :  { %v6208_v48 = vpop.eup %6207  ;;  %v5916_v51 = vpop.f32.mrf.mxu1 }
0x4145   :  { %6209 = vtanh.f32 %v4075_v42  ;;  %5897 = vmatmul.mubr.msk.f32.vlgmr.msra.gmra.mxu0 %vm173_vm2, %v6208_v48  ;;  %v4090_v46 = vadd.f32 %v5916_v51, %v5081_v25 }
0x4146   :  { %6211 = vtanh.f32 %v4080_v50  ;;  %v4084_v14 = vpop.f32.mrf.mxu1  ;;  %5924 = vmatpush3.msra.mxu0 %v4124_v39 }
0x4147   :  { %v4085_v44 = vadd.f32 %v5081_v25, %v4084_v14  ;;  %5925 = vmatprep.subr.mxu0 %v4123_v53  ;;  %v7402_v14 = vld [vmem:[%s7607_s3 + $0x140] ss:$0 sm:$0xff] }
0x4148   :  { %v5919_v0 = vpop.f32.mrf.mxu1  ;;  %5926 = vmatpush3.msra.mxu0 %v4123_v53 }
0x4149   :  { %6213 = vtanh.f32 %v4085_v44  ;;  %5927 = vmatprep.subr.mxu0 %v4122_v12  ;;  %v4100_v34 = vadd.f32 %v5919_v0, %v5081_v25 }
0x414a   :  { %6215 = vtanh.f32 %v4090_v46  ;;  %v4094_v5 = vpop.f32.mrf.mxu1  ;;  %5928 = vmatpush3.msra.mxu0 %v4122_v12 }
0x414b   :  { %v4095_v56 = vadd.f32 %v5081_v25, %v4094_v5  ;;  %5929 = vmatprep.subr.mxu0 %v4121_v40 }
0x414c   :  { %v5922_v59 = vpop.f32.mrf.mxu1  ;;  %5930 = vmatpush3.msra.mxu0 %v4121_v40 }
0x414d   :  { %6217 = vtanh.f32 %v4095_v56  ;;  %v4110_v47 = vadd.f32 %v5922_v59, %v5081_v25  ;;  %5943 = vmatprep.subr.mxu0 %v4270_v4 }
0x414e   :  { %6219 = vtanh.f32 %v4100_v34  ;;  %v4104_v62 = vpop.f32.mrf.mxu1 }
0x414f   :  { %v4105_v37 = vadd.f32 %v5081_v25, %v4104_v62  ;;  %v4566_v62 = vld [vmem:[%s7607_s3 + $0x150] sm:$0xff] }
0x4150   :  { %v5977_v31 = vpop.f32.mrf.mxu1 }
0x4151   :  { %6221 = vtanh.f32 %v4105_v37  ;;  %v4524_v5 = vadd.f32 %v5977_v31, %v7402_v14 }
0x4152   :  { %v6210_v52 = vpop.eup %6209  ;;  %6223 = vtanh.f32 %v4110_v47  ;;  %v4518_v9 = vpop.f32.mrf.mxu1 }
0x4153   :  { %v6212_v6 = vpop.eup %6211  ;;  %5931 = vmatprep.mubr.msk.f32.mxu0 %vm173_vm2, %v6210_v52  ;;  %v4519_v0 = vadd.f32 %v7402_v14, %v4518_v9 }
0x4154   :  { %5932 = vmatmul.mubr.msk.f32.vlgmr.msra.gmra.mxu0 %vm173_vm2, %v6212_v6  ;;  %v5980_v50 = vpop.f32.mrf.mxu1 }
0x4155   :  { %5944 = vmatpush3.msra.mxu0 %v4270_v4 }
0x4156   :  { %v6214_v7 = vpop.eup %6213  ;;  %5945 = vmatprep.subr.mxu0 %v4269_v1  ;;  %v4528_v53 = vpop.f32.mrf.mxu1 }
0x4157   :  { %v6216_v45 = vpop.eup %6215  ;;  %5934 = vmatprep.mubr.msk.f32.mxu0 %vm173_vm2, %v6214_v7  ;;  %5946 = vmatpush3.msra.mxu0 %v4269_v1  ;;  %v4529_v59 = vadd.f32 %v7402_v14, %v4528_v53  ;;  %v4565_v7 = vld [vmem:[%s7607_s3 + $0x148] sm:$0xff] }
0x4158   :  { %5935 = vmatmul.mubr.msk.f32.gmra.mxu0 %vm173_vm2, %v6216_v45  ;;  %5947 = vmatprep.subr.mxu0 %v4268_v17  ;;  %v5983_v34 = vpop.f32.mrf.mxu1  ;;  %v7473_v53 = vld [vmem:[%s7607_s3 + $0x168] ss:$0 sm:$0xff] }
0x4159   :  { %5948 = vmatpush3.msra.mxu0 %v4268_v17 }
0x415a   :  { %v6218_v10 = vpop.eup %6217  ;;  %5949 = vmatprep.subr.mxu0 %v4267_v24  ;;  %v4538_v47 = vpop.f32.mrf.mxu1 }
0x415b   :  { %v6220_v11 = vpop.eup %6219  ;;  %5937 = vmatprep.mubr.msk.f32.mxu0 %vm173_vm2, %v6218_v10  ;;  %5950 = vmatpush3.msra.mxu0 %v4267_v24  ;;  %v4539_v6 = vadd.f32 %v7402_v14, %v4538_v47 }
0x415c   :  { %5938 = vmatmul.mubr.msk.f32.gmra.mxu0 %vm173_vm2, %v6220_v11  ;;  %5987 = vmatprep.subr.mxu0 %v4568_v28 }
0x415e   :  { %v6222_v15 = vpop.eup %6221 }
0x415f   :  { %v6224_v43 = vpop.eup %6223  ;;  %5940 = vmatprep.mubr.msk.f32.mxu0 %vm173_vm2, %v6222_v15 }
0x4160   :  { %5941 = vmatmul.mubr.msk.f32.gmra.mxu0 %vm173_vm2, %v6224_v43 }
0x4205   :  { %v3928_v22 = vpop.f32.mrf.mxu0 }
0x4206   :  { %v7390_v13 = vadd.f32 %v6966_v19, %v3928_v22  ;;  %v4714_v22 = vld [vmem:[%s7607_s3 + $0x188] sm:$0xff] }
0x4207   :  { %v5898_v29 = vpop.f32.mrf.mxu0  ;;  %6007 = vmatprep.subr.mxu1 %v4714_v22 }
0x4208   :  { %v3932_v2 = vmul.f32 0.5, %v7390_v13  ;;  %6008 = vmatpush3.msra.mxu1 %v4714_v22  ;;  %v4713_v29 = vld [vmem:[%s7607_s3 + $0x180] sm:$0xff] }
0x4209   :  { %6009 = vmatprep.subr.mxu1 %v4713_v29 }
0x420a   :  { %v3933_v41 = vmul.f32 1.442695, %v3932_v2  ;;  %v4712_v2 = vld [vmem:[%s7607_s3 + $0x178] sm:$0xff]  ;;  %6010 = vmatpush3.msra.mxu1 %v4713_v29 }
0x420b   :  { %6011 = vmatprep.subr.mxu1 %v4712_v2 }
0x420c   :  { %6225 = vpow2.f32 %v3933_v41  ;;  %6012 = vmatpush3.msra.mxu1 %v4712_v2  ;;  %v4711_v41 = vld [vmem:[%s7607_s3 + $0x170] sm:$0xff] }
0x420d   :  { %6013 = vmatprep.subr.mxu1 %v4711_v41 }
0x420e   :  { %6014 = vmatpush3.msra.mxu1 %v4711_v41 }
0x4214   :  { %v5933_v26 = vpop.f32.mrf.mxu0 }
0x4215   :  { %v4226_v57 = vadd.f32 %v5933_v26, %v5090_v36 }
0x4216   :  { %v4220_v18 = vpop.f32.mrf.mxu0 }
0x4217   :  { %v4221_v39 = vadd.f32 %v5090_v36, %v4220_v18  ;;  %v5099_v18 = vld [vmem:[%s7607_s3 + $0x108] ss:$0 sm:$0xff] }
0x4218   :  { %v5936_v32 = vpop.f32.mrf.mxu0 }
0x4219   :  { %v6226_v20 = vpop.eup %6225  ;;  %6227 = vtanh.f32 %v4221_v39  ;;  %v4236_v19 = vadd.f32 %v5936_v32, %v5090_v36 }
0x421a   :  { %6229 = vtanh.f32 %v4226_v57  ;;  %v4230_v25 = vpop.f32.mrf.mxu0  ;;  %3936 = vrot.lane.b32.xlu1 %v6226_v20, %s6279_s23 }
0x421b   :  { %v4231_v21 = vadd.f32 %v5090_v36, %v4230_v25 }
0x421c   :  { %v5939_v61 = vpop.f32.mrf.mxu0 }
0x421d   :  { %6231 = vtanh.f32 %v4231_v21  ;;  %v4246_v42 = vadd.f32 %v5939_v61, %v5090_v36 }
0x421e   :  { %6233 = vtanh.f32 %v4236_v19  ;;  %v4240_v48 = vpop.f32.mrf.mxu0  ;;  %4857 = vrot.lane.b32.xlu1 %v6969_v23, %s6280_s7 }
0x421f   :  { %v4241_v51 = vadd.f32 %v5090_v36, %v4240_v48 }
0x4220   :  { %v5942_v46 = vpop.f32.mrf.mxu0 }
0x4221   :  { %6235 = vtanh.f32 %v4241_v51  ;;  %v4256_v12 = vadd.f32 %v5942_v46, %v5090_v36 }
0x4222   :  { %6237 = vtanh.f32 %v4246_v42  ;;  %v4250_v44 = vpop.f32.mrf.mxu0  ;;  %4861 = vrot.lane.b32.xlu1 %v7057_v55, %s6280_s7  ;;  %v4567_v55 = vld [vmem:[%s7607_s3 + $0x158] sm:$0xff] }
0x4223   :  { %v4251_v40 = vadd.f32 %v5090_v36, %v4250_v44  ;;  %v32_v36 = vld [vmem:[%s7608_s1 + $0x38] sm:$0xff] }
0x4225   :  { %6239 = vtanh.f32 %v4251_v40 }
0x4226   :  { %v6228_v23 = vpop.eup %6227  ;;  %6241 = vtanh.f32 %v4256_v12  ;;  %4865 = vrot.lane.b32.xlu1 %v7143_v27, %s6280_s7  ;;  %v4534_v27 = vadd.f32 %v5980_v50, %v7402_v14 }
0x4227   :  { %v6230_v56 = vpop.eup %6229  ;;  %6243 = vtanh.f32 %v4519_v0  ;;  %5951 = vmatprep.mubr.msk.f32.mxu0 %vm173_vm2, %v6228_v23 }
0x4228   :  { %5952 = vmatmul.mubr.msk.f32.vlgmr.msra.gmra.mxu0 %vm173_vm2, %v6230_v56  ;;  %6245 = vtanh.f32 %v4524_v5 }
0x4229   :  { %5988 = vmatpush3.msra.mxu0 %v4568_v28  ;;  %6247 = vtanh.f32 %v4529_v59 }
0x422a   :  { %v6232_v37 = vpop.eup %6231  ;;  %4869 = vrot.lane.b32.xlu1 %v7237_v38, %s6280_s7  ;;  %5989 = vmatprep.subr.mxu0 %v4567_v55  ;;  %6249 = vtanh.f32 %v4534_v27  ;;  %v4544_v38 = vadd.f32 %v5983_v34, %v7402_v14 }
0x422b   :  { %v6234_v52 = vpop.eup %6233  ;;  %5954 = vmatprep.mubr.msk.f32.mxu0 %vm173_vm2, %v6232_v37  ;;  %5990 = vmatpush3.msra.mxu0 %v4567_v55  ;;  %6251 = vtanh.f32 %v4539_v6 }
0x422c   :  { %5955 = vmatmul.mubr.msk.f32.gmra.mxu0 %vm173_vm2, %v6234_v52  ;;  %5991 = vmatprep.subr.mxu0 %v4566_v62  ;;  %6253 = vtanh.f32 %v4544_v38 }
0x422d   :  { %5992 = vmatpush3.msra.mxu0 %v4566_v62 }
0x422e   :  { %v6236_v45 = vpop.eup %6235  ;;  %5993 = vmatprep.subr.mxu0 %v4565_v7 }
0x422f   :  { %v6238_v10 = vpop.eup %6237  ;;  %5957 = vmatprep.mubr.msk.f32.mxu0 %vm173_vm2, %v6236_v45  ;;  %5994 = vmatpush3.msra.mxu0 %v4565_v7 }
0x4230   :  { %5958 = vmatmul.mubr.msk.f32.gmra.mxu0 %vm173_vm2, %v6238_v10 }
0x4232   :  { %v6240_v11 = vpop.eup %6239 }
0x4233   :  { %v6242_v15 = vpop.eup %6241  ;;  %5960 = vmatprep.mubr.msk.f32.mxu0 %vm173_vm2, %v6240_v11 }
0x4234   :  { %v6244_v43 = vpop.eup %6243  ;;  %5961 = vmatmul.mubr.msk.f32.gmra.mxu0 %vm173_vm2, %v6242_v15 }
0x4235   :  { %5995 = vmatprep.mubr.msk.f32.mxu0 %vm173_vm2, %v6244_v43  ;;  %v6246_v4 = vpop.eup %6245  ;;  %v7495_v43 = vld [vmem:[%s7607_s3 + $0x190] ss:$0 sm:$0xff] }
0x4236   :  { %v6248_v1 = vpop.eup %6247 }
0x4237   :  { %v6250_v17 = vpop.eup %6249 }
0x4238   :  { %5996 = vmatmul.mubr.msk.f32.vlgmr.msra.gmra.mxu0 %vm173_vm2, %v6246_v4  ;;  %v6252_v24 = vpop.eup %6251 }
0x4239   :  { %5998 = vmatprep.mubr.msk.f32.mxu0 %vm173_vm2, %v6248_v1  ;;  %v6254_v28 = vpop.eup %6253 }
0x423c   :  { %5999 = vmatmul.mubr.msk.f32.gmra.mxu0 %vm173_vm2, %v6250_v17 }
0x423d   :  { %6001 = vmatprep.mubr.msk.f32.mxu0 %vm173_vm2, %v6252_v24 }
0x4240   :  { %6002 = vmatmul.mubr.msk.f32.gmra.mxu0 %vm173_vm2, %v6254_v28 }
0x428c   :  { %v3937_v31 = vpop.permute.xlu1 %3936 }
0x428d   :  { %v3939_v26 = vmul.f32 %v3937_v31, %v32_v36 }
0x428f   :  { %v7455_v57 = vadd.f32 %v3939_v26, %v7390_v13 }
0x4291   :  { %4406 = vrot.lane.b32.xlu0 %v7455_v57, %s6278_s26  ;;  %s6281_s26 = smov 48  }
0x4295   :  { %4859 = vrot.lane.b32.xlu0 %v7014_v3, %s6280_s7 }
0x4299   :  { %4863 = vrot.lane.b32.xlu0 %v7100_v60, %s6280_s7 }
0x429d   :  { %4867 = vrot.lane.b32.xlu0 %v7186_v63, %s6280_s7 }
0x42a1   :  { %4871 = vrot.lane.b32.xlu0 %v7390_v13, %s6280_s7 }
0x42e8   :  { %v5953_v39 = vpop.f32.mrf.mxu0 }
0x42e9   :  { %v4372_v9 = vadd.f32 %v5953_v39, %v5099_v18 }
0x42ea   :  { %v4366_v32 = vpop.f32.mrf.mxu0 }
0x42eb   :  { %v4367_v20 = vadd.f32 %v5099_v18, %v4366_v32  ;;  %4891 = vrot.lane.b32.xlu0 %v4372_v9, %s6281_s26  ;;  %v4858_v9 = vpop.permute.xlu1 %4857 }
0x42ec   :  { %v5956_v3 = vpop.f32.mrf.mxu0 }
0x42ed   :  { %v4382_v19 = vadd.f32 %v5956_v3, %v5099_v18  ;;  %4889 = vrot.lane.b32.xlu1 %v4367_v20, %s6281_s26 }
0x42ee   :  { %v4376_v60 = vpop.f32.mrf.mxu0 }
0x42ef   :  { %v4377_v25 = vadd.f32 %v5099_v18, %v4376_v60  ;;  %4895 = vrot.lane.b32.xlu0 %v4382_v19, %s6281_s26  ;;  %v4862_v20 = vpop.permute.xlu1 %4861 }
0x42f0   :  { %v5959_v63 = vpop.f32.mrf.mxu0 }
0x42f1   :  { %v4392_v21 = vadd.f32 %v5959_v63, %v5099_v18  ;;  %4893 = vrot.lane.b32.xlu1 %v4377_v25, %s6281_s26 }
0x42f2   :  { %v4386_v13 = vpop.f32.mrf.mxu0 }
0x42f3   :  { %v4387_v50 = vadd.f32 %v5099_v18, %v4386_v13  ;;  %4899 = vrot.lane.b32.xlu0 %v4392_v21, %s6281_s26  ;;  %v4866_v19 = vpop.permute.xlu1 %4865 }
0x42f4   :  { %v5962_v61 = vpop.f32.mrf.mxu0 }
0x42f5   :  { %v4402_v42 = vadd.f32 %v5962_v61, %v5099_v18  ;;  %4897 = vrot.lane.b32.xlu1 %v4387_v50, %s6281_s26 }
0x42f6   :  { %v4396_v48 = vpop.f32.mrf.mxu0 }
0x42f7   :  { %v4397_v51 = vadd.f32 %v5099_v18, %v4396_v48  ;;  %4903 = vrot.lane.b32.xlu0 %v4402_v42, %s6281_s26  ;;  %v7513_v25 = vpop.permute.xlu1 %4869 }
0x42f8   :  { %v5997_v46 = vpop.f32.mrf.mxu0 }
0x42f9   :  { %4901 = vrot.lane.b32.xlu1 %v4397_v51, %s6281_s26  ;;  %v4670_v12 = vadd.f32 %v5997_v46, %v7473_v53  ;;  %v4945_v46 = vsel %vm40_vm1, %v6977_v33, %v4858_v9 }
0x42fa   :  { %v4664_v44 = vpop.f32.mrf.mxu0 }
0x42fb   :  { %v4665_v0 = vadd.f32 %v7473_v53, %v4664_v44 }
0x42fc   :  { %v6000_v40 = vpop.f32.mrf.mxu0 }
0x42fd   :  { %6255 = vtanh.f32 %v4665_v0  ;;  %v4680_v34 = vadd.f32 %v6000_v40, %v7473_v53 }
0x42fe   :  { %6257 = vtanh.f32 %v4670_v12  ;;  %v4674_v23 = vpop.f32.mrf.mxu0 }
0x42ff   :  { %v4675_v5 = vadd.f32 %v7473_v53, %v4674_v23  ;;  %v4953_v23 = vsel %vm173_vm2, %v4945_v46, %v4858_v9 }
0x4300   :  { %v6003_v56 = vpop.f32.mrf.mxu0 }
0x4301   :  { %6259 = vtanh.f32 %v4675_v5  ;;  %v4690_v59 = vadd.f32 %v6003_v56, %v7473_v53  ;;  %v4947_v5 = vsel %vm40_vm1, %v7065_v35, %v4862_v20 }
0x4302   :  { %6261 = vtanh.f32 %v4680_v34  ;;  %v4684_v55 = vpop.f32.mrf.mxu0 }
0x4303   :  { %v4685_v47 = vadd.f32 %v7473_v53, %v4684_v55  ;;  %v4407_v62 = vpop.permute.xlu0 %4406 }
0x4304   :  { %v4416_v37 = vsel %vm173_vm2, %v6667_v30, %v4407_v62 }
0x4305   :  { %6263 = vtanh.f32 %v4685_v47  ;;  %5985 = vmatmul.mubr.msk.f32.gmra.mxu1 %vm1026_vm3, %v4416_v37 }
0x4306   :  { %6265 = vtanh.f32 %v4690_v59 }
0x4307   :  { %v4860_v39 = vpop.permute.xlu0 %4859 }
0x4308   :  { %v4946_v48 = vsel %vm40_vm1, %v7022_v58, %v4860_v39 }
0x4309   :  { %v4954_v44 = vsel %vm173_vm2, %v4946_v48, %v4860_v39 }
0x430a   :  { %v6256_v27 = vpop.eup %6255 }
0x430b   :  { %v6258_v52 = vpop.eup %6257  ;;  %6015 = vmatprep.mubr.msk.f32.mxu1 %vm173_vm2, %v6256_v27  ;;  %v4864_v32 = vpop.permute.xlu0 %4863  ;;  %v4955_v27 = vsel %vm173_vm2, %v4947_v5, %v4862_v20 }
0x430c   :  { %6016 = vmatmul.mubr.msk.f32.vlgmr.msra.gmra.mxu1 %vm173_vm2, %v6258_v52  ;;  %v4948_v0 = vsel %vm40_vm1, %v7108_v8, %v4864_v32 }
0x430d   :  { %v4956_v55 = vsel %vm173_vm2, %v4948_v0, %v4864_v32  ;;  %v4951_v32 = vsel %vm40_vm1, %v7251_v54, %v7513_v25 }
0x430e   :  { %v6260_v6 = vpop.eup %6259 }
0x430f   :  { %v6262_v7 = vpop.eup %6261  ;;  %6018 = vmatprep.mubr.msk.f32.mxu1 %vm173_vm2, %v6260_v6  ;;  %v4868_v3 = vpop.permute.xlu0 %4867  ;;  %v4949_v6 = vsel %vm40_vm1, %v7151_v49, %v4866_v19 }
0x4310   :  { %6019 = vmatmul.mubr.msk.f32.gmra.mxu1 %vm173_vm2, %v6262_v7  ;;  %v4950_v47 = vsel %vm40_vm1, %v7200_v16, %v4868_v3  ;;  %v4957_v49 = vsel %vm173_vm2, %v4949_v6, %v4866_v19 }
0x4312   :  { %v6264_v45 = vpop.eup %6263 }
0x4313   :  { %v6266_v38 = vpop.eup %6265  ;;  %6021 = vmatprep.mubr.msk.f32.mxu1 %vm173_vm2, %v6264_v45  ;;  %v7511_v60 = vpop.permute.xlu0 %4871 }
0x4314   :  { %6022 = vmatmul.mubr.msk.f32.gmra.mxu1 %vm173_vm2, %v6266_v38  ;;  %v4958_v38 = vsel %vm173_vm2, %v4950_v47, %v4868_v3 }
0x435d   :  { %v4892_v63 = vpop.permute.xlu0 %4891 }
0x435e   :  { %v4962_v40 = vsel %vm1026_vm3, %v4954_v44, %v4892_v63 }
0x435f   :  { %v4890_v21 = vpop.permute.xlu1 %4889 }
0x4360   :  { %v4961_v33 = vsel %vm1026_vm3, %v4953_v23, %v4890_v21 }
0x4361   :  { %v4896_v13 = vpop.permute.xlu0 %4895 }
0x4362   :  { %v4964_v62 = vsel %vm1026_vm3, %v4956_v55, %v4896_v13 }
0x4363   :  { %v4894_v50 = vpop.permute.xlu1 %4893 }
0x4364   :  { %v4963_v7 = vsel %vm1026_vm3, %v4955_v27, %v4894_v50 }
0x4365   :  { %v4900_v61 = vpop.permute.xlu0 %4899 }
0x4367   :  { %v4898_v42 = vpop.permute.xlu1 %4897 }
0x4369   :  { %v7517_v51 = vpop.permute.xlu0 %4903 }
0x436b   :  { %v7521_v12 = vpop.permute.xlu1 %4901 }
0x43c5   :  { %v5986_v30 = vpop.f32.mrf.mxu1 }
0x43c6   :  { %v4554_v10 = vadd.f32 %v5986_v30, %v7402_v14 }
0x43c7   :  { %v4548_v11 = vpop.f32.mrf.mxu1 }
0x43c8   :  { %v4549_v15 = vadd.f32 %v7402_v14, %v4548_v11 }
0x43ca   :  { %6267 = vtanh.f32 %v4549_v15 }
0x43cb   :  { %6269 = vtanh.f32 %v4554_v10  ;;  %v4966_v10 = vsel %vm1026_vm3, %v4958_v38, %v4900_v61 }
0x43cc   :  { %v6017_v4 = vpop.f32.mrf.mxu1 }
0x43cd   :  { %v4816_v1 = vadd.f32 %v6017_v4, %v7495_v43 }
0x43ce   :  { %v4810_v17 = vpop.f32.mrf.mxu1 }
0x43cf   :  { %v4811_v24 = vadd.f32 %v7495_v43, %v4810_v17  ;;  %4923 = vrot.lane.b32.xlu0 %v4816_v1, %s6282_s30  ;;  %v4965_v1 = vsel %vm1026_vm3, %v4957_v49, %v4898_v42 }
0x43d0   :  { %v6020_v28 = vpop.f32.mrf.mxu1 }
0x43d1   :  { %v4826_v22 = vadd.f32 %v6020_v28, %v7495_v43  ;;  %4921 = vrot.lane.b32.xlu1 %v4811_v24, %s6282_s30 }
0x43d2   :  { %v4820_v14 = vpop.f32.mrf.mxu1 }
0x43d3   :  { %v4821_v29 = vadd.f32 %v7495_v43, %v4820_v14  ;;  %4927 = vrot.lane.b32.xlu0 %v4826_v22, %s6282_s30 }
0x43d4   :  { %v6023_v2 = vpop.f32.mrf.mxu1 }
0x43d5   :  { %v4836_v41 = vadd.f32 %v6023_v2, %v7495_v43  ;;  %4925 = vrot.lane.b32.xlu1 %v4821_v29, %s6282_s30 }
0x43d6   :  { %v4830_v36 = vpop.f32.mrf.mxu1 }
0x43d7   :  { %v6268_v31 = vpop.eup %6267  ;;  %v4831_v26 = vadd.f32 %v7495_v43, %v4830_v36  ;;  %4931 = vrot.lane.b32.xlu0 %v4836_v41, %s6282_s30 }
0x43d8   :  { %v6270_v18 = vpop.eup %6269  ;;  %6004 = vmatprep.mubr.msk.f32.mxu0 %vm173_vm2, %v6268_v31 }
0x43d9   :  { %4929 = vrot.lane.b32.xlu1 %v4831_v26, %s6282_s30  ;;  %6005 = vmatmul.mubr.msk.f32.gmra.mxu0 %vm173_vm2, %v6270_v18 }
0x4441   :  { %v4924_v34 = vpop.permute.xlu0 %4923 }
0x4442   :  { %v4971_v58 = vsel %vm4969_vm4, %v4962_v40, %v4924_v34 }
0x4443   :  { %v4980_v56 = vsel %vm4978_vm5, %v4971_v58, 0.0  ;;  %v4922_v59 = vpop.permute.xlu1 %4921 }
0x4444   :  { %4988 = vst [vmem:[%s7609_s4 + $0x8] sm:$0xff] %v4980_v56  ;;  %v4970_v8 = vsel %vm4969_vm4, %v4961_v33, %v4922_v59 }
0x4445   :  { %v4979_v35 = vsel %vm4978_vm5, %v4970_v8, 0.0  ;;  %v4928_v37 = vpop.permute.xlu0 %4927 }
0x4446   :  { %4987 = vst [vmem:[%s7609_s4] sm:$0xff] %v4979_v35  ;;  %v4973_v52 = vsel %vm4969_vm4, %v4964_v62, %v4928_v37 }
0x4447   :  { %v4982_v16 = vsel %vm4978_vm5, %v4973_v52, 0.0  ;;  %v4926_v45 = vpop.permute.xlu1 %4925 }
0x4448   :  { %4990 = vst [vmem:[%s7609_s4 + $0x18] sm:$0xff] %v4982_v16  ;;  %v4972_v30 = vsel %vm4969_vm4, %v4963_v7, %v4926_v45 }
0x4449   :  { %v4981_v11 = vsel %vm4978_vm5, %v4972_v30, 0.0  ;;  %v4932_v15 = vpop.permute.xlu0 %4931 }
0x444a   :  { %4989 = vst [vmem:[%s7609_s4 + $0x10] sm:$0xff] %v4981_v11  ;;  %v4975_v4 = vsel %vm4969_vm4, %v4966_v10, %v4932_v15 }
0x444b   :  { %v4984_v17 = vsel %vm4978_vm5, %v4975_v4, 0.0  ;;  %v4930_v24 = vpop.permute.xlu1 %4929 }
0x444c   :  { %4992 = vst [vmem:[%s7609_s4 + $0x28] sm:$0xff] %v4984_v17  ;;  %v4974_v28 = vsel %vm4969_vm4, %v4965_v1, %v4930_v24 }
0x444d   :  { %v4983_v22 = vsel %vm4978_vm5, %v4974_v28, 0.0 }
0x444e   :  { %4991 = vst [vmem:[%s7609_s4 + $0x20] sm:$0xff] %v4983_v22 }
0x4499   :  { %v6006_v14 = vpop.f32.mrf.mxu0 }
0x449a   :  { %v4700_v29 = vadd.f32 %v6006_v14, %v7473_v53 }
0x449b   :  { %v4694_v2 = vpop.f32.mrf.mxu0 }
0x449c   :  { %v4695_v41 = vadd.f32 %v7473_v53, %v4694_v2  ;;  %v4952_v53 = vsel %vm40_vm1, %v7455_v57, %v7511_v60 }
0x449d   :  { %v4960_v20 = vsel %vm173_vm2, %v4952_v53, %v7511_v60 }
0x449e   :  { %6271 = vtanh.f32 %v4695_v41  ;;  %v4968_v3 = vsel %vm1026_vm3, %v4960_v20, %v7517_v51 }
0x449f   :  { %6273 = vtanh.f32 %v4700_v29 }
0x44ab   :  { %v6272_v36 = vpop.eup %6271 }
0x44ac   :  { %v6274_v31 = vpop.eup %6273  ;;  %6024 = vmatprep.mubr.msk.f32.mxu1 %vm173_vm2, %v6272_v36 }
0x44ad   :  { %6025 = vmatmul.mubr.msk.f32.gmra.mxu1 %vm173_vm2, %v6274_v31 }
0x456d   :  { %v6026_v26 = vpop.f32.mrf.mxu1 }
0x456e   :  { %v4846_v18 = vadd.f32 %v6026_v26, %v7495_v43 }
0x456f   :  { %v4840_v39 = vpop.f32.mrf.mxu1 }
0x4570   :  { %v4841_v9 = vadd.f32 %v7495_v43, %v4840_v39  ;;  %4935 = vrot.lane.b32.xlu0 %v4846_v18, %s6282_s30  ;;  %v4959_v43 = vsel %vm173_vm2, %v4951_v32, %v7513_v25 }
0x4571   :  { %v4967_v21 = vsel %vm1026_vm3, %v4959_v43, %v7521_v12 }
0x4572   :  { %4933 = vrot.lane.b32.xlu1 %v4841_v9, %s6282_s30 }
0x45e2   :  { %v4936_v19 = vpop.permute.xlu0 %4935 }
0x45e3   :  { %v4977_v63 = vsel %vm4969_vm4, %v4968_v3, %v4936_v19 }
0x45e4   :  { %v4986_v57 = vsel %vm4978_vm5, %v4977_v63, 0.0  ;;  %v4934_v13 = vpop.permute.xlu1 %4933 }
0x45e5   :  { %4994 = vst [vmem:[%s7609_s4 + $0x38] sm:$0xff] %v4986_v57  ;;  %v4976_v54 = vsel %vm4969_vm4, %v4967_v21, %v4934_v13 }
0x45e6   :  { %v4985_v60 = vsel %vm4978_vm5, %v4976_v54, 0.0 }
0x45e7   :  { %4993 = vst [vmem:[%s7609_s4 + $0x30] sm:$0xff] %v4985_v60 }

</bundles_post_ra>
